<compile_context>
chip_gen: v6e
topology: v6e:2x2x1
jax: 0.10.0
libtpu: 0.0.40
codegen_flags: <defaults>
</compile_context>

<pallas_src>
import jax
import jax.numpy as jnp
import numpy as np
from jax.experimental import pallas as pl
from jax.experimental.pallas import tpu as pltpu

INPUT_DIM = 3
HIDDEN_DIM = 8
EDGE_DIM = 2
OUTPUT_DIM = 4
N_ITERS = 1

_D, _H, _ED, _O = INPUT_DIM, HIDDEN_DIM, EDGE_DIM, OUTPUT_DIM
_MID_W = (3 * _H + 2 * _D) // 2        # 15
_START_W = 2 * (_H + _D)               # 22
_O_PAD = 8                             # logits padded to a full sublane group
_SLAB_COLS = 128


def _slab_layout():
    # name -> (rows, cols): weights stored transposed [out, in], bias appended
    # as one extra column.  Row offsets are 8-aligned so in-kernel slices are
    # sublane-tile aligned; unused rows stay zero (exploited for edge3 padding).
    entries = (
        ("norm", _D, 1),
        ("lin1", 2 * _H, _D + 1),
        ("lin2", 2 * _H, 2 * _H + 1),
        ("lin3", _H, 2 * _H + 1),
        ("conv1", _MID_W, _START_W + 1),
        ("conv2", _H, _MID_W + 1),
        ("edge1", 2 * _H, 2 * _H + _ED + 1),
        ("edge2", 2 * _H, 2 * _H + 1),
        ("edge3", _O, 2 * _H + 1),
    )
    off, r = {}, 0
    for name, rows, _ in entries:
        off[name] = r
        r += -(-rows // 8) * 8
    return off, r


_SLAB_OFF, _SLAB_ROWS = _slab_layout()


def _round_up(a, b):
    return (a + b - 1) // b * b


def _dot(a, b):
    return jnp.dot(a, b, preferred_element_type=jnp.float32)


def _elu(v):
    return jnp.where(v > 0.0, v, jnp.exp(jnp.minimum(v, 0.0)) - 1.0)


def _slab_lin(slab_ref, name, out_dim, in_dims):
    """Static views into the packed weight slab -> ([W^T pieces...], bias[:, :1])."""
    off = _SLAB_OFF[name]
    col, ws = 0, []
    for c in in_dims:
        ws.append(slab_ref[off:off + out_dim, col:col + c])
        col += c
    bias = slab_ref[off:off + out_dim, col:col + 1]
    return ws, bias


# --------------------------------------------------------------------------------------
# Fused kernel.  grid = (phase, edge_tile), both "arbitrary":
#   phase 0: datanorm + inputnet + folded EdgeConv message + scatter-add -> hcat scratch
#   phase 1: folded edge network + log-softmax -> [8, E_pad] output
# --------------------------------------------------------------------------------------
def _edgenet_kernel(rc_ref, colcm_ref, ea_ref, xt_ref, slab_ref, out_ref,
                    hcat_ref, pconv_ref, qedge_ref):
    n = xt_ref.shape[-1]
    te = rc_ref.shape[-1]
    phase = pl.program_id(0)
    tile = pl.program_id(1)

    # ---- one-time setup: datanorm + inputnet + conv1 fold ----
    @pl.when((phase == 0) & (tile == 0))
    def _():
        norm = slab_ref[_SLAB_OFF["norm"]:_SLAB_OFF["norm"] + _D, 0:1]
        xn = xt_ref[...] * norm                                            # [d, N]
        (w1,), b1 = _slab_lin(slab_ref, "lin1", 2 * _H, (_D,))
        a = jnp.tanh(_dot(w1, xn) + b1)
        (w2,), b2 = _slab_lin(slab_ref, "lin2", 2 * _H, (2 * _H,))
        a = jnp.tanh(_dot(w2, a) + b2)
        (w3,), b3 = _slab_lin(slab_ref, "lin3", _H, (2 * _H,))
        a = jnp.tanh(_dot(w3, a) + b3)                                     # [h, N]
        # conv1 fold: Wci@x_i + Wcd@(x_j-x_i) = (Wci-Wcd)@x_i + Wcd@x_j, with
        # x_i = hx[col], x_j = hx[row], hx = [H | x_norm].  Pre-multiply the
        # weights through hx so each edge tile needs one gather-matmul.
        (wci, wcd), _bc = _slab_lin(slab_ref, "conv1", _MID_W, (_H + _D, _H + _D))
        dci = wci - wcd
        pconv_ref[:, 0:n] = _dot(dci[:, :_H], a) + _dot(dci[:, _H:], xn)       # P_col
        pconv_ref[:, n:2 * n] = _dot(wcd[:, :_H], a) + _dot(wcd[:, _H:], xn)   # P_row
        hcat_ref[...] = jnp.zeros_like(hcat_ref)

    # Stacked gather one-hot [2N, TE]: rows [0,N) match the col (target) node id,
    # rows [N,2N) match the row (source) node id.  Padded edges carry id == 2N so
    # they match nothing -> gather zeros, scatter nothing.
    row_ids = rc_ref[0:1, :]                                               # [1, TE]
    col_ids = rc_ref[1:2, :]
    iota2n = jax.lax.broadcasted_iota(jnp.int32, (2 * n, te), 0)
    g_oh = ((iota2n == col_ids) | (iota2n == (row_ids + n))).astype(jnp.float32)

    # ---- phase 0: EdgeConv message + scatter-add (accumulate into VMEM) ----
    @pl.when(phase == 0)
    def _():
        off_c1 = _SLAB_OFF["conv1"]
        bc1 = slab_ref[off_c1:off_c1 + _MID_W, _START_W:_START_W + 1]
        m = _elu(_dot(pconv_ref[...], g_oh) + bc1)                         # [mid, TE]
        (wc2,), bc2 = _slab_lin(slab_ref, "conv2", _H, (_MID_W,))
        m = _elu(_dot(wc2, m) + bc2)                                       # [h, TE]
        # aggr='add': scatter one-hot built directly in [TE, N] orientation so
        # the contraction is a plain matmul (no XLU transpose).
        iota_n = jax.lax.broadcasted_iota(jnp.int32, (te, n), 1)
        s_oh = (iota_n == colcm_ref[...]).astype(jnp.float32)              # [TE, N]
        hcat_ref[...] += _dot(m, s_oh)                                     # [h, N]

    # ---- phase-1 setup: edge1 fold through the finished H_cat ----
    @pl.when((phase == 1) & (tile == 0))
    def _():
        off_e1 = _SLAB_OFF["edge1"]
        w_row = slab_ref[off_e1:off_e1 + 2 * _H, 0:_H]
        w_col = slab_ref[off_e1:off_e1 + 2 * _H, _H:2 * _H]
        hcat = hcat_ref[...]
        qedge_ref[:, 0:n] = _dot(w_col, hcat)                              # Q_col
        qedge_ref[:, n:2 * n] = _dot(w_row, hcat)                          # Q_row

    # ---- phase 1: edge network + log-softmax ----
    @pl.when(phase == 1)
    def _():
        off_e1 = _SLAB_OFF["edge1"]
        w_attr = slab_ref[off_e1:off_e1 + 2 * _H, 2 * _H:2 * _H + _ED]
        be1 = slab_ref[off_e1:off_e1 + 2 * _H, 2 * _H + _ED:2 * _H + _ED + 1]
        e1 = _elu(_dot(qedge_ref[...], g_oh) + _dot(w_attr, ea_ref[...]) + be1)
        (w2,), b2 = _slab_lin(slab_ref, "edge2", 2 * _H, (2 * _H,))
        e2 = _elu(_dot(w2, e1) + b2)
        # edge3 read with 8 output rows (extra rows are zero in the slab) so the
        # store below is a full 8-sublane vreg store.
        (w3,), b3 = _slab_lin(slab_ref, "edge3", _O_PAD, (2 * _H,))
        logits = _dot(w3, e2) + b3                                         # [8, TE]
        rmask = jax.lax.broadcasted_iota(jnp.int32, (_O_PAD, te), 0) < _O
        logits = jnp.where(rmask, logits, jnp.float32(-1e30))
        mx = jnp.max(logits, axis=0, keepdims=True)
        lse = mx + jnp.log(jnp.sum(jnp.exp(logits - mx), axis=0, keepdims=True))
        out_ref[...] = logits - lse


def _build_slab(p):
    h, d = HIDDEN_DIM, INPUT_DIM
    slab = jnp.zeros((_SLAB_ROWS, _SLAB_COLS), jnp.float32)

    def put(slab, name, *pieces):
        off, col = _SLAB_OFF[name], 0
        for piece in pieces:
            r, c = piece.shape
            slab = slab.at[off:off + r, col:col + c].set(piece.astype(jnp.float32))
            col += c
        return slab

    wc1, we1 = p["wc1"], p["we1"]
    slab = put(slab, "norm", p["norm"].reshape(d, 1))
    slab = put(slab, "lin1", p["w1"].T, p["b1"].T)
    slab = put(slab, "lin2", p["w2"].T, p["b2"].T)
    slab = put(slab, "lin3", p["w3"].T, p["b3"].T)
    slab = put(slab, "conv1", wc1[:h + d].T, wc1[h + d:].T, p["bc1"].T)
    slab = put(slab, "conv2", p["wc2"].T, p["bc2"].T)
    slab = put(slab, "edge1", we1[:h].T, we1[h:2 * h].T, we1[2 * h:].T, p["be1"].T)
    slab = put(slab, "edge2", p["we2"].T, p["be2"].T)
    slab = put(slab, "edge3", p["we3"].T, p["be3"].T)
    return slab


def init_params(key):
    ks = jax.random.split(key, 16)
    h, d, ed, o = HIDDEN_DIM, INPUT_DIM, EDGE_DIM, OUTPUT_DIM

    def lin(k, fan_in, fan_out):
        bound = 1.0 / np.sqrt(fan_in)
        kw, kb = jax.random.split(k)
        w = jax.random.uniform(kw, (fan_in, fan_out), jnp.float32, -bound, bound)
        b = jax.random.uniform(kb, (1, fan_out), jnp.float32, -bound, bound)
        return w, b

    p = {}
    p["norm"] = jnp.array([[1.0, 0.5, 2.0]], dtype=jnp.float32)            # datanorm
    p["w1"], p["b1"] = lin(ks[0], d, 2 * h)
    p["w2"], p["b2"] = lin(ks[1], 2 * h, 2 * h)
    p["w3"], p["b3"] = lin(ks[2], 2 * h, h)
    p["wc1"], p["bc1"] = lin(ks[3], _START_W, _MID_W)
    p["wc2"], p["bc2"] = lin(ks[4], _MID_W, h)
    p["we1"], p["be1"] = lin(ks[5], 2 * N_ITERS * h + ed, 2 * h)
    p["we2"], p["be2"] = lin(ks[6], 2 * h, 2 * h)
    p["we3"], p["be3"] = lin(ks[7], 2 * h, o)
    return p


def edgenet_forward(x, edge_index, edge_attr, params, tile_e=None):
    n, d = x.shape
    e = int(edge_attr.shape[0])
    if tile_e is None:
        # Largest multiple of 256 whose per-tile one-hots (~12*N*TE bytes) stay
        # within a small budget -- conservative for v7x's 64 MiB VMEM.
        budget = 6 * 1024 * 1024
        tile_e = max(256, min(2048, (budget // max(12 * n, 1)) // 256 * 256))
        tile_e = min(tile_e, _round_up(max(e, 1), 256))
    tile_e = max(128, _round_up(int(tile_e), 128))
    e_pad = _round_up(max(e, 1), tile_e)
    num_tiles = e_pad // tile_e
    pad = e_pad - e

    # Padded edges carry node id == 2*n: matches neither half of the stacked
    # gather one-hot nor the [0, n) scatter iota -> pure no-ops in both phases.
    fill = jnp.full((pad,), 2 * n, jnp.int32)
    row = jnp.concatenate([edge_index[0].astype(jnp.int32), fill])
    col = jnp.concatenate([edge_index[1].astype(jnp.int32), fill])
    rc = jnp.stack([row, col])                                             # [2, E_pad]
    col_cm = col[:, None]                                                  # [E_pad, 1]
    ea_t = jnp.concatenate(
        [edge_attr.astype(jnp.float32), jnp.zeros((pad, EDGE_DIM), jnp.float32)],
        axis=0).T                                                          # [ed, E_pad]
    x_t = x.astype(jnp.float32).T                                          # [d, N]
    slab = _build_slab(params)                                             # [112, 128]

    mm = lambda m, k, nn: 2 * m * k * nn
    flops = (mm(2 * _H, _D, n) + mm(2 * _H, 2 * _H, n) + mm(_H, 2 * _H, n)          # inputnet
             + 2 * (mm(_MID_W, _H, n) + mm(_MID_W, _D, n)) + 2 * mm(2 * _H, _H, n)  # folds
             + e_pad * 2 * (_MID_W * 2 * n + _H * _MID_W + _H * n                   # phase 0
                            + 2 * _H * 2 * n + 2 * _H * _ED + 4 * _H * _H
                            + _O_PAD * 2 * _H))                                     # phase 1
    trans = 3 * 2 * _H * n + e_pad * (_MID_W + _H + 4 * _H + _O_PAD + 1)
    bytes_acc = (2 * e_pad * 12                       # rc + col_cm, fetched in both phases
                 + e_pad * (4 * _ED + 4 * _O_PAD)     # edge_attr in + logits out
                 + 4 * _D * n + 4 * _SLAB_ROWS * _SLAB_COLS)

    out_t = pl.pallas_call(
        _edgenet_kernel,
        out_shape=jax.ShapeDtypeStruct((_O_PAD, e_pad), jnp.float32),
        grid=(2, num_tiles),
        in_specs=[
            pl.BlockSpec((2, tile_e), lambda p, i: (0, i)),                # row/col packed
            pl.BlockSpec((tile_e, 1), lambda p, i: (i, 0)),                # col, sublane-major
            pl.BlockSpec((EDGE_DIM, tile_e), lambda p, i: (0, p * i)),     # edge_attr (phase 1)
            pl.BlockSpec((INPUT_DIM, n), lambda p, i: (0, 0)),             # x^T (grid-invariant)
            pl.BlockSpec((_SLAB_ROWS, _SLAB_COLS), lambda p, i: (0, 0)),   # weight slab
        ],
        out_specs=pl.BlockSpec((_O_PAD, tile_e), lambda p, i: (0, p * i)),  # written in phase 1
        scratch_shapes=[
            pltpu.VMEM((_H, n), jnp.float32),             # H_cat accumulator (VMEM-resident)
            pltpu.VMEM((_MID_W, 2 * n), jnp.float32),     # P = [P_col | P_row]  (conv1 fold)
            pltpu.VMEM((2 * _H, 2 * n), jnp.float32),     # Q = [Q_col | Q_row]  (edge1 fold)
        ],
        compiler_params=pltpu.CompilerParams(
            dimension_semantics=("arbitrary", "arbitrary"),
            vmem_limit_bytes=32 * 1024 * 1024),
        cost_estimate=pl.CostEstimate(
            flops=int(flops), transcendentals=int(trans), bytes_accessed=int(bytes_acc)),
    )(rc, col_cm, ea_t, x_t, slab)

    return out_t[:OUTPUT_DIM, :e].T                                        # [E, OUTPUT_DIM]


def edgenet_reference(x, edge_index, edge_attr, params):
    """Pure-JAX replica of the PyTorch forward (for validation)."""
    row, col = edge_index[0], edge_index[1]
    n = x.shape[0]
    x_norm = params["norm"] * x
    h = jnp.tanh(x_norm @ params["w1"] + params["b1"])
    h = jnp.tanh(h @ params["w2"] + params["b2"])
    h = jnp.tanh(h @ params["w3"] + params["b3"])
    hx = jnp.concatenate([h, x_norm], axis=-1)
    # EdgeConv: message = nn(cat([x_i, x_j - x_i])), x_i = target (col), x_j = source (row)
    xi, xj = hx[col], hx[row]
    m = _elu(jnp.concatenate([xi, xj - xi], axis=-1) @ params["wc1"] + params["bc1"])
    m = _elu(m @ params["wc2"] + params["bc2"])
    h_cat = jnp.zeros((n, m.shape[1]), m.dtype).at[col].add(m)             # aggr='add'
    ein = jnp.concatenate([h_cat[row], h_cat[col], edge_attr.astype(jnp.float32)], axis=-1)
    e1 = _elu(ein @ params["we1"] + params["be1"])
    e2 = _elu(e1 @ params["we2"] + params["be2"])
    logits = e2 @ params["we3"] + params["be3"]
    m_max = jnp.max(logits, axis=-1, keepdims=True)
    return logits - (m_max + jnp.log(jnp.sum(jnp.exp(logits - m_max), axis=-1, keepdims=True)))


if __name__ == "__main__":
    key = jax.random.PRNGKey(0)
    k_params, k_x, k_row, k_col, k_attr = jax.random.split(key, 5)

    N_NODES, N_EDGES = 64, 700
    params = init_params(k_params)
    x = jax.random.normal(k_x, (N_NODES, INPUT_DIM), dtype=jnp.float32)
    edge_index = jnp.stack([
        jax.random.randint(k_row, (N_EDGES,), 0, N_NODES),
        jax.random.randint(k_col, (N_EDGES,), 0, N_NODES),
    ]).astype(jnp.int32)                                                   # [2, E]
    edge_attr = jax.random.normal(k_attr, (N_EDGES, EDGE_DIM), dtype=jnp.float32)

    ref = edgenet_reference(x, edge_index, edge_attr, params)
    fwd = jax.jit(edgenet_forward, static_argnames=("tile_e",))

    # Default tile (single large edge tile) and an explicit smaller tile that
    # exercises multi-tile accumulation + the padded tail.
    for te in (None, 256):
        out = fwd(x, edge_index, edge_attr, params, tile_e=te)
        out = jax.block_until_ready(out)
        np.testing.assert_allclose(np.asarray(out), np.asarray(ref), rtol=1e-4, atol=1e-4)

    print("KERNEL_OK")
</pallas_src>

<mosaic_0001>
module attributes {stable_mosaic.version = 11 : i64} {
  func.func @_edgenet_kernel(%arg0: i32, %arg1: i32, %arg2: memref<2x768xi32, #tpu.memory_space<vmem>>, %arg3: memref<768x1xi32, #tpu.memory_space<vmem>>, %arg4: memref<2x768xf32, #tpu.memory_space<vmem>>, %arg5: memref<3x64xf32, #tpu.memory_space<vmem>>, %arg6: memref<112x128xf32, #tpu.memory_space<vmem>>, %arg7: memref<8x768xf32, #tpu.memory_space<vmem>>, %arg8: memref<8x64xf32, #tpu.memory_space<vmem>>, %arg9: memref<15x128xf32, #tpu.memory_space<vmem>>, %arg10: memref<16x128xf32, #tpu.memory_space<vmem>>) attributes {dimension_semantics = [#tpu.dimension_semantics<arbitrary>, #tpu.dimension_semantics<arbitrary>], iteration_bounds = array<i64: 2, 1>, scalar_prefetch = 0 : i64, scratch_operands = 3 : i64, tpu.core_type = #tpu.core_type<tc>, window_params = [{transform_indices = @transform_0, window_bounds = array<i64: 2, 768>}, {transform_indices = @transform_1, window_bounds = array<i64: 768, 1>}, {transform_indices = @transform_2, window_bounds = array<i64: 2, 768>}, {pipeline_mode = #tpu.pipeline_mode<synchronous>, transform_indices = @transform_3, window_bounds = array<i64: 3, 64>}, {pipeline_mode = #tpu.pipeline_mode<synchronous>, transform_indices = @transform_4, window_bounds = array<i64: 112, 128>}, {transform_indices = @transform_5, window_bounds = array<i64: 8, 768>}]} {
    %c0_i32 = arith.constant 0 : i32
    %0 = arith.cmpi eq, %arg0, %c0_i32 : i32
    %c0_i32_0 = arith.constant 0 : i32
    %1 = arith.cmpi eq, %arg1, %c0_i32_0 : i32
    %2 = arith.andi %0, %1 : i1
    %3 = arith.extui %2 : i1 to i32
    %c0_i32_1 = arith.constant 0 : i32
    %4 = arith.cmpi ne, %3, %c0_i32_1 : i32
    scf.if %4 {
      %c0_10 = arith.constant 0 : index
      %c0_11 = arith.constant 0 : index
      %28 = vector.load %arg6[%c0_10, %c0_11] : memref<112x128xf32, #tpu.memory_space<vmem>>, vector<3x1xf32>
      %c0_12 = arith.constant 0 : index
      %c0_13 = arith.constant 0 : index
      %29 = vector.load %arg5[%c0_12, %c0_13] : memref<3x64xf32, #tpu.memory_space<vmem>>, vector<3x64xf32>
      %30 = vector.broadcast %28 : vector<3x1xf32> to vector<3x64xf32>
      %31 = arith.mulf %29, %30 : vector<3x64xf32>
      %c8 = arith.constant 8 : index
      %c0_14 = arith.constant 0 : index
      %32 = vector.load %arg6[%c8, %c0_14] : memref<112x128xf32, #tpu.memory_space<vmem>>, vector<16x3xf32>
      %c8_15 = arith.constant 8 : index
      %c3 = arith.constant 3 : index
      %33 = vector.load %arg6[%c8_15, %c3] : memref<112x128xf32, #tpu.memory_space<vmem>>, vector<16x1xf32>
      %cst = arith.constant dense<0.000000e+00> : vector<16x64xf32>
      %34 = tpu.matmul %32, %31, %cst {dimension_numbers = #tpu.dot_dimension_numbers<[1], [0], [0], [1], [0, 0, 1, 1], [], []>} : vector<16x3xf32>, vector<3x64xf32>, vector<16x64xf32> -> vector<16x64xf32>
      %35 = vector.broadcast %33 : vector<16x1xf32> to vector<16x64xf32>
      %36 = arith.addf %34, %35 : vector<16x64xf32>
      %37 = math.tanh %36 : vector<16x64xf32>
      %c24 = arith.constant 24 : index
      %c0_16 = arith.constant 0 : index
      %38 = vector.load %arg6[%c24, %c0_16] : memref<112x128xf32, #tpu.memory_space<vmem>>, vector<16x16xf32>
      %c24_17 = arith.constant 24 : index
      %c16 = arith.constant 16 : index
      %39 = vector.load %arg6[%c24_17, %c16] : memref<112x128xf32, #tpu.memory_space<vmem>>, vector<16x1xf32>
      %cst_18 = arith.constant dense<0.000000e+00> : vector<16x64xf32>
      %40 = tpu.matmul %38, %37, %cst_18 {dimension_numbers = #tpu.dot_dimension_numbers<[1], [0], [0], [1], [0, 0, 1, 1], [], []>} : vector<16x16xf32>, vector<16x64xf32>, vector<16x64xf32> -> vector<16x64xf32>
      %41 = vector.broadcast %39 : vector<16x1xf32> to vector<16x64xf32>
      %42 = arith.addf %40, %41 : vector<16x64xf32>
      %43 = math.tanh %42 : vector<16x64xf32>
      %c40 = arith.constant 40 : index
      %c0_19 = arith.constant 0 : index
      %44 = vector.load %arg6[%c40, %c0_19] : memref<112x128xf32, #tpu.memory_space<vmem>>, vector<8x16xf32>
      %c40_20 = arith.constant 40 : index
      %c16_21 = arith.constant 16 : index
      %45 = vector.load %arg6[%c40_20, %c16_21] : memref<112x128xf32, #tpu.memory_space<vmem>>, vector<8x1xf32>
      %cst_22 = arith.constant dense<0.000000e+00> : vector<8x64xf32>
      %46 = tpu.matmul %44, %43, %cst_22 {dimension_numbers = #tpu.dot_dimension_numbers<[1], [0], [0], [1], [0, 0, 1, 1], [], []>} : vector<8x16xf32>, vector<16x64xf32>, vector<8x64xf32> -> vector<8x64xf32>
      %47 = vector.broadcast %45 : vector<8x1xf32> to vector<8x64xf32>
      %48 = arith.addf %46, %47 : vector<8x64xf32>
      %49 = math.tanh %48 : vector<8x64xf32>
      %c48 = arith.constant 48 : index
      %c0_23 = arith.constant 0 : index
      %50 = vector.load %arg6[%c48, %c0_23] : memref<112x128xf32, #tpu.memory_space<vmem>>, vector<15x11xf32>
      %c48_24 = arith.constant 48 : index
      %c11 = arith.constant 11 : index
      %51 = vector.load %arg6[%c48_24, %c11] : memref<112x128xf32, #tpu.memory_space<vmem>>, vector<15x11xf32>
      %52 = arith.subf %50, %51 : vector<15x11xf32>
      %53 = vector.extract_strided_slice %52 {offsets = [0, 0], sizes = [15, 8], strides = [1, 1]} : vector<15x11xf32> to vector<15x8xf32>
      %cst_25 = arith.constant dense<0.000000e+00> : vector<15x64xf32>
      %54 = tpu.matmul %53, %49, %cst_25 {dimension_numbers = #tpu.dot_dimension_numbers<[1], [0], [0], [1], [0, 0, 1, 1], [], []>} : vector<15x8xf32>, vector<8x64xf32>, vector<15x64xf32> -> vector<15x64xf32>
      %55 = vector.extract_strided_slice %52 {offsets = [0, 8], sizes = [15, 3], strides = [1, 1]} : vector<15x11xf32> to vector<15x3xf32>
      %cst_26 = arith.constant dense<0.000000e+00> : vector<15x64xf32>
      %56 = tpu.matmul %55, %31, %cst_26 {dimension_numbers = #tpu.dot_dimension_numbers<[1], [0], [0], [1], [0, 0, 1, 1], [], []>} : vector<15x3xf32>, vector<3x64xf32>, vector<15x64xf32> -> vector<15x64xf32>
      %57 = arith.addf %54, %56 : vector<15x64xf32>
      %c0_27 = arith.constant 0 : index
      %c0_28 = arith.constant 0 : index
      %58 = vector.load %arg9[%c0_27, %c0_28] : memref<15x128xf32, #tpu.memory_space<vmem>>, vector<15x64xf32>
      tpu.vector_store %arg9[%c0_27, %c0_28], %57 {strides = array<i32>} : memref<15x128xf32, #tpu.memory_space<vmem>>, vector<15x64xf32>,
      %59 = vector.extract_strided_slice %51 {offsets = [0, 0], sizes = [15, 8], strides = [1, 1]} : vector<15x11xf32> to vector<15x8xf32>
      %cst_29 = arith.constant dense<0.000000e+00> : vector<15x64xf32>
      %60 = tpu.matmul %59, %49, %cst_29 {dimension_numbers = #tpu.dot_dimension_numbers<[1], [0], [0], [1], [0, 0, 1, 1], [], []>} : vector<15x8xf32>, vector<8x64xf32>, vector<15x64xf32> -> vector<15x64xf32>
      %61 = vector.extract_strided_slice %51 {offsets = [0, 8], sizes = [15, 3], strides = [1, 1]} : vector<15x11xf32> to vector<15x3xf32>
      %cst_30 = arith.constant dense<0.000000e+00> : vector<15x64xf32>
      %62 = tpu.matmul %61, %31, %cst_30 {dimension_numbers = #tpu.dot_dimension_numbers<[1], [0], [0], [1], [0, 0, 1, 1], [], []>} : vector<15x3xf32>, vector<3x64xf32>, vector<15x64xf32> -> vector<15x64xf32>
      %63 = arith.addf %60, %62 : vector<15x64xf32>
      %c0_31 = arith.constant 0 : index
      %c64 = arith.constant 64 : index
      %64 = vector.load %arg9[%c0_31, %c64] : memref<15x128xf32, #tpu.memory_space<vmem>>, vector<15x64xf32>
      tpu.vector_store %arg9[%c0_31, %c64], %63 {strides = array<i32>} : memref<15x128xf32, #tpu.memory_space<vmem>>, vector<15x64xf32>,
      %cst_32 = arith.constant 0.000000e+00 : f32
      %65 = vector.broadcast %cst_32 : f32 to vector<8x64xf32>
      %c0_33 = arith.constant 0 : index
      %c0_34 = arith.constant 0 : index
      %66 = vector.load %arg8[%c0_33, %c0_34] : memref<8x64xf32, #tpu.memory_space<vmem>>, vector<8x64xf32>
      tpu.vector_store %arg8[%c0_33, %c0_34], %65 {strides = array<i32>} : memref<8x64xf32, #tpu.memory_space<vmem>>, vector<8x64xf32>,
    } else {
    }
    %c0 = arith.constant 0 : index
    %c0_2 = arith.constant 0 : index
    %5 = vector.load %arg2[%c0, %c0_2] : memref<2x768xi32, #tpu.memory_space<vmem>>, vector<1x768xi32>
    %c1 = arith.constant 1 : index
    %c0_3 = arith.constant 0 : index
    %6 = vector.load %arg2[%c1, %c0_3] : memref<2x768xi32, #tpu.memory_space<vmem>>, vector<1x768xi32>
    %7 = tpu.iota {dimensions = array<i32: 0>} : vector<128x768xi32>
    %8 = vector.broadcast %6 : vector<1x768xi32> to vector<128x768xi32>
    %9 = arith.cmpi eq, %7, %8 : vector<128x768xi32>
    %c64_i32 = arith.constant 64 : i32
    %10 = vector.broadcast %c64_i32 : i32 to vector<1x768xi32>
    %11 = arith.addi %5, %10 : vector<1x768xi32>
    %12 = vector.broadcast %11 : vector<1x768xi32> to vector<128x768xi32>
    %13 = arith.cmpi eq, %7, %12 : vector<128x768xi32>
    %14 = arith.ori %9, %13 : vector<128x768xi1>
    %15 = arith.extui %14 : vector<128x768xi1> to vector<128x768xi32>
    %16 = arith.sitofp %15 : vector<128x768xi32> to vector<128x768xf32>
    %c0_i32_4 = arith.constant 0 : i32
    %17 = arith.cmpi eq, %arg0, %c0_i32_4 : i32
    %18 = arith.extui %17 : i1 to i32
    %c0_i32_5 = arith.constant 0 : i32
    %19 = arith.cmpi ne, %18, %c0_i32_5 : i32
    scf.if %19 {
      %c48 = arith.constant 48 : index
      %c22 = arith.constant 22 : index
      %28 = vector.load %arg6[%c48, %c22] : memref<112x128xf32, #tpu.memory_space<vmem>>, vector<15x1xf32>
      %c0_10 = arith.constant 0 : index
      %c0_11 = arith.constant 0 : index
      %29 = vector.load %arg9[%c0_10, %c0_11] : memref<15x128xf32, #tpu.memory_space<vmem>>, vector<15x128xf32>
      %cst = arith.constant dense<0.000000e+00> : vector<15x768xf32>
      %30 = tpu.matmul %29, %16, %cst {dimension_numbers = #tpu.dot_dimension_numbers<[1], [0], [0], [1], [0, 0, 1, 1], [], []>} : vector<15x128xf32>, vector<128x768xf32>, vector<15x768xf32> -> vector<15x768xf32>
      %31 = vector.broadcast %28 : vector<15x1xf32> to vector<15x768xf32>
      %32 = arith.addf %30, %31 : vector<15x768xf32>
      %cst_12 = arith.constant 0.000000e+00 : f32
      %33 = vector.broadcast %cst_12 : f32 to vector<15x768xf32>
      %34 = arith.cmpf ogt, %32, %33 : vector<15x768xf32>
      %cst_13 = arith.constant 0.000000e+00 : f32
      %35 = vector.broadcast %cst_13 : f32 to vector<15x768xf32>
      %36 = arith.minimumf %32, %35 : vector<15x768xf32>
      %37 = math.exp %36 : vector<15x768xf32>
      %cst_14 = arith.constant 1.000000e+00 : f32
      %38 = vector.broadcast %cst_14 : f32 to vector<15x768xf32>
      %39 = arith.subf %37, %38 : vector<15x768xf32>
      %40 = arith.select %34, %32, %39 : vector<15x768xi1>, vector<15x768xf32>
      %c64 = arith.constant 64 : index
      %c0_15 = arith.constant 0 : index
      %41 = vector.load %arg6[%c64, %c0_15] : memref<112x128xf32, #tpu.memory_space<vmem>>, vector<8x15xf32>
      %c64_16 = arith.constant 64 : index
      %c15 = arith.constant 15 : index
      %42 = vector.load %arg6[%c64_16, %c15] : memref<112x128xf32, #tpu.memory_space<vmem>>, vector<8x1xf32>
      %cst_17 = arith.constant dense<0.000000e+00> : vector<8x768xf32>
      %43 = tpu.matmul %41, %40, %cst_17 {dimension_numbers = #tpu.dot_dimension_numbers<[1], [0], [0], [1], [0, 0, 1, 1], [], []>} : vector<8x15xf32>, vector<15x768xf32>, vector<8x768xf32> -> vector<8x768xf32>
      %44 = vector.broadcast %42 : vector<8x1xf32> to vector<8x768xf32>
      %45 = arith.addf %43, %44 : vector<8x768xf32>
      %cst_18 = arith.constant 0.000000e+00 : f32
      %46 = vector.broadcast %cst_18 : f32 to vector<8x768xf32>
      %47 = arith.cmpf ogt, %45, %46 : vector<8x768xf32>
      %cst_19 = arith.constant 0.000000e+00 : f32
      %48 = vector.broadcast %cst_19 : f32 to vector<8x768xf32>
      %49 = arith.minimumf %45, %48 : vector<8x768xf32>
      %50 = math.exp %49 : vector<8x768xf32>
      %cst_20 = arith.constant 1.000000e+00 : f32
      %51 = vector.broadcast %cst_20 : f32 to vector<8x768xf32>
      %52 = arith.subf %50, %51 : vector<8x768xf32>
      %53 = arith.select %47, %45, %52 : vector<8x768xi1>, vector<8x768xf32>
      %54 = tpu.iota {dimensions = array<i32: 1>} : vector<768x64xi32>
      %c0_21 = arith.constant 0 : index
      %c0_22 = arith.constant 0 : index
      %55 = vector.load %arg3[%c0_21, %c0_22] : memref<768x1xi32, #tpu.memory_space<vmem>>, vector<768x1xi32>
      %56 = vector.broadcast %55 : vector<768x1xi32> to vector<768x64xi32>
      %57 = arith.cmpi eq, %54, %56 : vector<768x64xi32>
      %58 = arith.extui %57 : vector<768x64xi1> to vector<768x64xi32>
      %59 = arith.sitofp %58 : vector<768x64xi32> to vector<768x64xf32>
      %c0_23 = arith.constant 0 : index
      %c0_24 = arith.constant 0 : index
      %60 = vector.load %arg8[%c0_23, %c0_24] : memref<8x64xf32, #tpu.memory_space<vmem>>, vector<8x64xf32>
      %cst_25 = arith.constant dense<0.000000e+00> : vector<8x64xf32>
      %61 = tpu.matmul %53, %59, %cst_25 {dimension_numbers = #tpu.dot_dimension_numbers<[1], [0], [0], [1], [0, 0, 1, 1], [], []>} : vector<8x768xf32>, vector<768x64xf32>, vector<8x64xf32> -> vector<8x64xf32>
      %62 = arith.addf %60, %61 : vector<8x64xf32>
      %c0_26 = arith.constant 0 : index
      %c0_27 = arith.constant 0 : index
      %63 = vector.load %arg8[%c0_26, %c0_27] : memref<8x64xf32, #tpu.memory_space<vmem>>, vector<8x64xf32>
      tpu.vector_store %arg8[%c0_26, %c0_27], %62 {strides = array<i32>} : memref<8x64xf32, #tpu.memory_space<vmem>>, vector<8x64xf32>,
    } else {
    }
    %c1_i32 = arith.constant 1 : i32
    %20 = arith.cmpi eq, %arg0, %c1_i32 : i32
    %c0_i32_6 = arith.constant 0 : i32
    %21 = arith.cmpi eq, %arg1, %c0_i32_6 : i32
    %22 = arith.andi %20, %21 : i1
    %23 = arith.extui %22 : i1 to i32
    %c0_i32_7 = arith.constant 0 : i32
    %24 = arith.cmpi ne, %23, %c0_i32_7 : i32
    scf.if %24 {
      %c72 = arith.constant 72 : index
      %c0_10 = arith.constant 0 : index
      %28 = vector.load %arg6[%c72, %c0_10] : memref<112x128xf32, #tpu.memory_space<vmem>>, vector<16x8xf32>
      %c72_11 = arith.constant 72 : index
      %c8 = arith.constant 8 : index
      %29 = vector.load %arg6[%c72_11, %c8] : memref<112x128xf32, #tpu.memory_space<vmem>>, vector<16x8xf32>
      %c0_12 = arith.constant 0 : index
      %c0_13 = arith.constant 0 : index
      %30 = vector.load %arg8[%c0_12, %c0_13] : memref<8x64xf32, #tpu.memory_space<vmem>>, vector<8x64xf32>
      %cst = arith.constant dense<0.000000e+00> : vector<16x64xf32>
      %31 = tpu.matmul %29, %30, %cst {dimension_numbers = #tpu.dot_dimension_numbers<[1], [0], [0], [1], [0, 0, 1, 1], [], []>} : vector<16x8xf32>, vector<8x64xf32>, vector<16x64xf32> -> vector<16x64xf32>
      %c0_14 = arith.constant 0 : index
      %c0_15 = arith.constant 0 : index
      %32 = vector.load %arg10[%c0_14, %c0_15] : memref<16x128xf32, #tpu.memory_space<vmem>>, vector<16x64xf32>
      tpu.vector_store %arg10[%c0_14, %c0_15], %31 {strides = array<i32>} : memref<16x128xf32, #tpu.memory_space<vmem>>, vector<16x64xf32>,
      %cst_16 = arith.constant dense<0.000000e+00> : vector<16x64xf32>
      %33 = tpu.matmul %28, %30, %cst_16 {dimension_numbers = #tpu.dot_dimension_numbers<[1], [0], [0], [1], [0, 0, 1, 1], [], []>} : vector<16x8xf32>, vector<8x64xf32>, vector<16x64xf32> -> vector<16x64xf32>
      %c0_17 = arith.constant 0 : index
      %c64 = arith.constant 64 : index
      %34 = vector.load %arg10[%c0_17, %c64] : memref<16x128xf32, #tpu.memory_space<vmem>>, vector<16x64xf32>
      tpu.vector_store %arg10[%c0_17, %c64], %33 {strides = array<i32>} : memref<16x128xf32, #tpu.memory_space<vmem>>, vector<16x64xf32>,
    } else {
    }
    %c1_i32_8 = arith.constant 1 : i32
    %25 = arith.cmpi eq, %arg0, %c1_i32_8 : i32
    %26 = arith.extui %25 : i1 to i32
    %c0_i32_9 = arith.constant 0 : i32
    %27 = arith.cmpi ne, %26, %c0_i32_9 : i32
    scf.if %27 {
      %c72 = arith.constant 72 : index
      %c16 = arith.constant 16 : index
      %28 = vector.load %arg6[%c72, %c16] : memref<112x128xf32, #tpu.memory_space<vmem>>, vector<16x2xf32>
      %c72_10 = arith.constant 72 : index
      %c18 = arith.constant 18 : index
      %29 = vector.load %arg6[%c72_10, %c18] : memref<112x128xf32, #tpu.memory_space<vmem>>, vector<16x1xf32>
      %c0_11 = arith.constant 0 : index
      %c0_12 = arith.constant 0 : index
      %30 = vector.load %arg10[%c0_11, %c0_12] : memref<16x128xf32, #tpu.memory_space<vmem>>, vector<16x128xf32>
      %cst = arith.constant dense<0.000000e+00> : vector<16x768xf32>
      %31 = tpu.matmul %30, %16, %cst {dimension_numbers = #tpu.dot_dimension_numbers<[1], [0], [0], [1], [0, 0, 1, 1], [], []>} : vector<16x128xf32>, vector<128x768xf32>, vector<16x768xf32> -> vector<16x768xf32>
      %c0_13 = arith.constant 0 : index
      %c0_14 = arith.constant 0 : index
      %32 = vector.load %arg4[%c0_13, %c0_14] : memref<2x768xf32, #tpu.memory_space<vmem>>, vector<2x768xf32>
      %cst_15 = arith.constant dense<0.000000e+00> : vector<16x768xf32>
      %33 = tpu.matmul %28, %32, %cst_15 {dimension_numbers = #tpu.dot_dimension_numbers<[1], [0], [0], [1], [0, 0, 1, 1], [], []>} : vector<16x2xf32>, vector<2x768xf32>, vector<16x768xf32> -> vector<16x768xf32>
      %34 = arith.addf %31, %33 : vector<16x768xf32>
      %35 = vector.broadcast %29 : vector<16x1xf32> to vector<16x768xf32>
      %36 = arith.addf %34, %35 : vector<16x768xf32>
      %cst_16 = arith.constant 0.000000e+00 : f32
      %37 = vector.broadcast %cst_16 : f32 to vector<16x768xf32>
      %38 = arith.cmpf ogt, %36, %37 : vector<16x768xf32>
      %cst_17 = arith.constant 0.000000e+00 : f32
      %39 = vector.broadcast %cst_17 : f32 to vector<16x768xf32>
      %40 = arith.minimumf %36, %39 : vector<16x768xf32>
      %41 = math.exp %40 : vector<16x768xf32>
      %cst_18 = arith.constant 1.000000e+00 : f32
      %42 = vector.broadcast %cst_18 : f32 to vector<16x768xf32>
      %43 = arith.subf %41, %42 : vector<16x768xf32>
      %44 = arith.select %38, %36, %43 : vector<16x768xi1>, vector<16x768xf32>
      %c88 = arith.constant 88 : index
      %c0_19 = arith.constant 0 : index
      %45 = vector.load %arg6[%c88, %c0_19] : memref<112x128xf32, #tpu.memory_space<vmem>>, vector<16x16xf32>
      %c88_20 = arith.constant 88 : index
      %c16_21 = arith.constant 16 : index
      %46 = vector.load %arg6[%c88_20, %c16_21] : memref<112x128xf32, #tpu.memory_space<vmem>>, vector<16x1xf32>
      %cst_22 = arith.constant dense<0.000000e+00> : vector<16x768xf32>
      %47 = tpu.matmul %45, %44, %cst_22 {dimension_numbers = #tpu.dot_dimension_numbers<[1], [0], [0], [1], [0, 0, 1, 1], [], []>} : vector<16x16xf32>, vector<16x768xf32>, vector<16x768xf32> -> vector<16x768xf32>
      %48 = vector.broadcast %46 : vector<16x1xf32> to vector<16x768xf32>
      %49 = arith.addf %47, %48 : vector<16x768xf32>
      %cst_23 = arith.constant 0.000000e+00 : f32
      %50 = vector.broadcast %cst_23 : f32 to vector<16x768xf32>
      %51 = arith.cmpf ogt, %49, %50 : vector<16x768xf32>
      %cst_24 = arith.constant 0.000000e+00 : f32
      %52 = vector.broadcast %cst_24 : f32 to vector<16x768xf32>
      %53 = arith.minimumf %49, %52 : vector<16x768xf32>
      %54 = math.exp %53 : vector<16x768xf32>
      %cst_25 = arith.constant 1.000000e+00 : f32
      %55 = vector.broadcast %cst_25 : f32 to vector<16x768xf32>
      %56 = arith.subf %54, %55 : vector<16x768xf32>
      %57 = arith.select %51, %49, %56 : vector<16x768xi1>, vector<16x768xf32>
      %c104 = arith.constant 104 : index
      %c0_26 = arith.constant 0 : index
      %58 = vector.load %arg6[%c104, %c0_26] : memref<112x128xf32, #tpu.memory_space<vmem>>, vector<8x16xf32>
      %c104_27 = arith.constant 104 : index
      %c16_28 = arith.constant 16 : index
      %59 = vector.load %arg6[%c104_27, %c16_28] : memref<112x128xf32, #tpu.memory_space<vmem>>, vector<8x1xf32>
      %cst_29 = arith.constant dense<0.000000e+00> : vector<8x768xf32>
      %60 = tpu.matmul %58, %57, %cst_29 {dimension_numbers = #tpu.dot_dimension_numbers<[1], [0], [0], [1], [0, 0, 1, 1], [], []>} : vector<8x16xf32>, vector<16x768xf32>, vector<8x768xf32> -> vector<8x768xf32>
      %61 = vector.broadcast %59 : vector<8x1xf32> to vector<8x768xf32>
      %62 = arith.addf %60, %61 : vector<8x768xf32>
      %63 = tpu.iota {dimensions = array<i32: 0>} : vector<8x768xi32>
      %c4_i32 = arith.constant 4 : i32
      %64 = vector.broadcast %c4_i32 : i32 to vector<8x768xi32>
      %65 = arith.cmpi slt, %63, %64 : vector<8x768xi32>
      %cst_30 = arith.constant -1.000000e+30 : f32
      %66 = vector.broadcast %cst_30 : f32 to vector<8x768xf32>
      %67 = arith.select %65, %62, %66 : vector<8x768xi1>, vector<8x768xf32>
      %cst_31 = arith.constant dense<0xFF800000> : vector<768xf32>
      %68 = vector.multi_reduction <maximumf>, %67, %cst_31 [0] : vector<8x768xf32> to vector<768xf32>
      %69 = vector.shape_cast %68 : vector<768xf32> to vector<1x768xf32>
      %70 = vector.broadcast %69 : vector<1x768xf32> to vector<8x768xf32>
      %71 = arith.subf %67, %70 : vector<8x768xf32>
      %72 = math.exp %71 : vector<8x768xf32>
      %cst_32 = arith.constant dense<0.000000e+00> : vector<768xf32>
      %73 = vector.multi_reduction <add>, %72, %cst_32 [0] : vector<8x768xf32> to vector<768xf32>
      %74 = vector.shape_cast %73 : vector<768xf32> to vector<1x768xf32>
      %75 = math.log %74 : vector<1x768xf32>
      %76 = arith.addf %69, %75 : vector<1x768xf32>
      %77 = vector.broadcast %76 : vector<1x768xf32> to vector<8x768xf32>
      %78 = arith.subf %67, %77 : vector<8x768xf32>
      %c0_33 = arith.constant 0 : index
      %c0_34 = arith.constant 0 : index
      %79 = vector.load %arg7[%c0_33, %c0_34] : memref<8x768xf32, #tpu.memory_space<vmem>>, vector<8x768xf32>
      tpu.vector_store %arg7[%c0_33, %c0_34], %78 {strides = array<i32>} : memref<8x768xf32, #tpu.memory_space<vmem>>, vector<8x768xf32>,
    } else {
    }
    return
  }
  func.func @transform_0(%arg0: i32, %arg1: i32) -> (i32, i32) {
    %c0_i32 = arith.constant 0 : i32
    %c0_i32_0 = arith.constant 0 : i32
    return %c0_i32, %arg1 : i32, i32
  }
  func.func @transform_1(%arg0: i32, %arg1: i32) -> (i32, i32) {
    %c0_i32 = arith.constant 0 : i32
    %c0_i32_0 = arith.constant 0 : i32
    return %arg1, %c0_i32 : i32, i32
  }
  func.func @transform_2(%arg0: i32, %arg1: i32) -> (i32, i32) {
    %0 = arith.muli %arg0, %arg1 : i32
    %c0_i32 = arith.constant 0 : i32
    %c0_i32_0 = arith.constant 0 : i32
    return %c0_i32, %0 : i32, i32
  }
  func.func @transform_3(%arg0: i32, %arg1: i32) -> (i32, i32) {
    %c0_i32 = arith.constant 0 : i32
    %c0_i32_0 = arith.constant 0 : i32
    %c0_i32_1 = arith.constant 0 : i32
    return %c0_i32, %c0_i32_0 : i32, i32
  }
  func.func @transform_4(%arg0: i32, %arg1: i32) -> (i32, i32) {
    %c0_i32 = arith.constant 0 : i32
    %c0_i32_0 = arith.constant 0 : i32
    %c0_i32_1 = arith.constant 0 : i32
    return %c0_i32, %c0_i32_0 : i32, i32
  }
  func.func @transform_5(%arg0: i32, %arg1: i32) -> (i32, i32) {
    %0 = arith.muli %arg0, %arg1 : i32
    %c0_i32 = arith.constant 0 : i32
    %c0_i32_0 = arith.constant 0 : i32
    return %c0_i32, %0 : i32, i32
  }
}

</mosaic_0001>

<bundles_post_ra>
// kernel: edgenet_forward.1
= control target key start
LH: loop header
LB: loop body
LE: loop exit
PB: predicated region body
PF: predicated region fallthrough
CT: control target
= control target key end

     0   :  { %s5566_s18 = smov 0   ;;  %s5568_s19 = smov 0   ;;  %s7959_s0 = inlined_call_operand.vmem [shape: s32[2,768], index: 0, kind: input, shape index: {}]   ;;  %s7960_s1 = inlined_call_operand.vmem [shape: s32[768,1], index: 1, kind: input, shape index: {}]   ;;  %s7961_s2 = inlined_call_operand.vmem [shape: f32[2,768], index: 2, kind: input, shape index: {}]   ;;  %s7962_s3 = inlined_call_operand.vmem [shape: f32[3,64], index: 3, kind: input, shape index: {}]   ;;  %s7963_s4 = inlined_call_operand.vmem [shape: f32[112,128], index: 4, kind: input, shape index: {}]   ;;  %s7964_s5 = inlined_call_operand.vmem [shape: f32[8,768], index: 5, kind: output, shape index: {}]  }
   0x1   :  { %s5570_s20 = smov 0  }
   0x2 LB: > { %s27_s21 = sadd.s32 1, %s5508_s19  ;;  %p4545_p0 = scmp.ge.s32.totalorder %s5512_s20, 1  ;;  %s5512_s20 = sphi %s5570_s20, %s15_s20   ;;  %s5508_s19 = sphi %s5568_s19, %s8706_s19   ;;  %s5504_s18 = sphi %s5566_s18, %s8705_s18  }
   0x3   : > { %p29_p1 = scmp.ge.s32.totalorder %s27_s21, 2  ;;  %p228_p2 = scmp.lt.s32.totalorder %s5512_s20, 3 }
   0x5   : > { %s8708_s21 = smov (%p29_p1, %s27_s21), 0  ;;  %p229_p3 = pnand %p4545_p0, %p228_p2 }
   0x7   : > { %232 = sbr.rel (%p229_p3) target bundleno = 3161 (0xc59), region = 40 }
   0xc   : > { %p296_p4 = scmp.eq.s32.totalorder %s5504_s18, 0 }
   0xd   : > { %v302_v0 = vld [vmem:[%s7963_s4] sm:$0x7] (%p296_p4)  ;;  %v310_v1 = vld [vmem:[%s7963_s4 + $0x8] sm:$0xff] (%p296_p4)  ;;  %v5514_v2 = vmov (%p296_p4), 0   ;;  %v5515_v3 = vmov (%p296_p4), 3   ;;  %vm322_vm0 = vcmask (%p296_p4), 23552  }
   0xe   : > { %301 = sbr.rel (!%p296_p4) target bundleno = 1096 (0x448), region = 44  ;;  %5358 = vset.pattern.permute.xlu0 (%p296_p4), %v5514_v2  ;;  %5360 = vset.pattern.permute.xlu1 (%p296_p4), %v5515_v3  ;;  %v409_v4 = vld [vmem:[%s7963_s4 + $0x20] sm:$0xff] (%p296_p4)  ;;  %v311_v5 = vld [vmem:[%s7963_s4 + $0x10] sm:$0xff] (%p296_p4)  ;;  %v5516_v6 = vmov (%p296_p4), 16   ;;  %v408_v7 = vld [vmem:[%s7963_s4 + $0x18] sm:$0xff] (%p296_p4)  ;;  %s5517_s9 = smov (%p296_p4), 117  }
   0xf   : > { %306 = vperm.xlu0 (%p296_p4), %5358, %v302_v0   ;;  %314 = vperm.xlu1 (%p296_p4), %5360, %v310_v1   ;;  %v581_v8 = vld [vmem:[%s7963_s4 + $0x30] sm:$0xff] (%p296_p4)  ;;  %v582_v9 = vld [vmem:[%s7963_s4 + $0x38] sm:$0x7f] (%p296_p4)  ;;  %v303_v10 = vld [vmem:[%s7962_s3] sm:$0x7] (%p296_p4)  ;;  %vm327_vm1 = vcmask (%p296_p4), 1042432  }
  0x10   : > { %5265 = vmatprep.mubr.msk.f32.mxu0 (%p296_p4), %vm322_vm0, %v310_v1  ;;  %s5518_s14 = smov (%p296_p4), 120   ;;  %vm420_vm2 = vcmask (%p296_p4), 130048   ;;  %v5519_v29 = vmov (%p296_p4), 0.0   ;;  %v502_v30 = vld [vmem:[%s7963_s4 + $0x28] sm:$0xff] (%p296_p4)  ;;  %vm5520_vm3 = vmmov (%p296_p4), 0   ;;  %s5521_s17 = smov (%p296_p4), 109  }
  0x11   : > { %5272 = vmatprep.mubr.msk.f32.mxu1 (%p296_p4), %vm420_vm2, %v408_v7  ;;  %vm678_vm4 = vcmask (%p296_p4), 64512   ;;  %vm758_vm5 = vcmask (%p296_p4), 523264   ;;  %vm760_vm6 = vcmask (%p296_p4), 522240   ;;  %s5522_s22 = smov (%p296_p4), 64   ;;  %vm934_vm7 = vcmask (%p296_p4), 1047040  }
  0x12   : > { %936 = vst.msk [vmem:[#allocation2] sm:$0xff] (%p296_p4), %vm758_vm5, %v5519_v29  ;;  %vm932_vm8 = vcmask (%p296_p4), 1048064  }
  0x13   : > { %5361 = vset.pattern.permute.xlu1 %v5516_v6  ;;  %5359 = vset.pattern.permute.xlu0 %v5515_v3 }
  0x14   : > { %417 = vperm.xlu1 %5361, %v409_v4   ;;  %319 = vperm.xlu0 %5359, %v311_v5  }
  0x18   : > { %412 = vperm.xlu1 %5361, %v408_v7   ;;  %585 = vrot.lane.b32.xlu0 %v581_v8, %s5517_s9 }
  0x19   : > { %5362 = vset.pattern.permute.xlu0 %v5516_v6 }
  0x1c   : > { %587 = vrot.lane.b32.xlu1 %v582_v9, %s5517_s9  ;;  %505 = vperm.xlu0 %5362, %v502_v30  }
  0x20   : > { %762 = vrot.lane.b32.xlu0 %v581_v8, %s5521_s17 }
  0x8a   : > { %v307_v11 = vpop.permute.xlu0 %306  ;;  %v315_v12 = vpop.permute.xlu1 %314 }
  0x8b   : > { %v309_v13 = vmul.f32 %v307_v11, %v303_v10 }
  0x8d   : > { %5263 = vmatprep.subr.msk.mxu0 %vm327_vm1, %v309_v13 }
  0x8e   : > { %5264 = vmatpush3.msk.msra.mxu0 %vm327_vm1, %v309_v13 }
  0x8f   : > { %5266 = vmatmul.mubr.msk.f32.vlgmr.msra.gmra.mxu0 %vm322_vm0, %v311_v5  ;;  %v418_v14 = vpop.permute.xlu1 %417  ;;  %v320_v15 = vpop.permute.xlu0 %319  ;;  %5275 = vmatprep.subr.mxu0 %v5519_v29 }
  0x90   : > { %5279 = vmatprep.mubr.msk.f32.mxu0 %vm5520_vm3, %v5519_v29 }
  0x93   : > { %v413_v16 = vpop.permute.xlu1 %412  ;;  %v5615_v17 = vpop.permute.xlu0 %585 }
  0x94   : > { %v591_v18 = vsub.f32 %v581_v8, %v5615_v17 }
  0x96   : > { %595 = vrot.lane.b32.xlu1 %v591_v18, %s5518_s14 }
  0x97   : > { %v5618_v19 = vpop.permute.xlu1 %587  ;;  %v506_v37 = vpop.permute.xlu0 %505 }
  0x98   : > { %v592_v20 = vsub.f32 %v582_v9, %v5618_v19 }
  0x9a   : > { %597 = vrot.lane.b32.xlu1 %v592_v20, %s5518_s14 }
  0x9b   : > { %v763_v38 = vpop.permute.xlu0 %762 }
  0x9e   : > { %764 = vrot.lane.b32.xlu1 %v582_v9, %s5521_s17 }
 0x108   : > { %v596_v26 = vpop.permute.xlu1 %595 }
 0x10c   : > { %v598_v28 = vpop.permute.xlu1 %597 }
 0x110   : > { %v765_v39 = vpop.permute.xlu1 %764 }
 0x14f   : > { %v5267_v21 = vpop.f32.mrf.mxu0 }
 0x150   : > { %v403_v22 = vadd.f32 %v5267_v21, %v320_v15 }
 0x151   : > { %v397_v23 = vpop.f32.mrf.mxu0 }
 0x152   : > { %5363 = vtanh.f32 %v403_v22  ;;  %v398_v24 = vadd.f32 %v397_v23, %v315_v12 }
 0x154   : > { %5365 = vtanh.f32 %v398_v24 }
 0x15f   : > { %v5364_v25 = vpop.eup %5363 }
 0x160   : > { %5268 = vmatprep.subr.mxu1 %v5364_v25 }
 0x161   : > { %v5366_v27 = vpop.eup %5365  ;;  %5269 = vmatpush3.msra.mxu1 %v5364_v25 }
 0x162   : > { %5270 = vmatprep.subr.mxu1 %v5366_v27 }
 0x163   : > { %5271 = vmatpush3.msra.mxu1 %v5366_v27 }
 0x164   : > { %5273 = vmatmul.mubr.msk.f32.vlgmr.msra.gmra.mxu1 %vm420_vm2, %v409_v4  ;;  %5282 = vmatprep.subr.msk.mxu1 %vm327_vm1, %v309_v13 }
 0x165   : > { %5283 = vmatpush3.msk.msra.mxu1 %vm327_vm1, %v309_v13  ;;  %5284 = vmatprep.mubr.msk.f32.mxu1 %vm322_vm0, %v596_v26 }
 0x166   : > { %5292 = vmatprep.subr.msk.mxu1 %vm327_vm1, %v309_v13 }
 0x168   : > { %5285 = vmatmul.mubr.msk.f32.vlgmr.msra.gmra.mxu1 %vm322_vm0, %v598_v28 }
 0x169   : > { %5293 = vmatpush3.msk.msra.mxu1 %vm327_vm1, %v309_v13  ;;  %5294 = vmatprep.mubr.msk.f32.mxu1 %vm322_vm0, %v763_v38 }
 0x16c   : > { %5295 = vmatmul.mubr.msk.f32.vlgmr.msra.gmra.mxu1 %vm322_vm0, %v765_v39 }
 0x224   : > { %v5274_v31 = vpop.f32.mrf.mxu1 }
 0x225   : > { %v497_v32 = vadd.f32 %v5274_v31, %v418_v14 }
 0x226   : > { %v491_v33 = vpop.f32.mrf.mxu1 }
 0x227   : > { %5367 = vtanh.f32 %v497_v32  ;;  %v492_v34 = vadd.f32 %v491_v33, %v413_v16 }
 0x228   : > { %v5286_v44 = vpop.f32.mrf.mxu1 }
 0x229   : > { %5369 = vtanh.f32 %v492_v34 }
 0x22a   : > { %v669_v45 = vpop.f32.mrf.mxu1 }
 0x22c   : > { %v5296_v49 = vpop.f32.mrf.mxu1 }
 0x22e   : > { %v836_v53 = vpop.f32.mrf.mxu1 }
 0x234   : > { %v5368_v35 = vpop.eup %5367 }
 0x235   : > { %5276 = vmatpush3.msra.mxu0 %v5368_v35 }
 0x236   : > { %v5370_v36 = vpop.eup %5369  ;;  %5277 = vmatprep.subr.mxu0 %v5519_v29 }
 0x237   : > { %5278 = vmatpush3.msra.mxu0 %v5370_v36 }
 0x238   : > { %5280 = vmatmul.mubr.msk.f32.vlgmr.msra.gmra.mxu0 %vm420_vm2, %v502_v30 }
 0x239   : > { %5289 = vmatprep.mubr.msk.f32.mxu0 %vm678_vm4, %v591_v18 }
 0x2f8   : > { %v576_v40 = vpop.f32.mrf.mxu0 }
 0x2f9   : > { %v577_v41 = vadd.f32 %v576_v40, %v506_v37 }
 0x2fa   : > { %v5281_v42 = vpop.f32.mrf.mxu0 }
 0x2fb   : > { %5371 = vtanh.f32 %v577_v41 }
 0x308   : > { %v5372_v43 = vpop.eup %5371 }
 0x309   : > { %5287 = vmatprep.subr.mxu0 %v5372_v43 }
 0x30a   : > { %5288 = vmatpush3.msra.mxu0 %v5372_v43 }
 0x30b   : > { %5290 = vmatmul.mubr.msk.f32.vlgmr.msra.gmra.mxu0 %vm678_vm4, %v592_v20  ;;  %5297 = vmatprep.subr.mxu0 %v5372_v43 }
 0x30c   : > { %5298 = vmatpush3.msra.mxu0 %v5372_v43  ;;  %5299 = vmatprep.mubr.msk.f32.mxu0 %vm678_vm4, %v5615_v17 }
 0x30f   : > { %5300 = vmatmul.mubr.msk.f32.vlgmr.msra.gmra.mxu0 %vm678_vm4, %v5618_v19 }
 0x3cb   : > { %v5291_v46 = vpop.f32.mrf.mxu0 }
 0x3cc   : > { %v755_v47 = vadd.f32 %v5291_v46, %v5286_v44 }
 0x3cd   : > { %v749_v48 = vpop.f32.mrf.mxu0 }
 0x3ce   : > { %761 = vst.msk [vmem:[#allocation3 + $0x8] sm:$0x7f] %vm760_vm6, %v755_v47  ;;  %v750_v50 = vadd.f32 %v749_v48, %v669_v45 }
 0x3cf   : > { %v5301_v51 = vpop.f32.mrf.mxu0 }
 0x3d0   : > { %759 = vst.msk [vmem:[#allocation3] sm:$0xff] %vm758_vm5, %v750_v50  ;;  %v921_v52 = vadd.f32 %v5301_v51, %v5296_v49 }
 0x3d1   : > { %v915_v54 = vpop.f32.mrf.mxu0 }
 0x3d2   : > { %v916_v55 = vadd.f32 %v915_v54, %v836_v53  ;;  %928 = vrot.lane.b32.xlu1 %v921_v52, %s5522_s22 }
 0x3d4   : > { %926 = vrot.lane.b32.xlu0 %v916_v55, %s5522_s22 }
 0x444   : > { %v929_v56 = vpop.permute.xlu1 %928 }
 0x445   : > { %935 = vst.msk [vmem:[#allocation3 + $0x8] sm:$0x7f] %vm934_vm7, %v929_v56 }
 0x446   : > { %v927_v57 = vpop.permute.xlu0 %926 }
 0x447   : > { %933 = vst.msk [vmem:[#allocation3] sm:$0xff] %vm932_vm8, %v927_v57 }
 0x448 PF: > { %v7965_v58 = vlaneseq  ;;  %v937_v60 = vld [vmem:[%s7959_s0] ss:$2 sm:$0x3f]  ;;  %v4563_v62 = vld [vmem:[%s7959_s0 + $0x1] ss:$2 sm:$0x3f] }
 0x449   : > { %v1077_v1 = vadd.s32 64, %v937_v60  ;;  %v8071_v18 = vmov 0  ;;  %v8074_v19 = vmov 0  ;;  %v8077_v20 = vmov 0  ;;  %p4660_p5 = scmp.ne.s32.totalorder %s5504_s18, 0 }
 0x44a   : > { %v5642_v59 = vshrl.u32 %v7965_v58, 7  ;;  %v8080_v21 = vmov 0  ;;  %v8083_v22 = vmov 0  ;;  %v8086_v24 = vmov 0 }
 0x44b   : > { %v8089_v25 = vmov 0  ;;  %v8092_v26 = vmov 0  ;;  %v8095_v27 = vmov 0  ;;  %v8098_v28 = vmov 0 }
 0x44c   : > { %8070 = vst [vmem:[#allocation5_spill] sm:$0xff] %v5642_v59  ;;  %v959_v61 = vsub.s32 0, %v5642_v59  ;;  %v963_v63 = vsub.s32 1, %v5642_v59  ;;  %v967_v0 = vsub.s32 2, %v5642_v59  ;;  %v971_v2 = vsub.s32 3, %v5642_v59 }
 0x44d   : > { %v975_v4 = vsub.s32 4, %v5642_v59  ;;  %v979_v5 = vsub.s32 5, %v5642_v59  ;;  %v942_v10 = vadd.s32 8, %v5642_v59  ;;  %v943_v23 = vadd.s32 16, %v5642_v59 }
 0x44e   : > { %v5654_v3 = vrot.slane %v4563_v62, %v959_v61  ;;  %v5658_v6 = vrot.slane %v4563_v62, %v963_v63  ;;  %v5660_v7 = vrot.slane %v4563_v62, %v967_v0  ;;  %v5662_v8 = vrot.slane %v1077_v1, %v959_v61 }
 0x44f   : > { %v5664_v9 = vrot.slane %v4563_v62, %v971_v2  ;;  %v5667_v11 = vrot.slane %v4563_v62, %v975_v4  ;;  %v5669_v12 = vrot.slane %v4563_v62, %v979_v5  ;;  %v5675_v13 = vrot.slane %v1077_v1, %v963_v63 }
 0x450   : > { %vm981_vm9 = vcmp.eq.s32.totalorder %v5642_v59, %v5654_v3  ;;  %vm982_vm10 = vcmp.eq.s32.totalorder %v5642_v59, %v5658_v6  ;;  %v5677_v14 = vrot.slane %v1077_v1, %v967_v0  ;;  %v5679_v15 = vrot.slane %v1077_v1, %v971_v2 }
 0x451   : > { %vm983_vm11 = vcmp.eq.s32.totalorder %v5642_v59, %v5660_v7  ;;  %v5683_v16 = vrot.slane %v1077_v1, %v975_v4  ;;  %v5685_v17 = vrot.slane %v1077_v1, %v979_v5  ;;  %vm1102_vm12 = vcmp.eq.s32.totalorder %v5642_v59, %v5662_v8 }
 0x452   : > { %vm984_vm13 = vcmp.eq.s32.totalorder %v5642_v59, %v5664_v9  ;;  %vm1103_vm14 = vcmp.eq.s32.totalorder %v5642_v59, %v5675_v13  ;;  %vm1104_vm15 = vcmp.eq.s32.totalorder %v5642_v59, %v5677_v14  ;;  %vm1105_vm0 = vcmp.eq.s32.totalorder %v5642_v59, %v5679_v15  ;;  %vm5697_vm1 = vmor %vm981_vm9, %vm1102_vm12 }
 0x453   : > { %v8072_v18 = vsel %vm5697_vm1, 4294967295, %v8071_v18  ;;  %vm985_vm2 = vcmp.eq.s32.totalorder %v5642_v59, %v5667_v11  ;;  %vm1106_vm3 = vcmp.eq.s32.totalorder %v5642_v59, %v5683_v16  ;;  %vm5708_vm4 = vmor %vm982_vm10, %vm1103_vm14  ;;  %vm986_vm5 = vcmp.eq.s32.totalorder %v5642_v59, %v5669_v12 }
 0x454   : > { %8073 = vst [vmem:[#allocation6_spill] sm:$0xff] %v8072_v18  ;;  %v8075_v19 = vsel %vm5708_vm4, 4294967295, %v8074_v19  ;;  %vm1107_vm6 = vcmp.eq.s32.totalorder %v5642_v59, %v5685_v17  ;;  %vm5716_vm7 = vmor %vm983_vm11, %vm1104_vm15  ;;  %vm987_vm8 = vcmp.eq.s32.totalorder %v942_v10, %v5654_v3  ;;  %vm1108_vm9 = vcmp.eq.s32.totalorder %v942_v10, %v5662_v8 }
 0x455   : > { %8076 = vst [vmem:[#allocation7_spill] sm:$0xff] %v8075_v19  ;;  %v8078_v20 = vsel %vm5716_vm7, 4294967295, %v8077_v20  ;;  %vm5722_vm12 = vmor %vm984_vm13, %vm1105_vm0  ;;  %vm988_vm10 = vcmp.eq.s32.totalorder %v942_v10, %v5658_v6  ;;  %vm1109_vm14 = vcmp.eq.s32.totalorder %v942_v10, %v5675_v13  ;;  %vm989_vm11 = vcmp.eq.s32.totalorder %v942_v10, %v5660_v7 }
 0x456   : > { %8079 = vst [vmem:[#allocation8_spill] sm:$0xff] %v8078_v20  ;;  %v8081_v21 = vsel %vm5722_vm12, 4294967295, %v8080_v21  ;;  %vm5728_vm1 = vmor %vm985_vm2, %vm1106_vm3  ;;  %vm1110_vm15 = vcmp.eq.s32.totalorder %v942_v10, %v5677_v14  ;;  %vm990_vm13 = vcmp.eq.s32.totalorder %v942_v10, %v5664_v9  ;;  %vm1111_vm0 = vcmp.eq.s32.totalorder %v942_v10, %v5679_v15 }
 0x457   : > { %8082 = vst [vmem:[#allocation9_spill] sm:$0xff] %v8081_v21  ;;  %v8084_v22 = vsel %vm5728_vm1, 4294967295, %v8083_v22  ;;  %vm5735_vm7 = vmor %vm986_vm5, %vm1107_vm6  ;;  %vm991_vm2 = vcmp.eq.s32.totalorder %v942_v10, %v5667_v11  ;;  %vm1112_vm3 = vcmp.eq.s32.totalorder %v942_v10, %v5683_v16  ;;  %vm992_vm5 = vcmp.eq.s32.totalorder %v942_v10, %v5669_v12 }
 0x458   : > { %8085 = vst [vmem:[#allocation10_spill] sm:$0xff] %v8084_v22  ;;  %v8087_v24 = vsel %vm5735_vm7, 4294967295, %v8086_v24  ;;  %vm5741_vm12 = vmor %vm987_vm8, %vm1108_vm9  ;;  %vm1113_vm6 = vcmp.eq.s32.totalorder %v942_v10, %v5685_v17  ;;  %vm993_vm8 = vcmp.eq.s32.totalorder %v943_v23, %v5654_v3  ;;  %vm1114_vm9 = vcmp.eq.s32.totalorder %v943_v23, %v5662_v8 }
 0x459   : > { %8088 = vst [vmem:[#allocation11_spill] sm:$0xff] %v8087_v24  ;;  %v8090_v25 = vsel %vm5741_vm12, 4294967295, %v8089_v25  ;;  %vm5747_vm1 = vmor %vm988_vm10, %vm1109_vm14  ;;  %vm994_vm10 = vcmp.eq.s32.totalorder %v943_v23, %v5658_v6  ;;  %vm1115_vm14 = vcmp.eq.s32.totalorder %v943_v23, %v5675_v13  ;;  %v8101_v29 = vmov 0 }
 0x45a   : > { %8091 = vst [vmem:[#allocation12_spill] sm:$0xff] %v8090_v25  ;;  %v8093_v26 = vsel %vm5747_vm1, 4294967295, %v8092_v26  ;;  %vm5753_vm7 = vmor %vm989_vm11, %vm1110_vm15  ;;  %v944_v30 = vadd.s32 24, %v5642_v59  ;;  %vm995_vm11 = vcmp.eq.s32.totalorder %v943_v23, %v5660_v7  ;;  %vm1116_vm15 = vcmp.eq.s32.totalorder %v943_v23, %v5677_v14 }
 0x45b   : > { %8094 = vst [vmem:[#allocation13_spill] sm:$0xff] %v8093_v26  ;;  %v8096_v27 = vsel %vm5753_vm7, 4294967295, %v8095_v27  ;;  %vm5759_vm4 = vmor %vm990_vm13, %vm1111_vm0  ;;  %v8104_v31 = vmov 0  ;;  %vm996_vm13 = vcmp.eq.s32.totalorder %v943_v23, %v5664_v9  ;;  %vm1117_vm0 = vcmp.eq.s32.totalorder %v943_v23, %v5679_v15 }
 0x45c   : > { %8097 = vst [vmem:[#allocation14_spill] sm:$0xff] %v8096_v27  ;;  %v8099_v28 = vsel %vm5759_vm4, 4294967295, %v8098_v28  ;;  %vm5765_vm12 = vmor %vm991_vm2, %vm1112_vm3  ;;  %v8107_v32 = vmov 0  ;;  %vm997_vm2 = vcmp.eq.s32.totalorder %v943_v23, %v5667_v11  ;;  %vm1118_vm3 = vcmp.eq.s32.totalorder %v943_v23, %v5683_v16 }
 0x45d   : > { %8100 = vst [vmem:[#allocation15_spill] sm:$0xff] %v8099_v28  ;;  %v8102_v29 = vsel %vm5765_vm12, 4294967295, %v8101_v29  ;;  %vm5772_vm7 = vmor %vm992_vm5, %vm1113_vm6  ;;  %v8110_v33 = vmov 0  ;;  %vm998_vm5 = vcmp.eq.s32.totalorder %v943_v23, %v5669_v12  ;;  %vm1119_vm6 = vcmp.eq.s32.totalorder %v943_v23, %v5685_v17 }
 0x45e   : > { %8103 = vst [vmem:[#allocation16_spill] sm:$0xff] %v8102_v29  ;;  %v8105_v31 = vsel %vm5772_vm7, 4294967295, %v8104_v31  ;;  %vm5778_vm4 = vmor %vm993_vm8, %vm1114_vm9  ;;  %v8113_v34 = vmov 0  ;;  %vm999_vm8 = vcmp.eq.s32.totalorder %v944_v30, %v5654_v3  ;;  %vm1120_vm9 = vcmp.eq.s32.totalorder %v944_v30, %v5662_v8 }
 0x45f   : > { %8106 = vst [vmem:[#allocation17_spill] sm:$0xff] %v8105_v31  ;;  %v8108_v32 = vsel %vm5778_vm4, 4294967295, %v8107_v32  ;;  %vm5784_vm12 = vmor %vm994_vm10, %vm1115_vm14  ;;  %v8116_v35 = vmov 0  ;;  %vm1000_vm10 = vcmp.eq.s32.totalorder %v944_v30, %v5658_v6  ;;  %vm1121_vm14 = vcmp.eq.s32.totalorder %v944_v30, %v5675_v13 }
 0x460   : > { %8109 = vst [vmem:[#allocation18_spill] sm:$0xff] %v8108_v32  ;;  %v8111_v33 = vsel %vm5784_vm12, 4294967295, %v8110_v33  ;;  %vm5790_vm7 = vmor %vm995_vm11, %vm1116_vm15  ;;  %v8119_v36 = vmov 0  ;;  %v945_v37 = vadd.s32 32, %v5642_v59  ;;  %vm1001_vm11 = vcmp.eq.s32.totalorder %v944_v30, %v5660_v7 }
 0x461   : > { %8112 = vst [vmem:[#allocation19_spill] sm:$0xff] %v8111_v33  ;;  %v8114_v34 = vsel %vm5790_vm7, 4294967295, %v8113_v34  ;;  %vm5796_vm1 = vmor %vm996_vm13, %vm1117_vm0  ;;  %vm1122_vm15 = vcmp.eq.s32.totalorder %v944_v30, %v5677_v14  ;;  %v8122_v38 = vmov 0  ;;  %vm1002_vm13 = vcmp.eq.s32.totalorder %v944_v30, %v5664_v9 }
 0x462   : > { %8115 = vst [vmem:[#allocation20_spill] sm:$0xff] %v8114_v34  ;;  %v8117_v35 = vsel %vm5796_vm1, 4294967295, %v8116_v35  ;;  %vm5802_vm4 = vmor %vm997_vm2, %vm1118_vm3  ;;  %vm1123_vm0 = vcmp.eq.s32.totalorder %v944_v30, %v5679_v15  ;;  %v8125_v39 = vmov 0  ;;  %vm1003_vm2 = vcmp.eq.s32.totalorder %v944_v30, %v5667_v11 }
 0x463   : > { %8118 = vst [vmem:[#allocation21_spill] sm:$0xff] %v8117_v35  ;;  %v8120_v36 = vsel %vm5802_vm4, 4294967295, %v8119_v36  ;;  %vm5809_vm7 = vmor %vm998_vm5, %vm1119_vm6  ;;  %vm1124_vm3 = vcmp.eq.s32.totalorder %v944_v30, %v5683_v16  ;;  %v8128_v40 = vmov 0  ;;  %vm1004_vm5 = vcmp.eq.s32.totalorder %v944_v30, %v5669_v12 }
 0x464   : > { %8121 = vst [vmem:[#allocation22_spill] sm:$0xff] %v8120_v36  ;;  %v8123_v38 = vsel %vm5809_vm7, 4294967295, %v8122_v38  ;;  %vm5815_vm1 = vmor %vm999_vm8, %vm1120_vm9  ;;  %vm1125_vm6 = vcmp.eq.s32.totalorder %v944_v30, %v5685_v17  ;;  %v8131_v41 = vmov 0  ;;  %vm1005_vm8 = vcmp.eq.s32.totalorder %v945_v37, %v5654_v3 }
 0x465   : > { %8124 = vst [vmem:[#allocation23_spill] sm:$0xff] %v8123_v38  ;;  %v8126_v39 = vsel %vm5815_vm1, 4294967295, %v8125_v39  ;;  %vm5821_vm4 = vmor %vm1000_vm10, %vm1121_vm14  ;;  %vm1126_vm9 = vcmp.eq.s32.totalorder %v945_v37, %v5662_v8  ;;  %v8134_v42 = vmov 0  ;;  %vm1006_vm10 = vcmp.eq.s32.totalorder %v945_v37, %v5658_v6 }
 0x466   : > { %8127 = vst [vmem:[#allocation24_spill] sm:$0xff] %v8126_v39  ;;  %v8129_v40 = vsel %vm5821_vm4, 4294967295, %v8128_v40  ;;  %vm5827_vm7 = vmor %vm1001_vm11, %vm1122_vm15  ;;  %vm1127_vm14 = vcmp.eq.s32.totalorder %v945_v37, %v5675_v13  ;;  %v8137_v43 = vmov 0  ;;  %v946_v44 = vadd.s32 40, %v5642_v59 }
 0x467   : > { %8130 = vst [vmem:[#allocation25_spill] sm:$0xff] %v8129_v40  ;;  %v8132_v41 = vsel %vm5827_vm7, 4294967295, %v8131_v41  ;;  %vm5833_vm12 = vmor %vm1002_vm13, %vm1123_vm0  ;;  %vm1007_vm11 = vcmp.eq.s32.totalorder %v945_v37, %v5660_v7  ;;  %vm1128_vm15 = vcmp.eq.s32.totalorder %v945_v37, %v5677_v14  ;;  %v8140_v45 = vmov 0 }
 0x468   : > { %8133 = vst [vmem:[#allocation26_spill] sm:$0xff] %v8132_v41  ;;  %v8135_v42 = vsel %vm5833_vm12, 4294967295, %v8134_v42  ;;  %vm5839_vm1 = vmor %vm1003_vm2, %vm1124_vm3  ;;  %vm1008_vm13 = vcmp.eq.s32.totalorder %v945_v37, %v5664_v9  ;;  %vm1129_vm0 = vcmp.eq.s32.totalorder %v945_v37, %v5679_v15  ;;  %v8143_v46 = vmov 0 }
 0x469   : > { %8136 = vst [vmem:[#allocation27_spill] sm:$0xff] %v8135_v42  ;;  %v8138_v43 = vsel %vm5839_vm1, 4294967295, %v8137_v43  ;;  %vm5846_vm7 = vmor %vm1004_vm5, %vm1125_vm6  ;;  %vm1009_vm2 = vcmp.eq.s32.totalorder %v945_v37, %v5667_v11  ;;  %vm1130_vm3 = vcmp.eq.s32.totalorder %v945_v37, %v5683_v16  ;;  %v8146_v47 = vmov 0 }
 0x46a   : > { %8139 = vst [vmem:[#allocation28_spill] sm:$0xff] %v8138_v43  ;;  %v8141_v45 = vsel %vm5846_vm7, 4294967295, %v8140_v45  ;;  %vm5852_vm12 = vmor %vm1005_vm8, %vm1126_vm9  ;;  %vm1010_vm5 = vcmp.eq.s32.totalorder %v945_v37, %v5669_v12  ;;  %vm1131_vm6 = vcmp.eq.s32.totalorder %v945_v37, %v5685_v17  ;;  %v8149_v48 = vmov 0 }
 0x46b   : > { %8142 = vst [vmem:[#allocation29_spill] sm:$0xff] %v8141_v45  ;;  %v8144_v46 = vsel %vm5852_vm12, 4294967295, %v8143_v46  ;;  %vm5858_vm1 = vmor %vm1006_vm10, %vm1127_vm14  ;;  %vm1011_vm8 = vcmp.eq.s32.totalorder %v946_v44, %v5654_v3  ;;  %vm1132_vm9 = vcmp.eq.s32.totalorder %v946_v44, %v5662_v8  ;;  %v8152_v49 = vmov 0 }
 0x46c   : > { %8145 = vst [vmem:[#allocation30_spill] sm:$0xff] %v8144_v46  ;;  %v8147_v47 = vsel %vm5858_vm1, 4294967295, %v8146_v47  ;;  %vm5864_vm7 = vmor %vm1007_vm11, %vm1128_vm15  ;;  %vm1012_vm10 = vcmp.eq.s32.totalorder %v946_v44, %v5658_v6  ;;  %vm1133_vm14 = vcmp.eq.s32.totalorder %v946_v44, %v5675_v13  ;;  %v8155_v50 = vmov 0 }
 0x46d   : > { %8148 = vst [vmem:[#allocation31_spill] sm:$0xff] %v8147_v47  ;;  %v8150_v48 = vsel %vm5864_vm7, 4294967295, %v8149_v48  ;;  %vm5870_vm4 = vmor %vm1008_vm13, %vm1129_vm0  ;;  %v947_v51 = vadd.s32 48, %v5642_v59  ;;  %vm1013_vm11 = vcmp.eq.s32.totalorder %v946_v44, %v5660_v7  ;;  %vm1134_vm15 = vcmp.eq.s32.totalorder %v946_v44, %v5677_v14 }
 0x46e   : > { %8151 = vst [vmem:[#allocation32_spill] sm:$0xff] %v8150_v48  ;;  %v8153_v49 = vsel %vm5870_vm4, 4294967295, %v8152_v49  ;;  %vm5876_vm12 = vmor %vm1009_vm2, %vm1130_vm3  ;;  %v8158_v52 = vmov 0  ;;  %vm1014_vm13 = vcmp.eq.s32.totalorder %v946_v44, %v5664_v9  ;;  %vm1135_vm0 = vcmp.eq.s32.totalorder %v946_v44, %v5679_v15 }
 0x46f   : > { %8154 = vst [vmem:[#allocation33_spill] sm:$0xff] %v8153_v49  ;;  %v8156_v50 = vsel %vm5876_vm12, 4294967295, %v8155_v50  ;;  %vm5883_vm7 = vmor %vm1010_vm5, %vm1131_vm6  ;;  %v8161_v53 = vmov 0  ;;  %vm1015_vm2 = vcmp.eq.s32.totalorder %v946_v44, %v5667_v11  ;;  %vm1136_vm3 = vcmp.eq.s32.totalorder %v946_v44, %v5683_v16 }
 0x470   : > { %8157 = vst [vmem:[#allocation34_spill] sm:$0xff] %v8156_v50  ;;  %v8159_v52 = vsel %vm5883_vm7, 4294967295, %v8158_v52  ;;  %vm5889_vm4 = vmor %vm1011_vm8, %vm1132_vm9  ;;  %v8164_v54 = vmov 0  ;;  %vm1016_vm5 = vcmp.eq.s32.totalorder %v946_v44, %v5669_v12  ;;  %vm1137_vm6 = vcmp.eq.s32.totalorder %v946_v44, %v5685_v17 }
 0x471   : > { %8160 = vst [vmem:[#allocation35_spill] sm:$0xff] %v8159_v52  ;;  %v8162_v53 = vsel %vm5889_vm4, 4294967295, %v8161_v53  ;;  %vm5895_vm12 = vmor %vm1012_vm10, %vm1133_vm14  ;;  %v8167_v55 = vmov 0  ;;  %vm1017_vm8 = vcmp.eq.s32.totalorder %v947_v51, %v5654_v3  ;;  %vm1138_vm9 = vcmp.eq.s32.totalorder %v947_v51, %v5662_v8 }
 0x472   : > { %8163 = vst [vmem:[#allocation36_spill] sm:$0xff] %v8162_v53  ;;  %v8165_v54 = vsel %vm5895_vm12, 4294967295, %v8164_v54  ;;  %vm5901_vm7 = vmor %vm1013_vm11, %vm1134_vm15  ;;  %v8170_v56 = vmov 0  ;;  %vm1018_vm10 = vcmp.eq.s32.totalorder %v947_v51, %v5658_v6  ;;  %vm1139_vm14 = vcmp.eq.s32.totalorder %v947_v51, %v5675_v13 }
 0x473   : > { %8166 = vst [vmem:[#allocation37_spill] sm:$0xff] %v8165_v54  ;;  %v8168_v55 = vsel %vm5901_vm7, 4294967295, %v8167_v55  ;;  %vm5907_vm1 = vmor %vm1014_vm13, %vm1135_vm0  ;;  %v8173_v57 = vmov 0  ;;  %v948_v60 = vadd.s32 56, %v5642_v59  ;;  %vm1019_vm11 = vcmp.eq.s32.totalorder %v947_v51, %v5660_v7 }
 0x474   : > { %8169 = vst [vmem:[#allocation38_spill] sm:$0xff] %v8168_v55  ;;  %v8171_v56 = vsel %vm5907_vm1, 4294967295, %v8170_v56  ;;  %vm5913_vm4 = vmor %vm1015_vm2, %vm1136_vm3  ;;  %vm1140_vm15 = vcmp.eq.s32.totalorder %v947_v51, %v5677_v14  ;;  %v8176_v61 = vmov 0  ;;  %vm1020_vm13 = vcmp.eq.s32.totalorder %v947_v51, %v5664_v9 }
 0x475   : > { %8172 = vst [vmem:[#allocation39_spill] sm:$0xff] %v8171_v56  ;;  %v8174_v57 = vsel %vm5913_vm4, 4294967295, %v8173_v57  ;;  %vm5920_vm7 = vmor %vm1016_vm5, %vm1137_vm6  ;;  %vm1141_vm0 = vcmp.eq.s32.totalorder %v947_v51, %v5679_v15  ;;  %v8179_v62 = vmov 0  ;;  %vm1021_vm2 = vcmp.eq.s32.totalorder %v947_v51, %v5667_v11 }
 0x476   : > { %8175 = vst [vmem:[#allocation40_spill] sm:$0xff] %v8174_v57  ;;  %v8177_v61 = vsel %vm5920_vm7, 4294967295, %v8176_v61  ;;  %vm5926_vm1 = vmor %vm1017_vm8, %vm1138_vm9  ;;  %vm1142_vm3 = vcmp.eq.s32.totalorder %v947_v51, %v5683_v16  ;;  %v8182_v63 = vmov 0  ;;  %vm1022_vm5 = vcmp.eq.s32.totalorder %v947_v51, %v5669_v12 }
 0x477   : > { %8178 = vst [vmem:[#allocation41_spill] sm:$0xff] %v8177_v61  ;;  %v8180_v62 = vsel %vm5926_vm1, 4294967295, %v8179_v62  ;;  %vm5932_vm4 = vmor %vm1018_vm10, %vm1139_vm14  ;;  %vm1143_vm6 = vcmp.eq.s32.totalorder %v947_v51, %v5685_v17  ;;  %v8185_v0 = vmov 0  ;;  %vm1023_vm8 = vcmp.eq.s32.totalorder %v948_v60, %v5654_v3 }
 0x478   : > { %8181 = vst [vmem:[#allocation42_spill] sm:$0xff] %v8180_v62  ;;  %v8183_v63 = vsel %vm5932_vm4, 4294967295, %v8182_v63  ;;  %vm5938_vm7 = vmor %vm1019_vm11, %vm1140_vm15  ;;  %vm1144_vm9 = vcmp.eq.s32.totalorder %v948_v60, %v5662_v8  ;;  %v8188_v1 = vmov 0  ;;  %vm1024_vm10 = vcmp.eq.s32.totalorder %v948_v60, %v5658_v6 }
 0x479   : > { %8184 = vst [vmem:[#allocation43_spill] sm:$0xff] %v8183_v63  ;;  %v8186_v0 = vsel %vm5938_vm7, 4294967295, %v8185_v0  ;;  %vm5944_vm12 = vmor %vm1020_vm13, %vm1141_vm0  ;;  %vm1145_vm14 = vcmp.eq.s32.totalorder %v948_v60, %v5675_v13  ;;  %v8191_v2 = vmov 0  ;;  %v949_v4 = vadd.s32 64, %v5642_v59 }
 0x47a   : > { %8187 = vst [vmem:[#allocation44_spill] sm:$0xff] %v8186_v0  ;;  %v8189_v1 = vsel %vm5944_vm12, 4294967295, %v8188_v1  ;;  %vm5950_vm1 = vmor %vm1021_vm2, %vm1142_vm3  ;;  %vm1025_vm11 = vcmp.eq.s32.totalorder %v948_v60, %v5660_v7  ;;  %vm1146_vm15 = vcmp.eq.s32.totalorder %v948_v60, %v5677_v14  ;;  %v8194_v5 = vmov 0 }
 0x47b   : > { %8190 = vst [vmem:[#allocation45_spill] sm:$0xff] %v8189_v1  ;;  %v8192_v2 = vsel %vm5950_vm1, 4294967295, %v8191_v2  ;;  %vm5957_vm7 = vmor %vm1022_vm5, %vm1143_vm6  ;;  %vm1026_vm13 = vcmp.eq.s32.totalorder %v948_v60, %v5664_v9  ;;  %vm1147_vm0 = vcmp.eq.s32.totalorder %v948_v60, %v5679_v15  ;;  %v8197_v10 = vmov 0 }
 0x47c   : > { %8193 = vst [vmem:[#allocation46_spill] sm:$0xff] %v8192_v2  ;;  %v8195_v5 = vsel %vm5957_vm7, 4294967295, %v8194_v5  ;;  %vm5963_vm12 = vmor %vm1023_vm8, %vm1144_vm9  ;;  %vm1027_vm2 = vcmp.eq.s32.totalorder %v948_v60, %v5667_v11  ;;  %vm1148_vm3 = vcmp.eq.s32.totalorder %v948_v60, %v5683_v16  ;;  %v8200_v23 = vmov 0 }
 0x47d   : > { %8196 = vst [vmem:[#allocation47_spill] sm:$0xff] %v8195_v5  ;;  %v8198_v10 = vsel %vm5963_vm12, 4294967295, %v8197_v10  ;;  %vm5969_vm1 = vmor %vm1024_vm10, %vm1145_vm14  ;;  %vm1028_vm5 = vcmp.eq.s32.totalorder %v948_v60, %v5669_v12  ;;  %vm1149_vm6 = vcmp.eq.s32.totalorder %v948_v60, %v5685_v17  ;;  %v8203_v30 = vmov 0 }
 0x47e   : > { %8199 = vst [vmem:[#allocation48_spill] sm:$0xff] %v8198_v10  ;;  %v8201_v23 = vsel %vm5969_vm1, 4294967295, %v8200_v23  ;;  %vm5975_vm7 = vmor %vm1025_vm11, %vm1146_vm15  ;;  %vm1029_vm8 = vcmp.eq.s32.totalorder %v949_v4, %v5654_v3  ;;  %vm1150_vm9 = vcmp.eq.s32.totalorder %v949_v4, %v5662_v8  ;;  %v8206_v37 = vmov 0 }
 0x47f   : > { %8202 = vst [vmem:[#allocation49_spill] sm:$0xff] %v8201_v23  ;;  %v8204_v30 = vsel %vm5975_vm7, 4294967295, %v8203_v30  ;;  %vm5981_vm4 = vmor %vm1026_vm13, %vm1147_vm0  ;;  %vm1030_vm10 = vcmp.eq.s32.totalorder %v949_v4, %v5658_v6  ;;  %vm1151_vm14 = vcmp.eq.s32.totalorder %v949_v4, %v5675_v13  ;;  %v8209_v44 = vmov 0 }
 0x480   : > { %8205 = vst [vmem:[#allocation50_spill] sm:$0xff] %v8204_v30  ;;  %v8207_v37 = vsel %vm5981_vm4, 4294967295, %v8206_v37  ;;  %vm5987_vm12 = vmor %vm1027_vm2, %vm1148_vm3  ;;  %v950_v51 = vadd.s32 72, %v5642_v59  ;;  %vm1031_vm11 = vcmp.eq.s32.totalorder %v949_v4, %v5660_v7  ;;  %vm1152_vm15 = vcmp.eq.s32.totalorder %v949_v4, %v5677_v14 }
 0x481   : > { %8208 = vst [vmem:[#allocation51_spill] sm:$0xff] %v8207_v37  ;;  %v8210_v44 = vsel %vm5987_vm12, 4294967295, %v8209_v44  ;;  %vm5994_vm7 = vmor %vm1028_vm5, %vm1149_vm6  ;;  %v8212_v60 = vmov 0  ;;  %vm1032_vm13 = vcmp.eq.s32.totalorder %v949_v4, %v5664_v9  ;;  %vm1153_vm0 = vcmp.eq.s32.totalorder %v949_v4, %v5679_v15 }
 0x482   : > { %8211 = vst [vmem:[#allocation52_spill] sm:$0xff] %v8210_v44  ;;  %v8213_v60 = vsel %vm5994_vm7, 4294967295, %v8212_v60  ;;  %vm6000_vm4 = vmor %vm1029_vm8, %vm1150_vm9  ;;  %v8215_v58 = vmov 0  ;;  %vm1033_vm2 = vcmp.eq.s32.totalorder %v949_v4, %v5667_v11  ;;  %vm1154_vm3 = vcmp.eq.s32.totalorder %v949_v4, %v5683_v16 }
 0x483   : > { %8214 = vst [vmem:[#allocation53_spill] sm:$0xff] %v8213_v60  ;;  %v8216_v58 = vsel %vm6000_vm4, 4294967295, %v8215_v58  ;;  %vm6006_vm12 = vmor %vm1030_vm10, %vm1151_vm14  ;;  %v8218_v22 = vmov 0  ;;  %vm1034_vm5 = vcmp.eq.s32.totalorder %v949_v4, %v5669_v12  ;;  %vm1155_vm6 = vcmp.eq.s32.totalorder %v949_v4, %v5685_v17 }
 0x484   : > { %8217 = vst [vmem:[#allocation54_spill] sm:$0xff] %v8216_v58  ;;  %v8219_v22 = vsel %vm6006_vm12, 4294967295, %v8218_v22  ;;  %vm6012_vm7 = vmor %vm1031_vm11, %vm1152_vm15  ;;  %v8221_v24 = vmov 0  ;;  %vm1035_vm8 = vcmp.eq.s32.totalorder %v950_v51, %v5654_v3  ;;  %vm1156_vm9 = vcmp.eq.s32.totalorder %v950_v51, %v5662_v8 }
 0x485   : > { %8220 = vst [vmem:[#allocation55_spill] sm:$0xff] %v8219_v22  ;;  %v8222_v24 = vsel %vm6012_vm7, 4294967295, %v8221_v24  ;;  %vm6018_vm1 = vmor %vm1032_vm13, %vm1153_vm0  ;;  %v8224_v29 = vmov 0  ;;  %vm1036_vm10 = vcmp.eq.s32.totalorder %v950_v51, %v5658_v6  ;;  %vm1157_vm14 = vcmp.eq.s32.totalorder %v950_v51, %v5675_v13 }
 0x486   : > { %8223 = vst [vmem:[#allocation56_spill] sm:$0xff] %v8222_v24  ;;  %v8225_v29 = vsel %vm6018_vm1, 4294967295, %v8224_v29  ;;  %vm6024_vm4 = vmor %vm1033_vm2, %vm1154_vm3  ;;  %v8227_v31 = vmov 0  ;;  %v951_v4 = vadd.s32 80, %v5642_v59  ;;  %vm1037_vm11 = vcmp.eq.s32.totalorder %v950_v51, %v5660_v7 }
 0x487   : > { %8226 = vst [vmem:[#allocation57_spill] sm:$0xff] %v8225_v29  ;;  %v8228_v31 = vsel %vm6024_vm4, 4294967295, %v8227_v31  ;;  %vm1158_vm15 = vcmp.eq.s32.totalorder %v950_v51, %v5677_v14  ;;  %vm6031_vm7 = vmor %vm1034_vm5, %vm1155_vm6  ;;  %v8230_v36 = vmov 0  ;;  %vm1038_vm13 = vcmp.eq.s32.totalorder %v950_v51, %v5664_v9 }
 0x488   : > { %8229 = vst [vmem:[#allocation58_spill] sm:$0xff] %v8228_v31  ;;  %v8231_v36 = vsel %vm6031_vm7, 4294967295, %v8230_v36  ;;  %vm1159_vm0 = vcmp.eq.s32.totalorder %v950_v51, %v5679_v15  ;;  %vm6037_vm1 = vmor %vm1035_vm8, %vm1156_vm9  ;;  %v8233_v38 = vmov 0  ;;  %vm1039_vm2 = vcmp.eq.s32.totalorder %v950_v51, %v5667_v11 }
 0x489   : > { %8232 = vst [vmem:[#allocation59_spill] sm:$0xff] %v8231_v36  ;;  %v8234_v38 = vsel %vm6037_vm1, 4294967295, %v8233_v38  ;;  %vm1160_vm3 = vcmp.eq.s32.totalorder %v950_v51, %v5683_v16  ;;  %vm6043_vm4 = vmor %vm1036_vm10, %vm1157_vm14  ;;  %v8236_v43 = vmov 0  ;;  %vm1040_vm5 = vcmp.eq.s32.totalorder %v950_v51, %v5669_v12 }
 0x48a   : > { %8235 = vst [vmem:[#allocation60_spill] sm:$0xff] %v8234_v38  ;;  %v8237_v43 = vsel %vm6043_vm4, 4294967295, %v8236_v43  ;;  %vm1161_vm6 = vcmp.eq.s32.totalorder %v950_v51, %v5685_v17  ;;  %vm6049_vm7 = vmor %vm1037_vm11, %vm1158_vm15  ;;  %v8239_v45 = vmov 0  ;;  %vm1041_vm8 = vcmp.eq.s32.totalorder %v951_v4, %v5654_v3 }
 0x48b   : > { %8238 = vst [vmem:[#allocation61_spill] sm:$0xff] %v8237_v43  ;;  %v8240_v45 = vsel %vm6049_vm7, 4294967295, %v8239_v45  ;;  %vm1162_vm9 = vcmp.eq.s32.totalorder %v951_v4, %v5662_v8  ;;  %vm6055_vm12 = vmor %vm1038_vm13, %vm1159_vm0  ;;  %v8242_v50 = vmov 0  ;;  %vm1042_vm10 = vcmp.eq.s32.totalorder %v951_v4, %v5658_v6 }
 0x48c   : > { %8241 = vst [vmem:[#allocation62_spill] sm:$0xff] %v8240_v45  ;;  %v8243_v50 = vsel %vm6055_vm12, 4294967295, %v8242_v50  ;;  %vm1163_vm14 = vcmp.eq.s32.totalorder %v951_v4, %v5675_v13  ;;  %vm6061_vm1 = vmor %vm1039_vm2, %vm1160_vm3  ;;  %v8245_v52 = vmov 0  ;;  %v952_v51 = vadd.s32 88, %v5642_v59 }
 0x48d   : > { %8244 = vst [vmem:[#allocation63_spill] sm:$0xff] %v8243_v50  ;;  %v8246_v52 = vsel %vm6061_vm1, 4294967295, %v8245_v52  ;;  %vm1043_vm11 = vcmp.eq.s32.totalorder %v951_v4, %v5660_v7  ;;  %vm1164_vm15 = vcmp.eq.s32.totalorder %v951_v4, %v5677_v14  ;;  %vm6068_vm7 = vmor %vm1040_vm5, %vm1161_vm6  ;;  %v8248_v57 = vmov 0 }
 0x48e   : > { %8247 = vst [vmem:[#allocation64_spill] sm:$0xff] %v8246_v52  ;;  %v8249_v57 = vsel %vm6068_vm7, 4294967295, %v8248_v57  ;;  %vm1044_vm13 = vcmp.eq.s32.totalorder %v951_v4, %v5664_v9  ;;  %vm1165_vm0 = vcmp.eq.s32.totalorder %v951_v4, %v5679_v15  ;;  %vm6074_vm12 = vmor %vm1041_vm8, %vm1162_vm9  ;;  %v8251_v61 = vmov 0 }
 0x48f   : > { %8250 = vst [vmem:[#allocation65_spill] sm:$0xff] %v8249_v57  ;;  %v8252_v61 = vsel %vm6074_vm12, 4294967295, %v8251_v61  ;;  %vm1045_vm2 = vcmp.eq.s32.totalorder %v951_v4, %v5667_v11  ;;  %vm1166_vm3 = vcmp.eq.s32.totalorder %v951_v4, %v5683_v16  ;;  %vm6080_vm1 = vmor %vm1042_vm10, %vm1163_vm14  ;;  %v8254_v2 = vmov 0 }
 0x490   : > { %8253 = vst [vmem:[#allocation66_spill] sm:$0xff] %v8252_v61  ;;  %v8255_v2 = vsel %vm6080_vm1, 4294967295, %v8254_v2  ;;  %vm1046_vm5 = vcmp.eq.s32.totalorder %v951_v4, %v5669_v12  ;;  %vm1167_vm6 = vcmp.eq.s32.totalorder %v951_v4, %v5685_v17  ;;  %vm6086_vm7 = vmor %vm1043_vm11, %vm1164_vm15  ;;  %v8257_v5 = vmov 0 }
 0x491   : > { %8256 = vst [vmem:[#allocation67_spill] sm:$0xff] %v8255_v2  ;;  %v8258_v5 = vsel %vm6086_vm7, 4294967295, %v8257_v5  ;;  %vm1047_vm8 = vcmp.eq.s32.totalorder %v952_v51, %v5654_v3  ;;  %vm1168_vm9 = vcmp.eq.s32.totalorder %v952_v51, %v5662_v8  ;;  %vm6092_vm4 = vmor %vm1044_vm13, %vm1165_vm0  ;;  %v8260_v44 = vmov 0 }
 0x492   : > { %8259 = vst [vmem:[#allocation68_spill] sm:$0xff] %v8258_v5  ;;  %v8261_v44 = vsel %vm6092_vm4, 4294967295, %v8260_v44  ;;  %vm1048_vm10 = vcmp.eq.s32.totalorder %v952_v51, %v5658_v6  ;;  %vm1169_vm14 = vcmp.eq.s32.totalorder %v952_v51, %v5675_v13  ;;  %vm6098_vm12 = vmor %vm1045_vm2, %vm1166_vm3  ;;  %v8263_v60 = vmov 0 }
 0x493   : > { %8262 = vst [vmem:[#allocation69_spill] sm:$0xff] %v8261_v44  ;;  %v8264_v60 = vsel %vm6098_vm12, 4294967295, %v8263_v60  ;;  %v953_v4 = vadd.s32 96, %v5642_v59  ;;  %vm1049_vm11 = vcmp.eq.s32.totalorder %v952_v51, %v5660_v7  ;;  %vm1170_vm15 = vcmp.eq.s32.totalorder %v952_v51, %v5677_v14  ;;  %vm6105_vm7 = vmor %vm1046_vm5, %vm1167_vm6 }
 0x494   : > { %8265 = vst [vmem:[#allocation70_spill] sm:$0xff] %v8264_v60  ;;  %v8266_v31 = vmov 0  ;;  %vm1050_vm13 = vcmp.eq.s32.totalorder %v952_v51, %v5664_v9  ;;  %vm1171_vm0 = vcmp.eq.s32.totalorder %v952_v51, %v5679_v15  ;;  %vm6111_vm4 = vmor %vm1047_vm8, %vm1168_vm9  ;;  %v8269_v36 = vmov 0 }
 0x495   : > { %v8267_v31 = vsel %vm6105_vm7, 4294967295, %v8266_v31  ;;  %v8270_v36 = vsel %vm6111_vm4, 4294967295, %v8269_v36  ;;  %vm1051_vm2 = vcmp.eq.s32.totalorder %v952_v51, %v5667_v11  ;;  %vm1172_vm3 = vcmp.eq.s32.totalorder %v952_v51, %v5683_v16  ;;  %vm6117_vm12 = vmor %vm1048_vm10, %vm1169_vm14 }
 0x496   : > { %8268 = vst [vmem:[#allocation71_spill] sm:$0xff] %v8267_v31  ;;  %8271 = vst [vmem:[#allocation72_spill] sm:$0xff] %v8270_v36  ;;  %v8272_v52 = vmov 0  ;;  %vm1052_vm5 = vcmp.eq.s32.totalorder %v952_v51, %v5669_v12  ;;  %vm1173_vm6 = vcmp.eq.s32.totalorder %v952_v51, %v5685_v17  ;;  %v8275_v57 = vmov 0 }
 0x497   : > { %v8273_v52 = vsel %vm6117_vm12, 4294967295, %v8272_v52  ;;  %vm6123_vm7 = vmor %vm1049_vm11, %vm1170_vm15  ;;  %vm1053_vm8 = vcmp.eq.s32.totalorder %v953_v4, %v5654_v3  ;;  %vm1174_vm9 = vcmp.eq.s32.totalorder %v953_v4, %v5662_v8  ;;  %v8278_v60 = vmov 0 }
 0x498   : > { %8274 = vst [vmem:[#allocation73_spill] sm:$0xff] %v8273_v52  ;;  %v8276_v57 = vsel %vm6123_vm7, 4294967295, %v8275_v57  ;;  %vm6129_vm1 = vmor %vm1050_vm13, %vm1171_vm0  ;;  %vm1054_vm10 = vcmp.eq.s32.totalorder %v953_v4, %v5658_v6  ;;  %vm1175_vm14 = vcmp.eq.s32.totalorder %v953_v4, %v5675_v13  ;;  %v8281_v31 = vmov 0 }
 0x499   : > { %8277 = vst [vmem:[#allocation74_spill] sm:$0xff] %v8276_v57  ;;  %v8279_v60 = vsel %vm6129_vm1, 4294967295, %v8278_v60  ;;  %vm6135_vm4 = vmor %vm1051_vm2, %vm1172_vm3  ;;  %v954_v51 = vadd.s32 104, %v5642_v59  ;;  %vm1055_vm11 = vcmp.eq.s32.totalorder %v953_v4, %v5660_v7  ;;  %vm1176_vm15 = vcmp.eq.s32.totalorder %v953_v4, %v5677_v14 }
 0x49a   : > { %8280 = vst [vmem:[#allocation75_spill] sm:$0xff] %v8279_v60  ;;  %v8282_v31 = vsel %vm6135_vm4, 4294967295, %v8281_v31  ;;  %vm6142_vm7 = vmor %vm1052_vm5, %vm1173_vm6  ;;  %v8284_v20 = vmov 0  ;;  %vm1056_vm13 = vcmp.eq.s32.totalorder %v953_v4, %v5664_v9  ;;  %vm1177_vm0 = vcmp.eq.s32.totalorder %v953_v4, %v5679_v15 }
 0x49b   : > { %8283 = vst [vmem:[#allocation76_spill] sm:$0xff] %v8282_v31  ;;  %v8285_v20 = vsel %vm6142_vm7, 4294967295, %v8284_v20  ;;  %vm6148_vm1 = vmor %vm1053_vm8, %vm1174_vm9  ;;  %v8287_v18 = vmov 0  ;;  %vm1057_vm2 = vcmp.eq.s32.totalorder %v953_v4, %v5667_v11  ;;  %vm1178_vm3 = vcmp.eq.s32.totalorder %v953_v4, %v5683_v16 }
 0x49c   : > { %8286 = vst [vmem:[#allocation77_spill] sm:$0xff] %v8285_v20  ;;  %v8288_v18 = vsel %vm6148_vm1, 4294967295, %v8287_v18  ;;  %vm6154_vm4 = vmor %vm1054_vm10, %vm1175_vm14  ;;  %v8290_v31 = vmov 0  ;;  %vm1058_vm5 = vcmp.eq.s32.totalorder %v953_v4, %v5669_v12  ;;  %vm1179_vm6 = vcmp.eq.s32.totalorder %v953_v4, %v5685_v17 }
 0x49d   : > { %8289 = vst [vmem:[#allocation78_spill] sm:$0xff] %v8288_v18  ;;  %v8291_v31 = vsel %vm6154_vm4, 4294967295, %v8290_v31  ;;  %vm6160_vm7 = vmor %vm1055_vm11, %vm1176_vm15  ;;  %v8293_v20 = vmov 0  ;;  %vm1059_vm8 = vcmp.eq.s32.totalorder %v954_v51, %v5654_v3  ;;  %vm1180_vm9 = vcmp.eq.s32.totalorder %v954_v51, %v5662_v8 }
 0x49e   : > { %8292 = vst [vmem:[#allocation79_spill] sm:$0xff] %v8291_v31  ;;  %v8294_v20 = vsel %vm6160_vm7, 4294967295, %v8293_v20  ;;  %vm6166_vm12 = vmor %vm1056_vm13, %vm1177_vm0  ;;  %v8296_v21 = vmov 0  ;;  %vm1060_vm10 = vcmp.eq.s32.totalorder %v954_v51, %v5658_v6  ;;  %vm1181_vm14 = vcmp.eq.s32.totalorder %v954_v51, %v5675_v13 }
 0x49f   : > { %8295 = vst [vmem:[#allocation80_spill] sm:$0xff] %v8294_v20  ;;  %v8297_v21 = vsel %vm6166_vm12, 4294967295, %v8296_v21  ;;  %vm6172_vm1 = vmor %vm1057_vm2, %vm1178_vm3  ;;  %v8299_v19 = vmov 0  ;;  %v955_v4 = vadd.s32 112, %v5642_v59  ;;  %vm1061_vm11 = vcmp.eq.s32.totalorder %v954_v51, %v5660_v7 }
 0x4a0   : > { %8298 = vst [vmem:[#allocation81_spill] sm:$0xff] %v8297_v21  ;;  %v8300_v19 = vsel %vm6172_vm1, 4294967295, %v8299_v19  ;;  %vm1182_vm15 = vcmp.eq.s32.totalorder %v954_v51, %v5677_v14  ;;  %vm6179_vm7 = vmor %vm1058_vm5, %vm1179_vm6  ;;  %v8302_v27 = vmov 0  ;;  %vm1062_vm13 = vcmp.eq.s32.totalorder %v954_v51, %v5664_v9 }
 0x4a1   : > { %8301 = vst [vmem:[#allocation82_spill] sm:$0xff] %v8300_v19  ;;  %v8303_v27 = vsel %vm6179_vm7, 4294967295, %v8302_v27  ;;  %vm1183_vm0 = vcmp.eq.s32.totalorder %v954_v51, %v5679_v15  ;;  %vm6185_vm12 = vmor %vm1059_vm8, %vm1180_vm9  ;;  %v8305_v25 = vmov 0  ;;  %vm1063_vm2 = vcmp.eq.s32.totalorder %v954_v51, %v5667_v11 }
 0x4a2   : > { %8304 = vst [vmem:[#allocation83_spill] sm:$0xff] %v8303_v27  ;;  %v8306_v25 = vsel %vm6185_vm12, 4294967295, %v8305_v25  ;;  %vm1184_vm3 = vcmp.eq.s32.totalorder %v954_v51, %v5683_v16  ;;  %vm6191_vm1 = vmor %vm1060_vm10, %vm1181_vm14  ;;  %v8308_v19 = vmov 0  ;;  %vm1064_vm5 = vcmp.eq.s32.totalorder %v954_v51, %v5669_v12 }
 0x4a3   : > { %8307 = vst [vmem:[#allocation84_spill] sm:$0xff] %v8306_v25  ;;  %v8309_v19 = vsel %vm6191_vm1, 4294967295, %v8308_v19  ;;  %vm1185_vm6 = vcmp.eq.s32.totalorder %v954_v51, %v5685_v17  ;;  %vm6197_vm7 = vmor %vm1061_vm11, %vm1182_vm15  ;;  %v8311_v27 = vmov 0  ;;  %vm1065_vm8 = vcmp.eq.s32.totalorder %v955_v4, %v5654_v3 }
 0x4a4   : > { %8310 = vst [vmem:[#allocation85_spill] sm:$0xff] %v8309_v19  ;;  %v8312_v27 = vsel %vm6197_vm7, 4294967295, %v8311_v27  ;;  %vm1186_vm9 = vcmp.eq.s32.totalorder %v955_v4, %v5662_v8  ;;  %vm6203_vm4 = vmor %vm1062_vm13, %vm1183_vm0  ;;  %v8314_v28 = vmov 0  ;;  %vm1066_vm10 = vcmp.eq.s32.totalorder %v955_v4, %v5658_v6 }
 0x4a5   : > { %8313 = vst [vmem:[#allocation86_spill] sm:$0xff] %v8312_v27  ;;  %v8315_v28 = vsel %vm6203_vm4, 4294967295, %v8314_v28  ;;  %vm1187_vm14 = vcmp.eq.s32.totalorder %v955_v4, %v5675_v13  ;;  %vm6209_vm12 = vmor %vm1063_vm2, %vm1184_vm3  ;;  %v8317_v26 = vmov 0  ;;  %v956_v51 = vadd.s32 120, %v5642_v59 }
 0x4a6   : > { %8316 = vst [vmem:[#allocation87_spill] sm:$0xff] %v8315_v28  ;;  %v8318_v26 = vsel %vm6209_vm12, 4294967295, %v8317_v26  ;;  %vm1067_vm11 = vcmp.eq.s32.totalorder %v955_v4, %v5660_v7  ;;  %vm1188_vm15 = vcmp.eq.s32.totalorder %v955_v4, %v5677_v14  ;;  %vm6216_vm7 = vmor %vm1064_vm5, %vm1185_vm6  ;;  %v8320_v34 = vmov 0 }
 0x4a7   : > { %8319 = vst [vmem:[#allocation88_spill] sm:$0xff] %v8318_v26  ;;  %v8321_v34 = vsel %vm6216_vm7, 4294967295, %v8320_v34  ;;  %vm1068_vm13 = vcmp.eq.s32.totalorder %v955_v4, %v5664_v9  ;;  %vm1189_vm0 = vcmp.eq.s32.totalorder %v955_v4, %v5679_v15  ;;  %vm6222_vm4 = vmor %vm1065_vm8, %vm1186_vm9  ;;  %v8323_v32 = vmov 0 }
 0x4a8   : > { %8322 = vst [vmem:[#allocation89_spill] sm:$0xff] %v8321_v34  ;;  %v8324_v32 = vsel %vm6222_vm4, 4294967295, %v8323_v32  ;;  %vm1069_vm2 = vcmp.eq.s32.totalorder %v955_v4, %v5667_v11  ;;  %vm1190_vm3 = vcmp.eq.s32.totalorder %v955_v4, %v5683_v16  ;;  %vm6228_vm12 = vmor %vm1066_vm10, %vm1187_vm14  ;;  %v8326_v59 = vmov 0 }
 0x4a9   : > { %8325 = vst [vmem:[#allocation90_spill] sm:$0xff] %v8324_v32  ;;  %v8327_v59 = vsel %vm6228_vm12, 4294967295, %v8326_v59  ;;  %vm1070_vm5 = vcmp.eq.s32.totalorder %v955_v4, %v5669_v12  ;;  %vm1191_vm6 = vcmp.eq.s32.totalorder %v955_v4, %v5685_v17  ;;  %vm6234_vm7 = vmor %vm1067_vm11, %vm1188_vm15  ;;  %v8329_v26 = vmov 0 }
 0x4aa   : > { %8328 = vst [vmem:[#allocation91_spill] sm:$0xff] %v8327_v59  ;;  %v8330_v26 = vsel %vm6234_vm7, 4294967295, %v8329_v26  ;;  %vm1071_vm8 = vcmp.eq.s32.totalorder %v956_v51, %v5654_v3  ;;  %vm1192_vm9 = vcmp.eq.s32.totalorder %v956_v51, %v5662_v8  ;;  %vm6240_vm1 = vmor %vm1068_vm13, %vm1189_vm0  ;;  %v8332_v34 = vmov 0 }
 0x4ab   : > { %8331 = vst [vmem:[#allocation92_spill] sm:$0xff] %v8330_v26  ;;  %v8333_v34 = vsel %vm6240_vm1, 4294967295, %v8332_v34  ;;  %vm1072_vm10 = vcmp.eq.s32.totalorder %v956_v51, %v5658_v6  ;;  %vm1193_vm14 = vcmp.eq.s32.totalorder %v956_v51, %v5675_v13  ;;  %vm6246_vm4 = vmor %vm1069_vm2, %vm1190_vm3  ;;  %v8335_v35 = vmov 0 }
 0x4ac   : > { %8334 = vst [vmem:[#allocation93_spill] sm:$0xff] %v8333_v34  ;;  %v8336_v35 = vsel %vm6246_vm4, 4294967295, %v8335_v35  ;;  %vm1073_vm11 = vcmp.eq.s32.totalorder %v956_v51, %v5660_v7  ;;  %vm1194_vm15 = vcmp.eq.s32.totalorder %v956_v51, %v5677_v14  ;;  %vm6252_vm7 = vmor %vm1070_vm5, %vm1191_vm6  ;;  %v8338_v3 = vmov 0 }
 0x4ad   : > { %8337 = vst [vmem:[#allocation94_spill] sm:$0xff] %v8336_v35  ;;  %v8339_v3 = vsel %vm6252_vm7, 4294967295, %v8338_v3  ;;  %vm1074_vm13 = vcmp.eq.s32.totalorder %v956_v51, %v5664_v9  ;;  %vm1195_vm0 = vcmp.eq.s32.totalorder %v956_v51, %v5679_v15  ;;  %vm6258_vm1 = vmor %vm1071_vm8, %vm1192_vm9  ;;  %v8341_v6 = vmov 0 }
 0x4ae   : > { %8340 = vst [vmem:[#allocation95_spill] sm:$0xff] %v8339_v3  ;;  %v8342_v6 = vsel %vm6258_vm1, 4294967295, %v8341_v6  ;;  %vm1075_vm2 = vcmp.eq.s32.totalorder %v956_v51, %v5667_v11  ;;  %vm1196_vm3 = vcmp.eq.s32.totalorder %v956_v51, %v5683_v16  ;;  %vm6264_vm4 = vmor %vm1072_vm10, %vm1193_vm14  ;;  %v8344_v7 = vmov 0 }
 0x4af   : > { %8343 = vst [vmem:[#allocation96_spill] sm:$0xff] %v8342_v6  ;;  %v8345_v7 = vsel %vm6264_vm4, 4294967295, %v8344_v7  ;;  %vm1076_vm5 = vcmp.eq.s32.totalorder %v956_v51, %v5669_v12  ;;  %vm1197_vm6 = vcmp.eq.s32.totalorder %v956_v51, %v5685_v17  ;;  %vm6270_vm7 = vmor %vm1073_vm11, %vm1194_vm15  ;;  %v8347_v8 = vmov 0 }
 0x4b0   : > { %8346 = vst [vmem:[#allocation97_spill] sm:$0xff] %v8345_v7  ;;  %v8348_v8 = vsel %vm6270_vm7, 4294967295, %v8347_v8  ;;  %vm6274_vm8 = vmor %vm1074_vm13, %vm1195_vm0  ;;  %v8350_v9 = vmov 0  ;;  %v8353_v11 = vmov 0  ;;  %v8356_v13 = vmov 0  ;;  %1488 = sbr.rel (%p4660_p5) target bundleno = 1930 (0x78a), region = 48 }
 0x4b1   : > { %8349 = vst [vmem:[#allocation98_spill] sm:$0xff] %v8348_v8  ;;  %v8351_v9 = vsel %vm6274_vm8, 4294967295, %v8350_v9  ;;  %vm6278_vm9 = vmor %vm1075_vm2, %vm1196_vm3 }
 0x4b2   : > { %8352 = vst [vmem:[#allocation99_spill] sm:$0xff] %v8351_v9  ;;  %v8354_v11 = vsel %vm6278_vm9, 4294967295, %v8353_v11  ;;  %vm6282_vm10 = vmor %vm1076_vm5, %vm1197_vm6 }
 0x4b3   : > { %8355 = vst [vmem:[#allocation100_spill] sm:$0xff] %v8354_v11  ;;  %v8357_v13 = vsel %vm6282_vm10, 4294967295, %v8356_v13 }
 0x4b4   : > { %8358 = vst [vmem:[#allocation101_spill] sm:$0xff] %v8357_v13 }
 0x4b5   : > { %v6290_v12 = vld [vmem:[%s7963_s4 + $0x40] sm:$0xff]  ;;  %v5523_v14 = vmov 15   ;;  %v8014_v15 = vmov 1.0   ;;  %vm8359_vm14 = vnez %v8333_v34  ;;  %vm8360_vm11 = vnez %v8324_v32  ;;  %v1490_v4 = vld [vmem:[%s7963_s4 + $0x38] sm:$0x7f]  ;;  %v2087_v51 = vld [vmem:[%s7960_s1 + $0x10] sm:$0xff] }
 0x4b6   : > { %5374 = vset.pattern.permute.xlu1 %v5523_v14  ;;  %4661 = vmatprep.subr.msk.mxu0 %vm6264_vm4, %v8014_v15  ;;  %vm8361_vm15 = vnez %v8330_v26  ;;  %v2085_v16 = vld [vmem:[%s7960_s1] sm:$0xff]  ;;  %vm8362_vm13 = vnez %v8309_v19  ;;  %vm8363_vm0 = vnez %v8315_v28  ;;  %v5525_v17 = vmov 0   ;;  %v2155_v11 = vld [vmem:[%s7960_s1 + $0x230] sm:$0xff]  ;;  %v2170_v13 = vld [vmem:[%s7960_s1 + $0x2a8] sm:$0xff] }
 0x4b7   : > { %4693 = vmatprep.subr.msk.mxu1 %vm6274_vm8, %v8014_v15  ;;  %1809 = vperm.xlu1 %5374, %v6290_v12   ;;  %vm8364_vm2 = vnez %v8306_v25  ;;  %vm8365_vm3 = vnez %v8312_v27  ;;  %vm8366_vm5 = vnez %v8291_v31  ;;  %vm8367_vm6 = vnez %v8297_v21 }
 0x4b8   : > { %4662 = vmatpush1.msk.msra.mxu0 %vm6258_vm1, %v8014_v15  ;;  %4694 = vmatpush1.msk.msra.mxu1 %vm6270_vm7, %v8014_v15  ;;  %v5526_v14 = vmov 22  }
 0x4b9   : > { %4663 = vmatprep.subr.msk.mxu0 %vm6228_vm12, %v8014_v15  ;;  %4695 = vmatprep.subr.msk.mxu1 %vm8359_vm14, %v8014_v15  ;;  %vm8368_vm14 = vnez %v8288_v18 }
 0x4ba   : > { %4664 = vmatpush1.msk.msra.mxu0 %vm8360_vm11, %v8014_v15  ;;  %4696 = vmatpush1.msk.msra.mxu1 %vm8361_vm15, %v8014_v15  ;;  %vm8369_vm11 = vnez %v8294_v20  ;;  %vm8370_vm15 = vnez %v8273_v52 }
 0x4bb   : > { %4665 = vmatprep.subr.msk.mxu0 %vm8362_vm13, %v8014_v15  ;;  %4697 = vmatprep.subr.msk.mxu1 %vm8363_vm0, %v8014_v15  ;;  %vm8371_vm13 = vnez %v8279_v60  ;;  %vm8372_vm0 = vnez %v8270_v36 }
 0x4bc   : > { %5375 = vset.pattern.permute.xlu1 %v5525_v17  ;;  %4666 = vmatpush1.msk.msra.mxu0 %vm8364_vm2, %v8014_v15  ;;  %vm8373_vm2 = vnez %v8276_v57 }
 0x4bd   : > { %4698 = vmatpush1.msk.msra.mxu1 %vm8365_vm3, %v8014_v15  ;;  %2182 = vperm.xlu1 %5375, %v2085_v16   ;;  %vm8374_vm3 = vnez %v8255_v2  ;;  %v1489_v16 = vld [vmem:[%s7963_s4 + $0x30] sm:$0xff] }
 0x4be   : > { %4667 = vmatprep.subr.msk.mxu0 %vm8366_vm5, %v8014_v15  ;;  %4699 = vmatprep.subr.msk.mxu1 %vm8367_vm6, %v8014_v15  ;;  %vm8375_vm5 = vnez %v8261_v44  ;;  %vm8376_vm6 = vnez %v8252_v61 }
 0x4bf   : > { %4668 = vmatpush1.msk.msra.mxu0 %vm8368_vm14, %v8014_v15  ;;  %4700 = vmatpush1.msk.msra.mxu1 %vm8369_vm11, %v8014_v15  ;;  %vm8377_vm14 = vnez %v8258_v5  ;;  %vm8378_vm11 = vnez %v8237_v43  ;;  %v2165_v5 = vld [vmem:[%s7960_s1 + $0x280] sm:$0xff] }
 0x4c0   : > { %4669 = vmatprep.subr.msk.mxu0 %vm8370_vm15, %v8014_v15  ;;  %4701 = vmatprep.subr.msk.mxu1 %vm8371_vm13, %v8014_v15  ;;  %vm8379_vm15 = vnez %v8243_v50  ;;  %vm8380_vm13 = vnez %v8234_v38  ;;  %v2149_v50 = vld [vmem:[%s7960_s1 + $0x200] sm:$0xff] }
 0x4c1   : > { %5373 = vset.pattern.permute.xlu0 %v5526_v14  ;;  %4670 = vmatpush1.msk.msra.mxu0 %vm8372_vm0, %v8014_v15  ;;  %vm8381_vm0 = vnez %v8240_v45  ;;  %v2086_v14 = vld [vmem:[%s7960_s1 + $0x8] sm:$0xff] }
 0x4c2   : > { %4702 = vmatpush1.msk.msra.mxu1 %vm8373_vm2, %v8014_v15  ;;  %1500 = vperm.xlu0 %5373, %v1490_v4   ;;  %v2088_v4 = vld [vmem:[%s7960_s1 + $0x18] sm:$0xff]  ;;  %vm8382_vm2 = vnez %v8219_v22  ;;  %v2150_v45 = vld [vmem:[%s7960_s1 + $0x208] sm:$0xff] }
 0x4c3   : > { %2188 = vperm.xlu1 %5375, %v2087_v51   ;;  %4671 = vmatprep.subr.msk.mxu0 %vm8374_vm3, %v8014_v15  ;;  %vm8383_vm3 = vnez %v8225_v29  ;;  %v2090_v51 = vld [vmem:[%s7960_s1 + $0x28] sm:$0xff] }
 0x4c4   : > { %4703 = vmatprep.subr.msk.mxu1 %vm8375_vm5, %v8014_v15  ;;  %4672 = vmatpush1.msk.msra.mxu0 %vm8376_vm6, %v8014_v15  ;;  %vm8384_vm5 = vnez %v8216_v58  ;;  %vm8385_vm6 = vnez %v8222_v24 }
 0x4c5   : > { %4704 = vmatpush1.msk.msra.mxu1 %vm8377_vm14, %v8014_v15  ;;  %4673 = vmatprep.subr.msk.mxu0 %vm8378_vm11, %v8014_v15  ;;  %vm8386_vm14 = vnez %v8201_v23  ;;  %vm8387_vm11 = vnez %v8207_v37  ;;  %v2152_v37 = vld [vmem:[%s7960_s1 + $0x218] sm:$0xff] }
 0x4c6   : > { %4705 = vmatprep.subr.msk.mxu1 %vm8379_vm15, %v8014_v15  ;;  %4674 = vmatpush1.msk.msra.mxu0 %vm8380_vm13, %v8014_v15  ;;  %vm8388_vm15 = vnez %v8198_v10  ;;  %vm8389_vm13 = vnez %v8204_v30  ;;  %v2168_v30 = vld [vmem:[%s7960_s1 + $0x298] sm:$0xff] }
 0x4c7   : > { %4706 = vmatpush1.msk.msra.mxu1 %vm8381_vm0, %v8014_v15  ;;  %1495 = vperm.xlu0 %5373, %v1489_v16   ;;  %vm8390_vm0 = vnez %v8183_v63  ;;  %v2089_v16 = vld [vmem:[%s7960_s1 + $0x20] sm:$0xff] }
 0x4c8   : > { %2191 = vperm.xlu1 %5375, %v2088_v4   ;;  %4675 = vmatprep.subr.msk.mxu0 %vm8382_vm2, %v8014_v15  ;;  %vm8391_vm2 = vnez %v8189_v1  ;;  %v2094_v4 = vld [vmem:[%s7960_s1 + $0x48] sm:$0xff]  ;;  %v2153_v1 = vld [vmem:[%s7960_s1 + $0x220] sm:$0xff] }
 0x4c9   : > { %4707 = vmatprep.subr.msk.mxu1 %vm8383_vm3, %v8014_v15  ;;  %4676 = vmatpush1.msk.msra.mxu0 %vm8384_vm5, %v8014_v15  ;;  %vm8392_vm3 = vnez %v8180_v62  ;;  %vm8393_vm5 = vnez %v8186_v0  ;;  %v2169_v0 = vld [vmem:[%s7960_s1 + $0x2a0] sm:$0xff] }
 0x4ca   : > { %4708 = vmatpush1.msk.msra.mxu1 %vm8385_vm6, %v8014_v15  ;;  %4677 = vmatprep.subr.msk.mxu0 %vm8386_vm14, %v8014_v15  ;;  %vm8394_vm6 = vnez %v8165_v54  ;;  %vm8395_vm14 = vnez %v8171_v56 }
 0x4cb   : > { %4709 = vmatprep.subr.msk.mxu1 %vm8387_vm11, %v8014_v15  ;;  %4678 = vmatpush1.msk.msra.mxu0 %vm8388_vm15, %v8014_v15  ;;  %vm8396_vm11 = vnez %v8162_v53  ;;  %vm8397_vm15 = vnez %v8168_v55  ;;  %v2154_v55 = vld [vmem:[%s7960_s1 + $0x228] sm:$0xff] }
 0x4cc   : > { %4710 = vmatpush1.msk.msra.mxu1 %vm8389_vm13, %v8014_v15  ;;  %5376 = vset.pattern.permute.xlu0 %v5525_v17  ;;  %v2092_v17 = vld [vmem:[%s7960_s1 + $0x38] sm:$0xff]  ;;  %vm8398_vm13 = vnez %v8147_v47  ;;  %v2166_v47 = vld [vmem:[%s7960_s1 + $0x288] sm:$0xff] }
 0x4cd   : > { %2197 = vperm.xlu1 %5375, %v2090_v51   ;;  %4679 = vmatprep.subr.msk.mxu0 %vm8390_vm0, %v8014_v15  ;;  %vm8399_vm0 = vnez %v8153_v49  ;;  %v2091_v51 = vld [vmem:[%s7960_s1 + $0x30] sm:$0xff] }
 0x4ce   : > { %4711 = vmatprep.subr.msk.mxu1 %vm8391_vm2, %v8014_v15  ;;  %2185 = vperm.xlu0 %5376, %v2086_v14   ;;  %vm8400_vm2 = vnez %v8144_v46  ;;  %v8407_v14 = vld [vmem:[#allocation21_spill] sm:$0xff]  ;;  %v2151_v46 = vld [vmem:[%s7960_s1 + $0x210] sm:$0xff] }
 0x4cf   : > { %4680 = vmatpush1.msk.msra.mxu0 %vm8392_vm3, %v8014_v15  ;;  %4712 = vmatpush1.msk.msra.mxu1 %vm8393_vm5, %v8014_v15  ;;  %vm8401_vm3 = vnez %v8150_v48  ;;  %vm8402_vm5 = vnez %v8129_v40  ;;  %v8425_v48 = vld [vmem:[#allocation6_spill] sm:$0xff] }
 0x4d0   : > { %4681 = vmatprep.subr.msk.mxu0 %vm8394_vm6, %v8014_v15  ;;  %4713 = vmatprep.subr.msk.mxu1 %vm8395_vm14, %v8014_v15  ;;  %vm8403_vm6 = vnez %v8135_v42  ;;  %vm8404_vm14 = vnez %v8126_v39  ;;  %v6518_v42 = vld [vmem:[#allocation3] sm:$0xff]  ;;  %v2167_v40 = vld [vmem:[%s7960_s1 + $0x290] sm:$0xff] }
 0x4d1   : > { %4682 = vmatpush1.msk.msra.mxu0 %vm8396_vm11, %v8014_v15  ;;  %4714 = vmatpush1.msk.msra.mxu1 %vm8397_vm15, %v8014_v15  ;;  %vm8405_vm11 = vnez %v8132_v41  ;;  %vm8406_vm15 = vnez %v8111_v33  ;;  %v8413_v41 = vld [vmem:[#allocation13_spill] sm:$0xff] }
 0x4d2   : > { %2203 = vperm.xlu1 %5375, %v2092_v17   ;;  %4683 = vmatprep.subr.msk.mxu0 %vm8398_vm13, %v8014_v15  ;;  %vm8408_vm13 = vnez %v8407_v14  ;;  %v8409_v17 = vld [vmem:[#allocation18_spill] sm:$0xff]  ;;  %v8415_v14 = vld [vmem:[#allocation15_spill] sm:$0xff] }
 0x4d3   : > { %4715 = vmatprep.subr.msk.mxu1 %vm8399_vm0, %v8014_v15  ;;  %2194 = vperm.xlu0 %5376, %v2089_v16   ;;  %vm8410_vm0 = vnez %v8409_v17  ;;  %v8411_v16 = vld [vmem:[#allocation20_spill] sm:$0xff] }
 0x4d4   : > { %4684 = vmatpush1.msk.msra.mxu0 %vm8400_vm2, %v8014_v15  ;;  %4716 = vmatpush1.msk.msra.mxu1 %vm8401_vm3, %v8014_v15  ;;  %vm8412_vm2 = vnez %v8411_v16  ;;  %vm8414_vm3 = vnez %v8413_v41  ;;  %v8417_v17 = vld [vmem:[#allocation12_spill] sm:$0xff]  ;;  %v8419_v16 = vld [vmem:[#allocation14_spill] sm:$0xff]  ;;  %v8421_v41 = vld [vmem:[#allocation7_spill] sm:$0xff] }
 0x4d5   : > { %4685 = vmatprep.subr.msk.mxu0 %vm8402_vm5, %v8014_v15  ;;  %4717 = vmatprep.subr.msk.mxu1 %vm8403_vm6, %v8014_v15  ;;  %vm8416_vm5 = vnez %v8415_v14  ;;  %vm8418_vm6 = vnez %v8417_v17  ;;  %v8423_v14 = vld [vmem:[#allocation9_spill] sm:$0xff]  ;;  %v8010_v17 = vmov 0.0  }
 0x4d6   : > { %4686 = vmatpush1.msk.msra.mxu0 %vm8404_vm14, %v8014_v15  ;;  %4718 = vmatpush1.msk.msra.mxu1 %vm8405_vm11, %v8014_v15  ;;  %vm8420_vm14 = vnez %v8419_v16  ;;  %vm8422_vm11 = vnez %v8421_v41  ;;  %v8427_v16 = vld [vmem:[#allocation8_spill] sm:$0xff]  ;;  %v2100_v41 = vld [vmem:[%s7960_s1 + $0x78] sm:$0xff] }
 0x4d7   : > { %2209 = vperm.xlu1 %5375, %v2094_v4   ;;  %4687 = vmatprep.subr.msk.mxu0 %vm8406_vm15, %v8014_v15  ;;  %v2096_v4 = vld [vmem:[%s7960_s1 + $0x58] sm:$0xff]  ;;  %vm8424_vm15 = vnez %v8423_v14  ;;  %v2097_v14 = vld [vmem:[%s7960_s1 + $0x60] sm:$0xff] }
 0x4d8   : > { %4719 = vmatprep.subr.msk.mxu1 %vm8408_vm13, %v8014_v15  ;;  %2200 = vperm.xlu0 %5376, %v2091_v51   ;;  %v2093_v51 = vld [vmem:[%s7960_s1 + $0x40] sm:$0xff]  ;;  %vm8426_vm13 = vnez %v8425_v48  ;;  %v6542_v48 = vld [vmem:[#allocation3 + $0x8] sm:$0x7f] }
 0x4d9   : > { %4688 = vmatpush1.msk.msra.mxu0 %vm8410_vm0, %v8014_v15  ;;  %4720 = vmatpush1.msk.msra.mxu1 %vm8412_vm2, %v8014_v15  ;;  %vm8428_vm0 = vnez %v8427_v16  ;;  %vm8429_vm2 = vnez %v8339_v3  ;;  %v8433_v16 = vld [vmem:[#allocation88_spill] sm:$0xff]  ;;  %v8444_v3 = vld [vmem:[#allocation71_spill] sm:$0xff] }
 0x4da   : > { %4689 = vmatprep.subr.msk.mxu0 %vm8414_vm3, %v8014_v15  ;;  %4721 = vmatprep.subr.msk.mxu1 %vm8416_vm5, %v8014_v15  ;;  %vm8430_vm3 = vnez %v8336_v35  ;;  %v2116_v35 = vld [vmem:[%s7960_s1 + $0xf8] sm:$0xff] }
 0x4db   : > { %4690 = vmatpush1.msk.msra.mxu0 %vm8418_vm6, %v8014_v15  ;;  %4722 = vmatpush1.msk.msra.mxu1 %vm8420_vm14, %v8014_v15  ;;  %vm8434_vm6 = vnez %v8433_v16  ;;  %v2113_v16 = vld [vmem:[%s7960_s1 + $0xe0] sm:$0xff] }
 0x4dc   : > { %2215 = vperm.xlu1 %5375, %v2096_v4   ;;  %4691 = vmatprep.subr.msk.mxu0 %vm8422_vm11, %v8014_v15  ;;  %v2098_v4 = vld [vmem:[%s7960_s1 + $0x68] sm:$0xff] }
 0x4dd   : > { %4723 = vmatprep.subr.msk.mxu1 %vm8424_vm15, %v8014_v15  ;;  %2206 = vperm.xlu0 %5376, %v2093_v51   ;;  %v2095_v51 = vld [vmem:[%s7960_s1 + $0x50] sm:$0xff] }
 0x4de   : > { %4692 = vmatpush1.msk.msra.mxu0 %vm8426_vm13, %v8014_v15  ;;  %1567 = vmatprep.mubr.f32.mxu0 %v8010_v17 }
 0x4df   : > { %4724 = vmatpush1.msk.msra.mxu1 %vm8428_vm0, %v8014_v15  ;;  %1644 = vmatprep.mubr.f32.mxu1 %v8010_v17  ;;  %vm8445_vm0 = vnez %v8444_v3  ;;  %v2111_v3 = vld [vmem:[%s7960_s1 + $0xd0] sm:$0xff] }
 0x4e0   : > { %1568 = vmatmul.mubr.f32.vlgmr.msra.gmra.mxu0 %v6518_v42  ;;  %1645 = vmatmul.mubr.f32.vlgmr.msra.gmra.mxu1 %v6518_v42 }
 0x4e1   : > { %4725 = vmatprep.subr.msk.mxu0 %vm6282_vm10, %v8014_v15  ;;  %2221 = vperm.xlu1 %5375, %v2098_v4   ;;  %v8431_v4 = vld [vmem:[#allocation89_spill] sm:$0xff] }
 0x4e2   : > { %4726 = vmatpush1.msk.msra.mxu0 %vm6278_vm9, %v8014_v15  ;;  %2212 = vperm.xlu0 %5376, %v2095_v51   ;;  %vm8432_vm5 = vnez %v8431_v4  ;;  %v2099_v51 = vld [vmem:[%s7960_s1 + $0x70] sm:$0xff]  ;;  %v8437_v4 = vmov 0.0  }
 0x4e3   : > { %4727 = vmatprep.subr.msk.mxu0 %vm8429_vm2, %v8014_v15  ;;  %1573 = vmatprep.mubr.f32.mxu0 %v8010_v17 }
 0x4e4   : > { %1650 = vmatprep.mubr.f32.mxu1 %v8010_v17  ;;  %4728 = vmatpush1.msk.msra.mxu0 %vm8430_vm3, %v8014_v15  ;;  %v8435_v17 = vld [vmem:[#allocation83_spill] sm:$0xff] }
 0x4e5   : > { %1574 = vmatmul.mubr.f32.gmra.mxu0 %v6542_v48  ;;  %1651 = vmatmul.mubr.f32.gmra.mxu1 %v6542_v48  ;;  %vm8436_vm14 = vnez %v8435_v17  ;;  %v8442_v17 = vld [vmem:[#allocation76_spill] sm:$0xff] }
 0x4e6   : > { %4729 = vmatprep.subr.msk.mxu0 %vm8432_vm5, %v8014_v15  ;;  %2227 = vperm.xlu1 %5375, %v2100_v41   ;;  %v8438_v41 = vld [vmem:[#allocation82_spill] sm:$0xff]  ;;  %vm8443_vm13 = vnez %v8442_v17  ;;  %v8452_v17 = vld [vmem:[#allocation59_spill] sm:$0xff] }
 0x4e7   : > { %4730 = vmatpush1.msk.msra.mxu0 %vm8434_vm6, %v8014_v15  ;;  %2218 = vperm.xlu0 %5376, %v2097_v14   ;;  %vm8439_vm11 = vnez %v8438_v41  ;;  %v8440_v14 = vld [vmem:[#allocation77_spill] sm:$0xff]  ;;  %v2115_v41 = vld [vmem:[%s7960_s1 + $0xf0] sm:$0xff]  ;;  %vm8453_vm6 = vnez %v8452_v17  ;;  %v8460_v17 = vld [vmem:[#allocation47_spill] sm:$0xff] }
 0x4e8   : > { %4731 = vmatprep.subr.msk.mxu0 %vm8436_vm14, %v8014_v15  ;;  %1721 = vmatprep.mubr.f32.mxu0 %v8437_v4  ;;  %vm8441_vm15 = vnez %v8440_v14  ;;  %v8446_v14 = vld [vmem:[#allocation70_spill] sm:$0xff] }
 0x4e9   : > { %4732 = vmatpush1.msk.msra.mxu0 %vm8439_vm11, %v8014_v15  ;;  %1969 = vmatprep.mubr.f32.mxu1 %v8437_v4  ;;  %vm8447_vm2 = vnez %v8446_v14  ;;  %v2114_v14 = vld [vmem:[%s7960_s1 + $0xe8] sm:$0xff] }
 0x4ea   : > { %4733 = vmatprep.subr.msk.mxu0 %vm8441_vm15, %v8014_v15  ;;  %2224 = vperm.xlu1 %5375, %v2099_v51   ;;  %v8448_v51 = vld [vmem:[#allocation65_spill] sm:$0xff] }
 0x4eb   : > { %4734 = vmatpush1.msk.msra.mxu0 %vm8443_vm13, %v8014_v15  ;;  %2275 = vperm.xlu0 %5376, %v2116_v35   ;;  %vm8449_vm3 = vnez %v8448_v51  ;;  %v8450_v35 = vld [vmem:[#allocation64_spill] sm:$0xff]  ;;  %v8454_v51 = vld [vmem:[#allocation58_spill] sm:$0xff]  ;;  %vm8461_vm13 = vnez %v8460_v17  ;;  %v8468_v17 = vld [vmem:[#allocation35_spill] sm:$0xff] }
 0x4ec   : > { %4735 = vmatprep.subr.msk.mxu0 %vm8445_vm0, %v8014_v15  ;;  %vm8451_vm5 = vnez %v8450_v35  ;;  %vm8455_vm14 = vnez %v8454_v51  ;;  %v2109_v35 = vld [vmem:[%s7960_s1 + $0xc0] sm:$0xff]  ;;  %v2112_v51 = vld [vmem:[%s7960_s1 + $0xd8] sm:$0xff] }
 0x4ed   : > { %4736 = vmatpush1.msk.msra.mxu0 %vm8447_vm2, %v8014_v15 }
 0x4ee   : > { %4737 = vmatprep.subr.msk.mxu0 %vm8449_vm3, %v8014_v15  ;;  %2266 = vperm.xlu1 %5375, %v2113_v16   ;;  %v8456_v16 = vld [vmem:[#allocation53_spill] sm:$0xff] }
 0x4ef   : > { %4738 = vmatpush1.msk.msra.mxu0 %vm8451_vm5, %v8014_v15  ;;  %2272 = vperm.xlu0 %5376, %v2115_v41   ;;  %vm8457_vm11 = vnez %v8456_v16  ;;  %v8458_v41 = vld [vmem:[#allocation52_spill] sm:$0xff]  ;;  %v8462_v16 = vld [vmem:[#allocation46_spill] sm:$0xff]  ;;  %vm8469_vm5 = vnez %v8468_v17  ;;  %v8476_v17 = vld [vmem:[#allocation23_spill] sm:$0xff] }
 0x4f0   : > { %4739 = vmatprep.subr.msk.mxu0 %vm8453_vm6, %v8014_v15  ;;  %vm8459_vm15 = vnez %v8458_v41  ;;  %vm8463_vm0 = vnez %v8462_v16  ;;  %v2107_v41 = vld [vmem:[%s7960_s1 + $0xb0] sm:$0xff]  ;;  %v2110_v16 = vld [vmem:[%s7960_s1 + $0xc8] sm:$0xff] }
 0x4f1   : > { %4740 = vmatpush1.msk.msra.mxu0 %vm8455_vm14, %v8014_v15 }
 0x4f2   : > { %4741 = vmatprep.subr.msk.mxu0 %vm8457_vm11, %v8014_v15  ;;  %2260 = vperm.xlu1 %5375, %v2111_v3   ;;  %v8464_v3 = vld [vmem:[#allocation41_spill] sm:$0xff] }
 0x4f3   : > { %4742 = vmatpush1.msk.msra.mxu0 %vm8459_vm15, %v8014_v15  ;;  %2269 = vperm.xlu0 %5376, %v2114_v14   ;;  %vm8465_vm2 = vnez %v8464_v3  ;;  %v8466_v14 = vld [vmem:[#allocation40_spill] sm:$0xff]  ;;  %v8470_v3 = vld [vmem:[#allocation34_spill] sm:$0xff]  ;;  %vm8477_vm15 = vnez %v8476_v17  ;;  %v8484_v17 = vld [vmem:[#allocation11_spill] sm:$0xff] }
 0x4f4   : > { %4743 = vmatprep.subr.msk.mxu0 %vm8461_vm13, %v8014_v15  ;;  %vm8467_vm3 = vnez %v8466_v14  ;;  %vm8471_vm6 = vnez %v8470_v3  ;;  %v2105_v14 = vld [vmem:[%s7960_s1 + $0xa0] sm:$0xff]  ;;  %v2108_v3 = vld [vmem:[%s7960_s1 + $0xb8] sm:$0xff] }
 0x4f5   : > { %4744 = vmatpush1.msk.msra.mxu0 %vm8463_vm0, %v8014_v15 }
 0x4f6   : > { %4745 = vmatprep.subr.msk.mxu0 %vm8465_vm2, %v8014_v15  ;;  %2254 = vperm.xlu1 %5375, %v2109_v35   ;;  %v8472_v35 = vld [vmem:[#allocation29_spill] sm:$0xff] }
 0x4f7   : > { %4746 = vmatpush1.msk.msra.mxu0 %vm8467_vm3, %v8014_v15  ;;  %2263 = vperm.xlu0 %5376, %v2112_v51   ;;  %vm8473_vm14 = vnez %v8472_v35  ;;  %v8474_v51 = vld [vmem:[#allocation28_spill] sm:$0xff]  ;;  %v8478_v35 = vld [vmem:[#allocation22_spill] sm:$0xff]  ;;  %vm8485_vm3 = vnez %v8484_v17  ;;  %v2164_v17 = vld [vmem:[%s7960_s1 + $0x278] sm:$0xff] }
 0x4f8   : > { %4747 = vmatprep.subr.msk.mxu0 %vm8469_vm5, %v8014_v15  ;;  %vm8475_vm11 = vnez %v8474_v51  ;;  %vm8479_vm13 = vnez %v8478_v35  ;;  %v2103_v51 = vld [vmem:[%s7960_s1 + $0x90] sm:$0xff]  ;;  %v2106_v35 = vld [vmem:[%s7960_s1 + $0xa8] sm:$0xff] }
 0x4f9   : > { %4748 = vmatpush1.msk.msra.mxu0 %vm8471_vm6, %v8014_v15  ;;  %vm1815_vm6 = vcmask 1046528  }
 0x4fa   : > { %4749 = vmatprep.subr.msk.mxu0 %vm8473_vm14, %v8014_v15  ;;  %2248 = vperm.xlu1 %5375, %v2107_v41   ;;  %v8480_v41 = vld [vmem:[#allocation17_spill] sm:$0xff]  ;;  %vm8069_vm14 = vcmask 121856  }
 0x4fb   : > { %4750 = vmatpush1.msk.msra.mxu0 %vm8475_vm11, %v8014_v15  ;;  %2257 = vperm.xlu0 %5376, %v2110_v16   ;;  %vm8481_vm0 = vnez %v8480_v41  ;;  %v8482_v16 = vld [vmem:[#allocation16_spill] sm:$0xff]  ;;  %v8486_v41 = vld [vmem:[#allocation10_spill] sm:$0xff] }
 0x4fc   : > { %4751 = vmatprep.subr.msk.mxu0 %vm8477_vm15, %v8014_v15  ;;  %vm8483_vm2 = vnez %v8482_v16  ;;  %vm8487_vm5 = vnez %v8486_v41  ;;  %v2102_v16 = vld [vmem:[%s7960_s1 + $0x88] sm:$0xff]  ;;  %v2179_v41 = vld [vmem:[%s7960_s1 + $0x2f0] sm:$0xff] }
 0x4fd   : > { %4752 = vmatpush1.msk.msra.mxu0 %vm8479_vm13, %v8014_v15 }
 0x4fe   : > { %4753 = vmatprep.subr.msk.mxu0 %vm8481_vm0, %v8014_v15  ;;  %2242 = vperm.xlu1 %5375, %v2105_v14   ;;  %v2101_v14 = vld [vmem:[%s7960_s1 + $0x80] sm:$0xff] }
 0x4ff   : > { %4754 = vmatpush1.msk.msra.mxu0 %vm8483_vm2, %v8014_v15  ;;  %2251 = vperm.xlu0 %5376, %v2108_v3   ;;  %v2104_v3 = vld [vmem:[%s7960_s1 + $0x98] sm:$0xff] }
 0x500   : > { %4755 = vmatprep.subr.msk.mxu0 %vm8485_vm3, %v8014_v15 }
 0x501   : > { %4756 = vmatpush1.msk.msra.mxu0 %vm8487_vm5, %v8014_v15  ;;  %v2171_v15 = vld [vmem:[%s7960_s1 + $0x2b0] sm:$0xff] }
 0x502   : > { %1722 = vmatmul.mubr.f32.vlgmr.msra.gmra.mxu0 %v6518_v42  ;;  %2236 = vperm.xlu1 %5375, %v2103_v51   ;;  %v2132_v42 = vld [vmem:[%s7960_s1 + $0x178] sm:$0xff] }
 0x503   : > { %2245 = vperm.xlu0 %5376, %v2106_v35   ;;  %1727 = vmatprep.mubr.f32.mxu0 %v8437_v4  ;;  %v2180_v51 = vld [vmem:[%s7960_s1 + $0x2f8] sm:$0xff]  ;;  %v2147_v35 = vld [vmem:[%s7960_s1 + $0x1f0] sm:$0xff] }
 0x506   : > { %1728 = vmatmul.mubr.f32.gmra.mxu0 %v6542_v48  ;;  %2230 = vperm.xlu1 %5375, %v2101_v14   ;;  %v2148_v48 = vld [vmem:[%s7960_s1 + $0x1f8] sm:$0xff]  ;;  %v2131_v14 = vld [vmem:[%s7960_s1 + $0x170] sm:$0xff] }
 0x507   : > { %2239 = vperm.xlu0 %5376, %v2104_v3   ;;  %1898 = vmatprep.mubr.f32.mxu0 %v8437_v4  ;;  %v2163_v3 = vld [vmem:[%s7960_s1 + $0x270] sm:$0xff] }
 0x50a   : > { %2323 = vperm.xlu1 %5375, %v2132_v42   ;;  %v2146_v42 = vld [vmem:[%s7960_s1 + $0x1e8] sm:$0xff] }
 0x50b   : > { %2233 = vperm.xlu0 %5376, %v2102_v16   ;;  %v2178_v16 = vld [vmem:[%s7960_s1 + $0x2e8] sm:$0xff] }
 0x50e   : > { %2467 = vperm.xlu1 %5375, %v2180_v51   ;;  %v2130_v51 = vld [vmem:[%s7960_s1 + $0x168] sm:$0xff] }
 0x50f   : > { %2371 = vperm.xlu0 %5376, %v2148_v48   ;;  %v2162_v48 = vld [vmem:[%s7960_s1 + $0x268] sm:$0xff] }
 0x512   : > { %2419 = vperm.xlu1 %5375, %v2164_v17   ;;  %v2145_v17 = vld [vmem:[%s7960_s1 + $0x1e0] sm:$0xff] }
 0x513   : > { %2368 = vperm.xlu0 %5376, %v2147_v35   ;;  %v2177_v35 = vld [vmem:[%s7960_s1 + $0x2e0] sm:$0xff] }
 0x516   : > { %2464 = vperm.xlu1 %5375, %v2179_v41   ;;  %v2129_v41 = vld [vmem:[%s7960_s1 + $0x160] sm:$0xff] }
 0x517   : > { %2320 = vperm.xlu0 %5376, %v2131_v14   ;;  %v2161_v14 = vld [vmem:[%s7960_s1 + $0x260] sm:$0xff] }
 0x51a   : > { %2416 = vperm.xlu1 %5375, %v2163_v3   ;;  %v2144_v3 = vld [vmem:[%s7960_s1 + $0x1d8] sm:$0xff] }
 0x51b   : > { %2365 = vperm.xlu0 %5376, %v2146_v42   ;;  %v2176_v42 = vld [vmem:[%s7960_s1 + $0x2d8] sm:$0xff] }
 0x51e   : > { %2461 = vperm.xlu1 %5375, %v2178_v16   ;;  %v2128_v16 = vld [vmem:[%s7960_s1 + $0x158] sm:$0xff] }
 0x51f   : > { %2317 = vperm.xlu0 %5376, %v2130_v51   ;;  %v2160_v51 = vld [vmem:[%s7960_s1 + $0x258] sm:$0xff] }
 0x522   : > { %2413 = vperm.xlu1 %5375, %v2162_v48   ;;  %v2143_v48 = vld [vmem:[%s7960_s1 + $0x1d0] sm:$0xff] }
 0x523   : > { %2362 = vperm.xlu0 %5376, %v2145_v17   ;;  %v2175_v17 = vld [vmem:[%s7960_s1 + $0x2d0] sm:$0xff] }
 0x526   : > { %2458 = vperm.xlu1 %5375, %v2177_v35   ;;  %v2127_v35 = vld [vmem:[%s7960_s1 + $0x150] sm:$0xff] }
 0x527   : > { %2314 = vperm.xlu0 %5376, %v2129_v41   ;;  %v2159_v41 = vld [vmem:[%s7960_s1 + $0x250] sm:$0xff] }
 0x52a   : > { %2410 = vperm.xlu1 %5375, %v2161_v14   ;;  %v2142_v14 = vld [vmem:[%s7960_s1 + $0x1c8] sm:$0xff] }
 0x52b   : > { %2359 = vperm.xlu0 %5376, %v2144_v3   ;;  %v2174_v3 = vld [vmem:[%s7960_s1 + $0x2c8] sm:$0xff] }
 0x52e   : > { %2455 = vperm.xlu1 %5375, %v2176_v42   ;;  %v2126_v42 = vld [vmem:[%s7960_s1 + $0x148] sm:$0xff] }
 0x52f   : > { %2311 = vperm.xlu0 %5376, %v2128_v16  }
 0x532   : > { %2407 = vperm.xlu1 %5375, %v2160_v51   ;;  %v2158_v51 = vld [vmem:[%s7960_s1 + $0x248] sm:$0xff] }
 0x533   : > { %2356 = vperm.xlu0 %5376, %v2143_v48   ;;  %v2141_v48 = vld [vmem:[%s7960_s1 + $0x1c0] sm:$0xff] }
 0x536   : > { %2452 = vperm.xlu1 %5375, %v2175_v17   ;;  %v2173_v17 = vld [vmem:[%s7960_s1 + $0x2c0] sm:$0xff] }
 0x537   : > { %2308 = vperm.xlu0 %5376, %v2127_v35  }
 0x53a   : > { %2404 = vperm.xlu1 %5375, %v2159_v41   ;;  %v2125_v41 = vld [vmem:[%s7960_s1 + $0x140] sm:$0xff] }
 0x53b   : > { %2353 = vperm.xlu0 %5376, %v2142_v14   ;;  %v2157_v14 = vld [vmem:[%s7960_s1 + $0x240] sm:$0xff] }
 0x53d   : > { %v6782_v16 = vpop.permute.xlu0 %1500 }
 0x53e   : > { %2449 = vperm.xlu1 %5375, %v2174_v3   ;;  %v2140_v3 = vld [vmem:[%s7960_s1 + $0x1b8] sm:$0xff] }
 0x53f   : > { %2305 = vperm.xlu0 %5376, %v2126_v42  }
 0x542   : > { %2401 = vperm.xlu1 %5375, %v2158_v51   ;;  %v6793_v35 = vpop.permute.xlu0 %1495  ;;  %v2172_v51 = vld [vmem:[%s7960_s1 + $0x2b8] sm:$0xff] }
 0x543   : > { %2350 = vperm.xlu0 %5376, %v2141_v48   ;;  %v2124_v48 = vld [vmem:[%s7960_s1 + $0x138] sm:$0xff] }
 0x546   : > { %2446 = vperm.xlu1 %5375, %v2173_v17  }
 0x547   : > { %2302 = vperm.xlu0 %5376, %v2125_v41   ;;  %v2156_v41 = vld [vmem:[%s7960_s1 + $0x238] sm:$0xff] }
 0x549   : > { %v6804_v42 = vpop.permute.xlu0 %2185 }
 0x54a   : > { %8488 = vst [vmem:[#allocation102_spill] sm:$0xff] %v6804_v42  ;;  %2398 = vperm.xlu1 %5375, %v2157_v14   ;;  %v2139_v14 = vld [vmem:[%s7960_s1 + $0x1b0] sm:$0xff] }
 0x54b   : > { %2347 = vperm.xlu0 %5376, %v2140_v3  }
 0x54e   : > { %2443 = vperm.xlu1 %5375, %v2172_v51   ;;  %v6812_v17 = vpop.permute.xlu0 %2194  ;;  %v2123_v51 = vld [vmem:[%s7960_s1 + $0x130] sm:$0xff] }
 0x54f   : > { %8489 = vst [vmem:[#allocation103_spill] sm:$0xff] %v6812_v17  ;;  %2299 = vperm.xlu0 %5376, %v2124_v48   ;;  %v6828_v48 = vpop.permute.xlu1 %1809 }
 0x550   : > { %8491 = vst [vmem:[#allocation105_spill] sm:$0xff] %v6828_v48 }
 0x552   : > { %2395 = vperm.xlu1 %5375, %v2156_v41  }
 0x553   : > { %2344 = vperm.xlu0 %5376, %v2139_v14   ;;  %v6820_v3 = vpop.permute.xlu0 %2200  ;;  %v2138_v14 = vld [vmem:[%s7960_s1 + $0x1a8] sm:$0xff]  ;;  %v6841_v49 = vpop.permute.xlu1 %2182 }
 0x554   : > { %8490 = vst [vmem:[#allocation104_spill] sm:$0xff] %v6820_v3  ;;  %8492 = vst [vmem:[#allocation106_spill] sm:$0xff] %v6841_v49 }
 0x556   : > { %2440 = vperm.xlu1 %5375, %v2171_v15   ;;  %v2122_v15 = vld [vmem:[%s7960_s1 + $0x128] sm:$0xff] }
 0x557   : > { %2296 = vperm.xlu0 %5376, %v2123_v51  }
 0x558   : > { %v6833_v41 = vpop.permute.xlu0 %2206 }
 0x55a   : > { %2392 = vperm.xlu1 %5375, %v2155_v11   ;;  %v2137_v11 = vld [vmem:[%s7960_s1 + $0x1a0] sm:$0xff] }
 0x55b   : > { %2341 = vperm.xlu0 %5376, %v2138_v14   ;;  %v6854_v14 = vpop.permute.xlu1 %2188 }
 0x55c   : > { %8493 = vst [vmem:[#allocation107_spill] sm:$0xff] %v6854_v14 }
 0x55d   : > { %v6846_v51 = vpop.permute.xlu0 %2212 }
 0x55e   : > { %2437 = vperm.xlu1 %5375, %v2170_v13   ;;  %v2121_v13 = vld [vmem:[%s7960_s1 + $0x120] sm:$0xff] }
 0x55f   : > { %2293 = vperm.xlu0 %5376, %v2122_v15   ;;  %v6869_v33 = vpop.permute.xlu1 %2191 }
 0x560   : > { %8494 = vst [vmem:[#allocation108_spill] sm:$0xff] %v6869_v33 }
 0x562   : > { %v6856_v56 = vpop.permute.xlu0 %2218  ;;  %2389 = vperm.xlu1 %5375, %v2154_v55   ;;  %v2136_v55 = vld [vmem:[%s7960_s1 + $0x198] sm:$0xff] }
 0x563   : > { %2338 = vperm.xlu0 %5376, %v2137_v11  }
 0x566   : > { %v6864_v15 = vpop.permute.xlu0 %2275  ;;  %2434 = vperm.xlu1 %5375, %v2169_v0   ;;  %v2120_v0 = vld [vmem:[%s7960_s1 + $0x118] sm:$0xff] }
 0x567   : > { %2290 = vperm.xlu0 %5376, %v2121_v13   ;;  %v6882_v13 = vpop.permute.xlu1 %2197 }
 0x568   : > { %8495 = vst [vmem:[#allocation109_spill] sm:$0xff] %v6882_v13 }
 0x56a   : > { %v6874_v11 = vpop.permute.xlu0 %2272  ;;  %2386 = vperm.xlu1 %5375, %v2153_v1   ;;  %v2135_v1 = vld [vmem:[%s7960_s1 + $0x190] sm:$0xff] }
 0x56b   : > { %2335 = vperm.xlu0 %5376, %v2136_v55   ;;  %v6897_v24 = vpop.permute.xlu1 %2203 }
 0x56e   : > { %v6884_v39 = vpop.permute.xlu0 %2269  ;;  %2431 = vperm.xlu1 %5375, %v2168_v30   ;;  %v2119_v30 = vld [vmem:[%s7960_s1 + $0x110] sm:$0xff] }
 0x56f   : > { %2287 = vperm.xlu0 %5376, %v2120_v0  }
 0x572   : > { %v6892_v55 = vpop.permute.xlu0 %2263  ;;  %2383 = vperm.xlu1 %5375, %v2152_v37   ;;  %v2134_v37 = vld [vmem:[%s7960_s1 + $0x188] sm:$0xff] }
 0x573   : > { %2332 = vperm.xlu0 %5376, %v2135_v1   ;;  %v6910_v1 = vpop.permute.xlu1 %2209 }
 0x576   : > { %v6902_v0 = vpop.permute.xlu0 %2257  ;;  %2428 = vperm.xlu1 %5375, %v2167_v40   ;;  %v2118_v40 = vld [vmem:[%s7960_s1 + $0x108] sm:$0xff] }
 0x577   : > { %2284 = vperm.xlu0 %5376, %v2119_v30   ;;  %v6925_v53 = vpop.permute.xlu1 %2215 }
 0x57a   : > { %v6912_v29 = vpop.permute.xlu0 %2251  ;;  %2380 = vperm.xlu1 %5375, %v2151_v46   ;;  %v2133_v46 = vld [vmem:[%s7960_s1 + $0x180] sm:$0xff] }
 0x57b   : > { %2329 = vperm.xlu0 %5376, %v2134_v37  }
 0x57e   : > { %v6920_v30 = vpop.permute.xlu0 %2245  ;;  %2425 = vperm.xlu1 %5375, %v2166_v47   ;;  %v2117_v47 = vld [vmem:[%s7960_s1 + $0x100] sm:$0xff] }
 0x57f   : > { %8496 = vst [vmem:[#allocation110_spill] sm:$0xff] %v6920_v30  ;;  %2281 = vperm.xlu0 %5376, %v2118_v40   ;;  %v6938_v40 = vpop.permute.xlu1 %2221 }
 0x582   : > { %v6930_v37 = vpop.permute.xlu0 %2239  ;;  %2377 = vperm.xlu1 %5375, %v2150_v45  }
 0x583   : > { %8497 = vst [vmem:[#allocation111_spill] sm:$0xff] %v6930_v37  ;;  %2326 = vperm.xlu0 %5376, %v2133_v46   ;;  %v6947_v46 = vpop.permute.xlu1 %2227 }
 0x586   : > { %v6940_v54 = vpop.permute.xlu0 %2233  ;;  %2374 = vperm.xlu1 %5375, %v2149_v50  }
 0x587   : > { %8498 = vst [vmem:[#allocation112_spill] sm:$0xff] %v6940_v54  ;;  %2278 = vperm.xlu0 %5376, %v2117_v47   ;;  %v6951_v44 = vpop.permute.xlu1 %2224 }
 0x58a   : > { %v6945_v45 = vpop.permute.xlu0 %2371 }
 0x58b   : > { %2422 = vperm.xlu0 %5376, %v2165_v5   ;;  %v6957_v10 = vpop.permute.xlu1 %2266 }
 0x58e   : > { %v6949_v62 = vpop.permute.xlu0 %2368 }
 0x58f   : > { %v6961_v47 = vpop.permute.xlu1 %2260 }
 0x592   : > { %v6953_v63 = vpop.permute.xlu0 %2320 }
 0x593   : > { %v6975_v43 = vpop.permute.xlu1 %2254 }
 0x596   : > { %v6955_v57 = vpop.permute.xlu0 %2365 }
 0x59a   : > { %v6959_v50 = vpop.permute.xlu0 %2317 }
 0x59e   : > { %v6963_v60 = vpop.permute.xlu0 %2362 }
 0x5a0   : > { %v1569_v23 = vpop.f32.mrf.mxu0  ;;  %v1646_v5 = vpop.f32.mrf.mxu1 }
 0x5a1   : > { %v6966_v20 = vadd.f32 %v1569_v23, %v6793_v35  ;;  %v6969_v58 = vadd.f32 %v1646_v5, %v6793_v35 }
 0x5a2   : > { %v6971_v21 = vpop.permute.xlu0 %2314  ;;  %v1571_v22 = vpop.f32.mrf.mxu0 }
 0x5a3   : > { %v1746_v27 = vmin.f32 %v6966_v20, 0.0  ;;  %v1748_v38 = vmin.f32 %v6969_v58, 0.0  ;;  %v1648_v28 = vpop.f32.mrf.mxu1  ;;  %v6978_v26 = vadd.f32 %v1571_v22, %v6793_v35  ;;  %vm1734_vm5 = vcmp.gt.f32.partialorder %v6966_v20, 0.0 }
 0x5a4   : > { %v6981_v61 = vadd.f32 %v1648_v28, %v6793_v35 }
 0x5a5   : > { %v1575_v23 = vpop.f32.mrf.mxu0  ;;  %v1652_v34 = vpop.f32.mrf.mxu1  ;;  %v1758_v5 = vmul.f32 1.442695, %v1746_v27  ;;  %v1747_v2 = vmin.f32 %v6978_v26, 0.0  ;;  %v1762_v18 = vmul.f32 1.442695, %v1748_v38  ;;  %vm1735_vm3 = vcmp.gt.f32.partialorder %v6978_v26, 0.0 }
 0x5a6   : > { %v1576_v8 = vadd.f32 %v1575_v23, %v6782_v16  ;;  %v6986_v36 = vadd.f32 %v1652_v34, %v6782_v16  ;;  %v6988_v52 = vpop.permute.xlu0 %2359  ;;  %v1749_v31 = vmin.f32 %v6981_v61, 0.0  ;;  %v6996_v34 = vpop.permute.xlu1 %2248 }
 0x5a7   : > { %v1577_v22 = vpop.f32.mrf.mxu0  ;;  %v1654_v25 = vpop.f32.mrf.mxu1  ;;  %v1760_v19 = vmul.f32 1.442695, %v1747_v2  ;;  %5377 = vpow2.f32 %v1758_v5 }
 0x5a8   : > { %v1752_v28 = vmin.f32 %v1576_v8, 0.0  ;;  %v1754_v9 = vmin.f32 %v6986_v36, 0.0  ;;  %v1578_v27 = vadd.f32 %v1577_v22, %v6782_v16  ;;  %v1655_v32 = vadd.f32 %v1654_v25, %v6782_v16 }
 0x5a9   : > { %5379 = vpow2.f32 %v1762_v18  ;;  %v1764_v59 = vmul.f32 1.442695, %v1749_v31  ;;  %vm1740_vm13 = vcmp.gt.f32.partialorder %v1576_v8, 0.0  ;;  %vm1742_vm2 = vcmp.gt.f32.partialorder %v6986_v36, 0.0 }
 0x5aa   : > { %v6994_v23 = vpop.permute.xlu0 %2311  ;;  %v1770_v38 = vmul.f32 1.442695, %v1752_v28  ;;  %v1774_v6 = vmul.f32 1.442695, %v1754_v9  ;;  %5381 = vpow2.f32 %v1760_v19  ;;  %v1753_v7 = vmin.f32 %v1578_v27, 0.0  ;;  %v7000_v25 = vpop.permute.xlu1 %2242 }
 0x5ab   : > { %v1755_v48 = vmin.f32 %v1655_v32, 0.0  ;;  %8499 = vst [vmem:[#allocation113_spill] sm:$0xff] %v7000_v25  ;;  %vm1741_vm15 = vcmp.gt.f32.partialorder %v1578_v27, 0.0  ;;  %vm1743_vm0 = vcmp.gt.f32.partialorder %v1655_v32, 0.0 }
 0x5ac   : > { %5383 = vpow2.f32 %v1770_v38  ;;  %v1772_v2 = vmul.f32 1.442695, %v1753_v7  ;;  %v8501_v38 = vlaneseq }
 0x5ad   : > { %5385 = vpow2.f32 %v1774_v6  ;;  %v1776_v49 = vmul.f32 1.442695, %v1755_v48 }
 0x5ae   : > { %v6998_v42 = vpop.permute.xlu0 %2356  ;;  %5387 = vpow2.f32 %v1764_v59  ;;  %v7006_v9 = vpop.permute.xlu1 %2236  ;;  %v7011_v59 = vand.u32 127, %v8501_v38 }
 0x5af   : > { %5389 = vpow2.f32 %v1772_v2  ;;  %8500 = vst [vmem:[#allocation114_spill] sm:$0xff] %v7006_v9 }
 0x5b0   : > { %5391 = vpow2.f32 %v1776_v49  ;;  %vm2532_vm11 = vcmp.eq.s32.totalorder %v7011_v59, %v6945_v45 }
 0x5b2   : > { %v7002_v5 = vpop.permute.xlu0 %2308  ;;  %v7013_v54 = vpop.permute.xlu1 %2230 }
 0x5b3   : > { %8502 = vst [vmem:[#allocation115_spill] sm:$0xff] %v7013_v54 }
 0x5b4   : > { %v5378_v31 = vpop.eup %5377 }
 0x5b5   : > { %v4757_v38 = vadd.f32 -1.0, %v5378_v31 }
 0x5b6   : > { %v7004_v18 = vpop.permute.xlu0 %2353  ;;  %v5380_v19 = vpop.eup %5379 }
 0x5b7   : > { %v5382_v22 = vpop.eup %5381  ;;  %v4759_v54 = vadd.f32 -1.0, %v5380_v19 }
 0x5b8   : > { %v4758_v17 = vadd.f32 -1.0, %v5382_v22 }
 0x5b9   : > { %v5384_v28 = vpop.eup %5383 }
 0x5ba   : > { %v7008_v6 = vpop.permute.xlu0 %2305  ;;  %v5386_v7 = vpop.eup %5385  ;;  %v4763_v49 = vadd.f32 -1.0, %v5384_v28 }
 0x5bb   : > { %v5388_v48 = vpop.eup %5387  ;;  %v4765_v9 = vadd.f32 -1.0, %v5386_v7 }
 0x5bc   : > { %v5390_v2 = vpop.eup %5389  ;;  %v4760_v13 = vadd.f32 -1.0, %v5388_v48  ;;  %v1800_v28 = vsel %vm1740_vm13, %v1576_v8, %v4763_v49  ;;  %v2324_v8 = vpop.permute.xlu1 %2323  ;;  %vm1736_vm13 = vcmp.gt.f32.partialorder %v6969_v58, 0.0 }
 0x5bd   : > { %v5392_v14 = vpop.eup %5391  ;;  %v4764_v37 = vadd.f32 -1.0, %v5390_v2  ;;  %v1802_v22 = vsel %vm1742_vm2, %v6986_v36, %v4765_v9  ;;  %vm2531_vm2 = vcmp.eq.s32.totalorder %v7011_v59, %v6949_v62 }
 0x5be   : > { %v7017_v33 = vpop.permute.xlu0 %2350  ;;  %v4766_v25 = vadd.f32 -1.0, %v5392_v14 }
 0x5bf   : > { %v1801_v30 = vsel %vm1741_vm15, %v1578_v27, %v4764_v37  ;;  %v1795_v37 = vsel %vm1735_vm3, %v6978_v26, %v4758_v17  ;;  %vm1737_vm15 = vcmp.gt.f32.partialorder %v6981_v61, 0.0  ;;  %v1796_v26 = vsel %vm1736_vm13, %v6969_v58, %v4759_v54 }
 0x5c0   : > { %4769 = vmatprep.subr.msk.mxu0 %vm1815_vm6, %v1801_v30  ;;  %v1803_v3 = vsel %vm1743_vm0, %v1655_v32, %v4766_v25  ;;  %v1797_v36 = vsel %vm1737_vm15, %v6981_v61, %v4760_v13  ;;  %vm2516_vm0 = vcmp.eq.s32.totalorder %v7011_v59, %v2324_v8  ;;  %vm2515_vm3 = vcmp.eq.s32.totalorder %v7011_v59, %v6953_v63 }
 0x5c1   : > { %4772 = vmatprep.subr.msk.mxu1 %vm1815_vm6, %v1803_v3  ;;  %4770 = vmatpush1.msk.msra.mxu0 %vm1815_vm6, %v1800_v28  ;;  %v1794_v3 = vsel %vm1734_vm5, %v6966_v20, %v4757_v38  ;;  %v8503_v61 = vmov 1.0   ;;  %vm2530_vm5 = vcmp.eq.s32.totalorder %v7011_v59, %v6955_v57  ;;  %vm2529_vm15 = vcmp.eq.s32.totalorder %v7011_v59, %v6963_v60 }
 0x5c2   : > { %v1723_v14 = vpop.f32.mrf.mxu0  ;;  %4773 = vmatpush1.msk.msra.mxu1 %vm1815_vm6, %v1802_v22  ;;  %1864 = vmatprep.subr.mxu0 %v1795_v37  ;;  %v7035_v30 = vpop.permute.xlu0 %2302  ;;  %vm2513_vm13 = vcmp.eq.s32.totalorder %v7011_v59, %v6971_v21  ;;  %v8516_v22 = vld [vmem:[#allocation115_spill] sm:$0xff] }
 0x5c3   : > { %v7031_v32 = vadd.f32 %v1723_v14, %v6793_v35  ;;  %1935 = vmatprep.subr.mxu1 %v1797_v36  ;;  %1865 = vmatpush1.msra.mxu0 %v1794_v3  ;;  %v8517_v14 = vld [vmem:[#allocation106_spill] sm:$0xff]  ;;  %v2468_v37 = vpop.permute.xlu1 %2467 }
 0x5c4   : > { %v1725_v17 = vpop.f32.mrf.mxu0  ;;  %1936 = vmatpush1.msra.mxu1 %v1796_v26  ;;  %4771 = vmatmul.mubr.msk.f32.vlgmr.msra.gmra.mxu0 %vm8069_vm14, %v6290_v12 }
 0x5c5   : > { %v7042_v27 = vadd.f32 %v1725_v17, %v6793_v35  ;;  %4774 = vmatmul.mubr.msk.f32.vlgmr.msra.gmra.mxu1 %vm8069_vm14, %v6290_v12  ;;  %5187 = vmatprep.subr.msk.mxu0 %vm2532_vm11, %v8503_v61  ;;  %v1750_v58 = vmin.f32 %v7031_v32, 0.0  ;;  %vm2514_vm11 = vcmp.eq.s32.totalorder %v7011_v59, %v6959_v50 }
 0x5c6   : > { %v1729_v20 = vpop.f32.mrf.mxu0  ;;  %v2348_v13 = vpop.permute.xlu0 %2347  ;;  %2040 = vmatprep.mubr.f32.mxu1 %v8437_v4  ;;  %5188 = vmatpush3.msk.msra.mxu0 %vm2516_vm0, %v8503_v61  ;;  %vm2528_vm0 = vcmp.eq.s32.totalorder %v7011_v59, %v6988_v52 }
 0x5c7   : > { %v1751_v54 = vmin.f32 %v7042_v27, 0.0  ;;  %v7059_v35 = vadd.f32 %v1729_v20, %v6782_v16  ;;  %5189 = vmatprep.subr.msk.mxu0 %vm2531_vm2, %v8503_v61  ;;  %v1766_v62 = vmul.f32 1.442695, %v1750_v58  ;;  %vm2512_vm2 = vcmp.eq.s32.totalorder %v7011_v59, %v6994_v23 }
 0x5c8   : > { %v1731_v12 = vpop.f32.mrf.mxu0  ;;  %5190 = vmatpush3.msk.msra.mxu0 %vm2515_vm3, %v8503_v61  ;;  %vm2527_vm3 = vcmp.eq.s32.totalorder %v7011_v59, %v6998_v42  ;;  %vm2524_vm14 = vcmp.eq.s32.totalorder %v7011_v59, %v2348_v13 }
 0x5c9   : > { %v1756_v45 = vmin.f32 %v7059_v35, 0.0  ;;  %v1768_v4 = vmul.f32 1.442695, %v1751_v54  ;;  %v1732_v50 = vadd.f32 %v1731_v12, %v6782_v16  ;;  %5191 = vmatprep.subr.msk.mxu0 %vm2530_vm5, %v8503_v61  ;;  %vm2511_vm5 = vcmp.eq.s32.totalorder %v7011_v59, %v7002_v5 }
 0x5ca   : > { %v2300_v25 = vpop.permute.xlu0 %2299  ;;  %5192 = vmatpush3.msk.msra.mxu0 %vm2514_vm11, %v8503_v61  ;;  %vm2526_vm11 = vcmp.eq.s32.totalorder %v7011_v59, %v7004_v18 }
 0x5cb   : > { %v1778_v60 = vmul.f32 1.442695, %v1756_v45  ;;  %v1757_v21 = vmin.f32 %v1732_v50, 0.0  ;;  %5193 = vmatprep.subr.msk.mxu0 %vm2529_vm15, %v8503_v61  ;;  %vm2510_vm15 = vcmp.eq.s32.totalorder %v7011_v59, %v7008_v6 }
 0x5cc   : > { %5194 = vmatpush3.msk.msra.mxu0 %vm2513_vm13, %v8503_v61  ;;  %vm2525_vm13 = vcmp.eq.s32.totalorder %v7011_v59, %v7017_v33 }
 0x5cd   : > { %5393 = vpow2.f32 %v1778_v60  ;;  %v1780_v52 = vmul.f32 1.442695, %v1757_v21  ;;  %5195 = vmatprep.subr.msk.mxu0 %vm2528_vm0, %v8503_v61  ;;  %vm2509_vm0 = vcmp.eq.s32.totalorder %v7011_v59, %v7035_v30 }
 0x5ce   : > { %5395 = vpow2.f32 %v1768_v4  ;;  %v2345_v57 = vpop.permute.xlu0 %2344  ;;  %5196 = vmatpush3.msk.msra.mxu0 %vm2512_vm2, %v8503_v61  ;;  %vm2508_vm2 = vcmp.eq.s32.totalorder %v7011_v59, %v2300_v25 }
 0x5cf   : > { %5397 = vpow2.f32 %v1766_v62  ;;  %5197 = vmatprep.subr.msk.mxu0 %vm2527_vm3, %v8503_v61  ;;  %vm2523_vm3 = vcmp.eq.s32.totalorder %v7011_v59, %v2345_v57 }
 0x5d0   : > { %5399 = vpow2.f32 %v1780_v52  ;;  %5198 = vmatpush3.msk.msra.mxu0 %vm2511_vm5, %v8503_v61 }
 0x5d1   : > { %5199 = vmatprep.subr.msk.mxu0 %vm2526_vm11, %v8503_v61 }
 0x5d2   : > { %v2297_v63 = vpop.permute.xlu0 %2296  ;;  %5200 = vmatpush3.msk.msra.mxu0 %vm2510_vm15, %v8503_v61 }
 0x5d3   : > { %5201 = vmatprep.subr.msk.mxu0 %vm2525_vm13, %v8503_v61  ;;  %vm2507_vm5 = vcmp.eq.s32.totalorder %v7011_v59, %v2297_v63  ;;  %vm1744_vm13 = vcmp.gt.f32.partialorder %v7059_v35, 0.0  ;;  %v8518_v63 = vld [vmem:[#allocation105_spill] sm:$0xff] }
 0x5d4   : > { %5202 = vmatpush3.msk.msra.mxu0 %vm2509_vm0, %v8503_v61 }
 0x5d5   : > { %5203 = vmatprep.subr.msk.mxu0 %vm2524_vm14, %v8503_v61  ;;  %vm1745_vm14 = vcmp.gt.f32.partialorder %v1732_v50, 0.0 }
 0x5d6   : > { %v2342_v33 = vpop.permute.xlu0 %2341  ;;  %5204 = vmatpush3.msk.msra.mxu0 %vm2508_vm2, %v8503_v61  ;;  %vm1739_vm2 = vcmp.gt.f32.partialorder %v7042_v27, 0.0 }
 0x5d7   : > { %vm2522_vm11 = vcmp.eq.s32.totalorder %v7011_v59, %v2342_v33  ;;  %5205 = vmatprep.subr.msk.mxu0 %vm2523_vm3, %v8503_v61  ;;  %vm2500_vm3 = vcmp.eq.s32.totalorder %v7011_v59, %v6864_v15  ;;  %v5413_v15 = vld [vmem:[%s7963_s4 + $0x40] sm:$0xff] }
 0x5d8   : > { %5206 = vmatpush3.msk.msra.mxu0 %vm2507_vm5, %v8503_v61  ;;  %vm1738_vm5 = vcmp.gt.f32.partialorder %v7031_v32, 0.0 }
 0x5d9   : > { %5207 = vmatprep.subr.msk.mxu0 %vm2522_vm11, %v8503_v61  ;;  %vm2484_vm11 = vcmp.eq.s32.totalorder %v7011_v59, %v6947_v46  ;;  %v8514_v46 = vld [vmem:[#allocation112_spill] sm:$0xff] }
 0x5da   : > { %v5394_v16 = vpop.eup %5393  ;;  %v2294_v23 = vpop.permute.xlu0 %2293 }
 0x5db   : > { %v5396_v42 = vpop.eup %5395  ;;  %vm2506_vm15 = vcmp.eq.s32.totalorder %v7011_v59, %v2294_v23  ;;  %v4767_v31 = vadd.f32 -1.0, %v5394_v16 }
 0x5dc   : > { %v5398_v5 = vpop.eup %5397  ;;  %5208 = vmatpush3.msk.msra.mxu0 %vm2506_vm15, %v8503_v61  ;;  %v4762_v19 = vadd.f32 -1.0, %v5396_v42  ;;  %vm2499_vm15 = vcmp.eq.s32.totalorder %v7011_v59, %v6874_v11  ;;  %v8510_v11 = vld [vmem:[#allocation111_spill] sm:$0xff] }
 0x5dd   : > { %v5400_v18 = vpop.eup %5399  ;;  %v4761_v7 = vadd.f32 -1.0, %v5398_v5  ;;  %v1804_v2 = vsel %vm1744_vm13, %v7059_v35, %v4767_v31  ;;  %vm2483_vm13 = vcmp.eq.s32.totalorder %v7011_v59, %v6951_v44 }
 0x5de   : > { %v4768_v9 = vadd.f32 -1.0, %v5400_v18  ;;  %v2339_v6 = vpop.permute.xlu0 %2338  ;;  %v1799_v49 = vsel %vm1739_vm2, %v7042_v27, %v4762_v19  ;;  %vm2482_vm2 = vcmp.eq.s32.totalorder %v7011_v59, %v6938_v40  ;;  %v8513_v40 = vld [vmem:[#allocation107_spill] sm:$0xff] }
 0x5df   : > { %vm2521_vm0 = vcmp.eq.s32.totalorder %v7011_v59, %v2339_v6  ;;  %v1798_v38 = vsel %vm1738_vm5, %v7031_v32, %v4761_v7  ;;  %vm2497_vm5 = vcmp.eq.s32.totalorder %v7011_v59, %v6957_v10  ;;  %v7254_v32 = vpop.permute.xlu1 %2419 }
 0x5e0   : > { %v1805_v48 = vsel %vm1745_vm14, %v1732_v50, %v4768_v9  ;;  %5209 = vmatprep.subr.msk.mxu0 %vm2521_vm0, %v8503_v61  ;;  %vm2498_vm0 = vcmp.eq.s32.totalorder %v7011_v59, %v6884_v39 }
 0x5e1   : > { %4775 = vmatprep.subr.msk.mxu1 %vm1815_vm6, %v1805_v48 }
 0x5e2   : > { %4776 = vmatpush1.msk.msra.mxu1 %vm1815_vm6, %v1804_v2  ;;  %v2291_v28 = vpop.permute.xlu0 %2290  ;;  %vm8504_vm6 = vcmask 121856  }
 0x5e3   : > { %2006 = vmatprep.subr.mxu1 %v1799_v49  ;;  %vm2505_vm14 = vcmp.eq.s32.totalorder %v7011_v59, %v2291_v28  ;;  %v7256_v36 = vpop.permute.xlu1 %2464 }
 0x5e4   : > { %2007 = vmatpush1.msra.mxu1 %v1798_v38  ;;  %5210 = vmatpush3.msk.msra.mxu0 %vm2505_vm14, %v8503_v61  ;;  %vm2495_vm14 = vcmp.eq.s32.totalorder %v7011_v59, %v6961_v47  ;;  %v8515_v47 = vld [vmem:[#allocation102_spill] sm:$0xff] }
 0x5e5   : > { %4777 = vmatmul.mubr.msk.f32.vlgmr.msra.gmra.mxu1 %vm8504_vm6, %v5413_v15  ;;  %5152 = vmatprep.subr.msk.mxu1 %vm2500_vm3, %v8503_v61  ;;  %vm2481_vm6 = vcmp.eq.s32.totalorder %v7011_v59, %v6856_v56  ;;  %v8505_v56 = vld [vmem:[#allocation104_spill] sm:$0xff] }
 0x5e6   : > { %5153 = vmatpush3.msk.msra.mxu1 %vm2484_vm11, %v8503_v61  ;;  %v2336_v44 = vpop.permute.xlu0 %2335  ;;  %vm2496_vm11 = vcmp.eq.s32.totalorder %v7011_v59, %v6892_v55  ;;  %v8511_v55 = vld [vmem:[#allocation108_spill] sm:$0xff] }
 0x5e7   : > { %5154 = vmatprep.subr.msk.mxu1 %vm2499_vm15, %v8503_v61  ;;  %vm2520_vm3 = vcmp.eq.s32.totalorder %v7011_v59, %v2336_v44  ;;  %vm2480_vm15 = vcmp.eq.s32.totalorder %v7011_v59, %v6925_v53  ;;  %v7258_v3 = vpop.permute.xlu1 %2416 }
 0x5e8   : > { %5155 = vmatpush3.msk.msra.mxu1 %vm2483_vm13, %v8503_v61  ;;  %5211 = vmatprep.subr.msk.mxu0 %vm2520_vm3, %v8503_v61  ;;  %vm2493_vm3 = vcmp.eq.s32.totalorder %v7011_v59, %v6975_v43 }
 0x5e9   : > { %5156 = vmatprep.subr.msk.mxu1 %vm2498_vm0, %v8503_v61  ;;  %vm2479_vm0 = vcmp.eq.s32.totalorder %v7011_v59, %v6846_v51  ;;  %v8509_v51 = vld [vmem:[#allocation103_spill] sm:$0xff] }
 0x5ea   : > { %5157 = vmatpush3.msk.msra.mxu1 %vm2482_vm2, %v8503_v61  ;;  %v2288_v39 = vpop.permute.xlu0 %2287  ;;  %vm2494_vm2 = vcmp.eq.s32.totalorder %v7011_v59, %v6902_v0 }
 0x5eb   : > { %5158 = vmatprep.subr.msk.mxu1 %vm2497_vm5, %v8503_v61  ;;  %vm2504_vm13 = vcmp.eq.s32.totalorder %v7011_v59, %v2288_v39  ;;  %vm2478_vm5 = vcmp.eq.s32.totalorder %v7011_v59, %v6910_v1  ;;  %v8512_v1 = vld [vmem:[#allocation114_spill] sm:$0xff]  ;;  %v7260_v30 = vpop.permute.xlu1 %2461 }
 0x5ec   : > { %5159 = vmatpush3.msk.msra.mxu1 %vm2481_vm6, %v8503_v61  ;;  %5212 = vmatpush3.msk.msra.mxu0 %vm2504_vm13, %v8503_v61  ;;  %vm2491_vm13 = vcmp.eq.s32.totalorder %v7011_v59, %v6996_v34 }
 0x5ed   : > { %5160 = vmatprep.subr.msk.mxu1 %vm2496_vm11, %v8503_v61  ;;  %vm2477_vm11 = vcmp.eq.s32.totalorder %v7011_v59, %v6833_v41  ;;  %v8508_v41 = vld [vmem:[#allocation113_spill] sm:$0xff] }
 0x5ee   : > { %5161 = vmatpush3.msk.msra.mxu1 %vm2480_vm15, %v8503_v61  ;;  %v2333_v53 = vpop.permute.xlu0 %2332  ;;  %vm2492_vm15 = vcmp.eq.s32.totalorder %v7011_v59, %v6912_v29  ;;  %v8506_v29 = vld [vmem:[#allocation110_spill] sm:$0xff] }
 0x5ef   : > { %5162 = vmatprep.subr.msk.mxu1 %vm2495_vm14, %v8503_v61  ;;  %vm2519_vm6 = vcmp.eq.s32.totalorder %v7011_v59, %v2333_v53  ;;  %vm2476_vm14 = vcmp.eq.s32.totalorder %v7011_v59, %v6897_v24  ;;  %v8507_v24 = vld [vmem:[#allocation109_spill] sm:$0xff]  ;;  %v7262_v26 = vpop.permute.xlu1 %2413 }
 0x5f0   : > { %5163 = vmatpush3.msk.msra.mxu1 %vm2479_vm0, %v8503_v61  ;;  %5213 = vmatprep.subr.msk.mxu0 %vm2519_vm6, %v8503_v61  ;;  %vm2489_vm6 = vcmp.eq.s32.totalorder %v7011_v59, %v8508_v41 }
 0x5f1   : > { %5164 = vmatprep.subr.msk.mxu1 %vm2494_vm2, %v8503_v61  ;;  %vm2475_vm2 = vcmp.eq.s32.totalorder %v7011_v59, %v8505_v56 }
 0x5f2   : > { %5165 = vmatpush3.msk.msra.mxu1 %vm2478_vm5, %v8503_v61  ;;  %v2285_v43 = vpop.permute.xlu0 %2284  ;;  %vm2490_vm5 = vcmp.eq.s32.totalorder %v7011_v59, %v8506_v29 }
 0x5f3   : > { %5166 = vmatprep.subr.msk.mxu1 %vm2493_vm3, %v8503_v61  ;;  %vm2503_vm0 = vcmp.eq.s32.totalorder %v7011_v59, %v2285_v43  ;;  %vm2474_vm3 = vcmp.eq.s32.totalorder %v7011_v59, %v8507_v24  ;;  %v7264_v17 = vpop.permute.xlu1 %2458 }
 0x5f4   : > { %5167 = vmatpush3.msk.msra.mxu1 %vm2477_vm11, %v8503_v61  ;;  %5214 = vmatpush3.msk.msra.mxu0 %vm2503_vm0, %v8503_v61  ;;  %vm2487_vm0 = vcmp.eq.s32.totalorder %v7011_v59, %v8512_v1 }
 0x5f5   : > { %5168 = vmatprep.subr.msk.mxu1 %vm2492_vm15, %v8503_v61  ;;  %vm2473_vm15 = vcmp.eq.s32.totalorder %v7011_v59, %v8509_v51 }
 0x5f6   : > { %5169 = vmatpush3.msk.msra.mxu1 %vm2476_vm14, %v8503_v61  ;;  %v2330_v10 = vpop.permute.xlu0 %2329  ;;  %vm2488_vm14 = vcmp.eq.s32.totalorder %v7011_v59, %v8510_v11 }
 0x5f7   : > { %5170 = vmatprep.subr.msk.mxu1 %vm2491_vm13, %v8503_v61  ;;  %vm2518_vm11 = vcmp.eq.s32.totalorder %v7011_v59, %v2330_v10  ;;  %vm2472_vm13 = vcmp.eq.s32.totalorder %v7011_v59, %v8511_v55  ;;  %v7266_v27 = vpop.permute.xlu1 %2410 }
 0x5f8   : > { %5171 = vmatpush3.msk.msra.mxu1 %vm2475_vm2, %v8503_v61  ;;  %5215 = vmatprep.subr.msk.mxu0 %vm2518_vm11, %v8503_v61 }
 0x5f9   : > { %5172 = vmatprep.subr.msk.mxu1 %vm2490_vm5, %v8503_v61  ;;  %vm2471_vm5 = vcmp.eq.s32.totalorder %v7011_v59, %v8513_v40 }
 0x5fa   : > { %5173 = vmatpush3.msk.msra.mxu1 %vm2474_vm3, %v8503_v61  ;;  %v2282_v0 = vpop.permute.xlu0 %2281  ;;  %vm2486_vm3 = vcmp.eq.s32.totalorder %v7011_v59, %v8514_v46 }
 0x5fb   : > { %5174 = vmatprep.subr.msk.mxu1 %vm2489_vm6, %v8503_v61  ;;  %vm2502_vm2 = vcmp.eq.s32.totalorder %v7011_v59, %v2282_v0  ;;  %vm2470_vm6 = vcmp.eq.s32.totalorder %v7011_v59, %v8515_v47  ;;  %v7268_v20 = vpop.permute.xlu1 %2455 }
 0x5fc   : > { %5175 = vmatpush3.msk.msra.mxu1 %vm2473_vm15, %v8503_v61  ;;  %5216 = vmatpush3.msk.msra.mxu0 %vm2502_vm2, %v8503_v61  ;;  %vm2485_vm15 = vcmp.eq.s32.totalorder %v7011_v59, %v8516_v22 }
 0x5fd   : > { %5176 = vmatprep.subr.msk.mxu1 %vm2488_vm14, %v8503_v61  ;;  %vm2469_vm14 = vcmp.eq.s32.totalorder %v7011_v59, %v8517_v14 }
 0x5fe   : > { %5177 = vmatpush3.msk.msra.mxu1 %vm2472_vm13, %v8503_v61  ;;  %v2327_v34 = vpop.permute.xlu0 %2326  ;;  %vm2564_vm13 = vcmp.eq.s32.totalorder %v7011_v59, %v2468_v37 }
 0x5ff   : > { %5178 = vmatprep.subr.msk.mxu1 %vm2487_vm0, %v8503_v61  ;;  %vm2517_vm11 = vcmp.eq.s32.totalorder %v7011_v59, %v2327_v34  ;;  %v7270_v58 = vpop.permute.xlu1 %2407 }
 0x600   : > { %5179 = vmatpush3.msk.msra.mxu1 %vm2471_vm5, %v8503_v61  ;;  %5217 = vmatprep.subr.msk.mxu0 %vm2517_vm11, %v8503_v61  ;;  %vm2548_vm11 = vcmp.eq.s32.totalorder %v7011_v59, %v7254_v32 }
 0x601   : > { %5180 = vmatprep.subr.msk.mxu1 %vm2486_vm3, %v8503_v61 }
 0x602   : > { %5181 = vmatpush3.msk.msra.mxu1 %vm2470_vm6, %v8503_v61  ;;  %v2279_v8 = vpop.permute.xlu0 %2278 }
 0x603   : > { %5182 = vmatprep.subr.msk.mxu1 %vm2485_vm15, %v8503_v61  ;;  %vm2501_vm0 = vcmp.eq.s32.totalorder %v7011_v59, %v2279_v8  ;;  %v7272_v54 = vpop.permute.xlu1 %2452  ;;  %vm2563_vm15 = vcmp.eq.s32.totalorder %v7011_v59, %v7256_v36 }
 0x604   : > { %5183 = vmatpush3.msk.msra.mxu1 %vm2469_vm14, %v8503_v61  ;;  %5218 = vmatpush3.msk.msra.mxu0 %vm2501_vm0, %v8503_v61  ;;  %vm2547_vm14 = vcmp.eq.s32.totalorder %v7011_v59, %v7258_v3  ;;  %vm2546_vm0 = vcmp.eq.s32.totalorder %v7011_v59, %v7262_v26 }
 0x605   : > { %5222 = vmatprep.subr.msk.mxu1 %vm2564_vm13, %v8503_v61  ;;  %vm2562_vm13 = vcmp.eq.s32.totalorder %v7011_v59, %v7260_v30 }
 0x607   : > { %v7274_v35 = vpop.permute.xlu1 %2404 }
 0x60b   : > { %v7276_v13 = vpop.permute.xlu1 %2449 }
 0x60f   : > { %v7278_v12 = vpop.permute.xlu1 %2401 }
 0x613   : > { %v7280_v45 = vpop.permute.xlu1 %2446 }
 0x617   : > { %v7282_v4 = vpop.permute.xlu1 %2398 }
 0x61b   : > { %v7284_v50 = vpop.permute.xlu1 %2443 }
 0x61f   : > { %v7286_v62 = vpop.permute.xlu1 %2395 }
 0x623   : > { %v7288_v60 = vpop.permute.xlu1 %2440 }
 0x627   : > { %v7290_v25 = vpop.permute.xlu1 %2392 }
 0x62b   : > { %v7292_v21 = vpop.permute.xlu1 %2437 }
 0x62f   : > { %v7294_v52 = vpop.permute.xlu1 %2389 }
 0x633   : > { %v7300_v48 = vpop.permute.xlu1 %2434 }
 0x637   : > { %v7302_v15 = vpop.permute.xlu1 %2386 }
 0x63b   : > { %v7304_v44 = vpop.permute.xlu1 %2431 }
 0x63f   : > { %v7306_v41 = vpop.permute.xlu1 %2383 }
 0x643   : > { %v7318_v40 = vpop.permute.xlu1 %2428 }
 0x647   : > { %v2381_v37 = vpop.permute.xlu1 %2380 }
 0x64b   : > { %v2426_v3 = vpop.permute.xlu1 %2425 }
 0x64f   : > { %v2378_v30 = vpop.permute.xlu1 %2377 }
 0x684   : > { %v1900_v57 = vpop.f32.mrf.mxu0 }
 0x685   : > { %v1901_v33 = vadd.f32 %v1900_v57, %v8518_v63  ;;  %v1971_v16 = vpop.f32.mrf.mxu1  ;;  %v2757_v57 = vld [vmem:[#allocation2] sm:$0xff] }
 0x686   : > { %v1972_v42 = vadd.f32 %v1971_v16, %v8518_v63  ;;  %v1902_v23 = vpop.f32.mrf.mxu0 }
 0x687   : > { %v2053_v5 = vmin.f32 %v1901_v33, 0.0  ;;  %v1903_v18 = vadd.f32 %v1902_v23, %v8518_v63  ;;  %v1973_v31 = vpop.f32.mrf.mxu1  ;;  %vm2047_vm5 = vcmp.gt.f32.partialorder %v1901_v33, 0.0 }
 0x688   : > { %v2055_v9 = vmin.f32 %v1972_v42, 0.0  ;;  %v1974_v19 = vadd.f32 %v1973_v31, %v8518_v63  ;;  %vm2049_vm6 = vcmp.gt.f32.partialorder %v1972_v42, 0.0 }
 0x689   : > { %v2059_v6 = vmul.f32 1.442695, %v2053_v5  ;;  %v2054_v7 = vmin.f32 %v1903_v18, 0.0  ;;  %vm2048_vm2 = vcmp.gt.f32.partialorder %v1903_v18, 0.0 }
 0x68a   : > { %v2063_v2 = vmul.f32 1.442695, %v2055_v9  ;;  %v2056_v49 = vmin.f32 %v1974_v19, 0.0  ;;  %vm2050_vm3 = vcmp.gt.f32.partialorder %v1974_v19, 0.0 }
 0x68b   : > { %5401 = vpow2.f32 %v2059_v6  ;;  %v2061_v38 = vmul.f32 1.442695, %v2054_v7 }
 0x68c   : > { %5403 = vpow2.f32 %v2063_v2  ;;  %v2065_v28 = vmul.f32 1.442695, %v2056_v49 }
 0x68d   : > { %5405 = vpow2.f32 %v2061_v38 }
 0x68e   : > { %5407 = vpow2.f32 %v2065_v28 }
 0x698   : > { %v5402_v39 = vpop.eup %5401 }
 0x699   : > { %v5404_v53 = vpop.eup %5403  ;;  %v4778_v56 = vadd.f32 -1.0, %v5402_v39 }
 0x69a   : > { %v5406_v43 = vpop.eup %5405  ;;  %v4780_v10 = vadd.f32 -1.0, %v5404_v53 }
 0x69b   : > { %v5408_v29 = vpop.eup %5407  ;;  %v4779_v24 = vadd.f32 -1.0, %v5406_v43  ;;  %v2077_v0 = vsel %vm2047_vm5, %v1901_v33, %v4778_v56  ;;  %vm2545_vm5 = vcmp.eq.s32.totalorder %v7011_v59, %v7266_v27 }
 0x69c   : > { %v4781_v51 = vadd.f32 -1.0, %v5408_v29  ;;  %v2079_v1 = vsel %vm2049_vm6, %v1972_v42, %v4780_v10  ;;  %vm2544_vm6 = vcmp.eq.s32.totalorder %v7011_v59, %v7270_v58 }
 0x69d   : > { %v2078_v11 = vsel %vm2048_vm2, %v1903_v18, %v4779_v24  ;;  %vm2561_vm2 = vcmp.eq.s32.totalorder %v7011_v59, %v7264_v17  ;;  %v2423_v17 = vpop.permute.xlu0 %2422 }
 0x69e   : > { %2822 = vmatprep.mubr.f32.mxu1 %v2078_v11  ;;  %v2080_v55 = vsel %vm2050_vm3, %v1974_v19, %v4781_v51  ;;  %vm2560_vm3 = vcmp.eq.s32.totalorder %v7011_v59, %v7268_v20  ;;  %v2375_v20 = vpop.permute.xlu1 %2374 }
 0x69f   : > { %2892 = vmatprep.mubr.f32.mxu0 %v2080_v55  ;;  %2823 = vmatmul.mubr.f32.vlgmr.msra.gmra.mxu1 %v2077_v0 }
 0x6a0   : > { %2893 = vmatmul.mubr.f32.vlgmr.msra.gmra.mxu0 %v2079_v1  ;;  %5223 = vmatpush3.msk.msra.mxu1 %vm2548_vm11, %v8503_v61  ;;  %vm2559_vm11 = vcmp.eq.s32.totalorder %v7011_v59, %v7272_v54 }
 0x6a1   : > { %5224 = vmatprep.subr.msk.mxu1 %vm2563_vm15, %v8503_v61  ;;  %vm2543_vm15 = vcmp.eq.s32.totalorder %v7011_v59, %v7274_v35 }
 0x6a2   : > { %5225 = vmatpush3.msk.msra.mxu1 %vm2547_vm14, %v8503_v61  ;;  %vm2558_vm14 = vcmp.eq.s32.totalorder %v7011_v59, %v7276_v13 }
 0x6a3   : > { %5226 = vmatprep.subr.msk.mxu1 %vm2562_vm13, %v8503_v61  ;;  %vm2542_vm13 = vcmp.eq.s32.totalorder %v7011_v59, %v7278_v12 }
 0x6a4   : > { %5227 = vmatpush3.msk.msra.mxu1 %vm2546_vm0, %v8503_v61  ;;  %vm2557_vm0 = vcmp.eq.s32.totalorder %v7011_v59, %v7280_v45 }
 0x6a5   : > { %v2042_v46 = vpop.f32.mrf.mxu1  ;;  %5228 = vmatprep.subr.msk.mxu1 %vm2561_vm2, %v8503_v61  ;;  %vm2541_vm2 = vcmp.eq.s32.totalorder %v7011_v59, %v7282_v4 }
 0x6a6   : > { %v7330_v47 = vadd.f32 %v2042_v46, %v8518_v63  ;;  %5229 = vmatpush3.msk.msra.mxu1 %vm2545_vm5, %v8503_v61  ;;  %vm2556_vm5 = vcmp.eq.s32.totalorder %v7011_v59, %v7284_v50 }
 0x6a7   : > { %v2044_v34 = vpop.f32.mrf.mxu1  ;;  %5230 = vmatprep.subr.msk.mxu1 %vm2560_vm3, %v8503_v61  ;;  %vm2540_vm3 = vcmp.eq.s32.totalorder %v7011_v59, %v7286_v62 }
 0x6a8   : > { %v2057_v22 = vmin.f32 %v7330_v47, 0.0  ;;  %v7340_v14 = vadd.f32 %v2044_v34, %v8518_v63  ;;  %5231 = vmatpush3.msk.msra.mxu1 %vm2544_vm6, %v8503_v61  ;;  %vm2555_vm6 = vcmp.eq.s32.totalorder %v7011_v59, %v7288_v60 }
 0x6a9   : > { %5232 = vmatprep.subr.msk.mxu1 %vm2559_vm11, %v8503_v61  ;;  %vm2539_vm11 = vcmp.eq.s32.totalorder %v7011_v59, %v7290_v25 }
 0x6aa   : > { %v2067_v8 = vmul.f32 1.442695, %v2057_v22  ;;  %v2058_v32 = vmin.f32 %v7340_v14, 0.0  ;;  %5233 = vmatpush3.msk.msra.mxu1 %vm2543_vm15, %v8503_v61  ;;  %vm2554_vm15 = vcmp.eq.s32.totalorder %v7011_v59, %v7292_v21 }
 0x6ab   : > { %5234 = vmatprep.subr.msk.mxu1 %vm2558_vm14, %v8503_v61  ;;  %vm2538_vm14 = vcmp.eq.s32.totalorder %v7011_v59, %v7294_v52 }
 0x6ac   : > { %5409 = vpow2.f32 %v2067_v8  ;;  %v2069_v36 = vmul.f32 1.442695, %v2058_v32  ;;  %5235 = vmatpush3.msk.msra.mxu1 %vm2542_vm13, %v8503_v61  ;;  %vm2553_vm13 = vcmp.eq.s32.totalorder %v7011_v59, %v7300_v48 }
 0x6ad   : > { %5236 = vmatprep.subr.msk.mxu1 %vm2557_vm0, %v8503_v61  ;;  %vm2537_vm0 = vcmp.eq.s32.totalorder %v7011_v59, %v7302_v15 }
 0x6ae   : > { %5411 = vpow2.f32 %v2069_v36  ;;  %5237 = vmatpush3.msk.msra.mxu1 %vm2541_vm2, %v8503_v61  ;;  %vm2552_vm2 = vcmp.eq.s32.totalorder %v7011_v59, %v7304_v44 }
 0x6af   : > { %5238 = vmatprep.subr.msk.mxu1 %vm2556_vm5, %v8503_v61  ;;  %vm2536_vm5 = vcmp.eq.s32.totalorder %v7011_v59, %v7306_v41 }
 0x6b0   : > { %5239 = vmatpush3.msk.msra.mxu1 %vm2540_vm3, %v8503_v61  ;;  %vm2551_vm3 = vcmp.eq.s32.totalorder %v7011_v59, %v7318_v40 }
 0x6b1   : > { %5240 = vmatprep.subr.msk.mxu1 %vm2555_vm6, %v8503_v61  ;;  %vm2535_vm6 = vcmp.eq.s32.totalorder %v7011_v59, %v2381_v37 }
 0x6b2   : > { %5241 = vmatpush3.msk.msra.mxu1 %vm2539_vm11, %v8503_v61  ;;  %vm2550_vm11 = vcmp.eq.s32.totalorder %v7011_v59, %v2426_v3 }
 0x6b3   : > { %5242 = vmatprep.subr.msk.mxu1 %vm2554_vm15, %v8503_v61  ;;  %vm2534_vm15 = vcmp.eq.s32.totalorder %v7011_v59, %v2378_v30 }
 0x6b4   : > { %5243 = vmatpush3.msk.msra.mxu1 %vm2538_vm14, %v8503_v61  ;;  %vm2549_vm14 = vcmp.eq.s32.totalorder %v7011_v59, %v2423_v17 }
 0x6b5   : > { %5244 = vmatprep.subr.msk.mxu1 %vm2553_vm13, %v8503_v61  ;;  %vm2052_vm13 = vcmp.gt.f32.partialorder %v7340_v14, 0.0 }
 0x6b6   : > { %5245 = vmatpush3.msk.msra.mxu1 %vm2537_vm0, %v8503_v61  ;;  %vm2533_vm0 = vcmp.eq.s32.totalorder %v7011_v59, %v2375_v20 }
 0x6b7   : > { %5246 = vmatprep.subr.msk.mxu1 %vm2552_vm2, %v8503_v61  ;;  %vm2051_vm2 = vcmp.gt.f32.partialorder %v7330_v47, 0.0 }
 0x6b8   : > { %5247 = vmatpush3.msk.msra.mxu1 %vm2536_vm5, %v8503_v61  ;;  %vm2969_vm5 = vcmask 523264  }
 0x6b9   : > { %v5410_v26 = vpop.eup %5409  ;;  %5248 = vmatprep.subr.msk.mxu1 %vm2551_vm3, %v8503_v61 }
 0x6ba   : > { %5249 = vmatpush3.msk.msra.mxu1 %vm2535_vm6, %v8503_v61  ;;  %v4782_v58 = vadd.f32 -1.0, %v5410_v26 }
 0x6bb   : > { %v5412_v27 = vpop.eup %5411  ;;  %5250 = vmatprep.subr.msk.mxu1 %vm2550_vm11, %v8503_v61 }
 0x6bc   : > { %v4783_v54 = vadd.f32 -1.0, %v5412_v27  ;;  %5251 = vmatpush3.msk.msra.mxu1 %vm2534_vm15, %v8503_v61  ;;  %v2081_v13 = vsel %vm2051_vm2, %v7330_v47, %v4782_v58 }
 0x6bd   : > { %5252 = vmatprep.subr.msk.mxu1 %vm2549_vm14, %v8503_v61 }
 0x6be   : > { %v2082_v35 = vsel %vm2052_vm13, %v7340_v14, %v4783_v54  ;;  %5253 = vmatpush3.msk.msra.mxu1 %vm2533_vm0, %v8503_v61 }
 0x6bf   : > { %2962 = vmatprep.mubr.f32.mxu1 %v2082_v35 }
 0x6c0   : > { %2963 = vmatmul.mubr.f32.vlgmr.msra.gmra.mxu1 %v2081_v13 }
 0x75f   : > { %v5184_v12 = vpop.f32.mrf.mxu1 }
 0x760   : > { %v5219_v45 = vpop.f32.mrf.mxu0 }
 0x761   : > { %v5185_v4 = vpop.f32.mrf.mxu1 }
 0x762   : > { %v5220_v50 = vpop.f32.mrf.mxu0  ;;  %v5186_v62 = vadd.f32 %v5185_v4, %v5184_v12 }
 0x763   : > { %v5221_v60 = vadd.f32 %v5220_v50, %v5219_v45 }
 0x765   : > { %v2895_v21 = vadd.f32 %v5221_v60, %v5186_v62 }
 0x780   : > { %v5254_v25 = vpop.f32.mrf.mxu1 }
 0x782   : > { %v5255_v59 = vpop.f32.mrf.mxu1 }
 0x783   : > { %v5256_v52 = vadd.f32 %v5255_v59, %v5254_v25 }
 0x785   : > { %v2965_v63 = vadd.f32 %v5256_v52, %v2895_v21 }
 0x787   : > { %v2968_v33 = vadd.f32 %v2965_v63, %v2757_v57 }
 0x789   : > { %2970 = vst.msk [vmem:[#allocation2] sm:$0xff] %vm2969_vm5, %v2968_v33 }
 0x78a PF: > { %p2971_p6 = scmp.eq.s32.totalorder %s5504_s18, 1 }
 0x78b   : > { %v2976_v16 = vld [vmem:[%s7963_s4 + $0x48] sm:$0xff] (%p2971_p6)  ;;  %vm2985_vm3 = vcmask (%p2971_p6), 64512   ;;  %v2977_v42 = vld [vmem:[%s7963_s4 + $0x50] sm:$0xff] (%p2971_p6)  ;;  %s5528_s17 = smov (%p2971_p6), 120   ;;  %s5529_s22 = smov (%p2971_p6), 64   ;;  %vm3065_vm6 = vcmask (%p2971_p6), 523264  }
 0x78c   : > { %2975 = sbr.rel (!%p2971_p6) target bundleno = 2254 (0x8ce), region = 52  ;;  %2981 = vrot.lane.b32.xlu0 (%p2971_p6), %v2976_v16, %s5528_s17  ;;  %5309 = vmatprep.mubr.msk.f32.mxu1 (%p2971_p6), %vm2985_vm3, %v2976_v16  ;;  %vm3155_vm11 = vcmask (%p2971_p6), 1048064  }
 0x790   : > { %v2978_v61 = vld [vmem:[#allocation2] sm:$0xff] (%p2971_p6)  ;;  %2983 = vrot.lane.b32.xlu0 (%p2971_p6), %v2977_v42, %s5528_s17 }
 0x791   : > { %5307 = vmatprep.subr.mxu1 %v2978_v61  ;;  %5302 = vmatprep.subr.mxu0 %v2978_v61 }
 0x792   : > { %5308 = vmatpush3.msra.mxu1 %v2978_v61  ;;  %5303 = vmatpush3.msra.mxu0 %v2978_v61 }
 0x793   : > { %5310 = vmatmul.mubr.msk.f32.vlgmr.msra.gmra.mxu1 %vm2985_vm3, %v2977_v42 }
 0x7fe   : > { %v2982_v23 = vpop.permute.xlu0 %2981 }
 0x7ff   : > { %5304 = vmatprep.mubr.msk.f32.mxu0 %vm2985_vm3, %v2982_v23 }
 0x802   : > { %v2984_v5 = vpop.permute.xlu0 %2983 }
 0x803   : > { %5305 = vmatmul.mubr.msk.f32.vlgmr.msra.gmra.mxu0 %vm2985_vm3, %v2984_v5 }
 0x853   : > { %v5311_v18 = vpop.f32.mrf.mxu1 }
 0x855   : > { %v3138_v31 = vpop.f32.mrf.mxu1 }
 0x856   : > { %3149 = vrot.lane.b32.xlu1 %v3138_v31, %s5529_s22 }
 0x85a   : > { %3151 = vrot.lane.b32.xlu1 %v5311_v18, %s5529_s22 }
 0x8c3   : > { %v5306_v9 = vpop.f32.mrf.mxu0 }
 0x8c4   : > { %3067 = vst.msk [vmem:[#allocation4 + $0x8] sm:$0xff] %vm3065_vm6, %v5306_v9 }
 0x8c5   : > { %v3056_v6 = vpop.f32.mrf.mxu0 }
 0x8c6   : > { %3066 = vst.msk [vmem:[#allocation4] sm:$0xff] %vm3065_vm6, %v3056_v6 }
 0x8c8   : > { %v3150_v19 = vpop.permute.xlu1 %3149 }
 0x8c9   : > { %3156 = vst.msk [vmem:[#allocation4] sm:$0xff] %vm3155_vm11, %v3150_v19 }
 0x8cc   : > { %v3152_v7 = vpop.permute.xlu1 %3151 }
 0x8cd   : > { %3157 = vst.msk [vmem:[#allocation4 + $0x8] sm:$0xff] %vm3155_vm11, %v3152_v7 }
 0x8ce PF: > { %p4981_p7 = scmp.ne.s32.totalorder %s5504_s18, 1 }
 0x8cf   : > { %s5530_s27 = smov (!%p4981_p7), 112  }
 0x8d0   : > { %3160 = sbr.rel (%p4981_p7) target bundleno = 3161 (0xc59), region = 56 }
 0x8d5   : > { %v3161_v48 = vld [vmem:[%s7963_s4 + $0x48] sm:$0xff]  ;;  %v3165_v2 = vld [vmem:[%s7961_s2] sm:$0xff]  ;;  %v5531_v49 = vmov 1983009808   ;;  %v3162_v28 = vld [vmem:[%s7963_s4 + $0x50] sm:$0xff]  ;;  %v5532_v15 = vmov 0.0  }
 0x8d6   : > { %3169 = vrot.lane.b32.xlu0 %v3161_v48, %s5530_s27  ;;  %v3177_v38 = vunpack.c.l.s4 %v5531_v49  ;;  %3282 = vmatprep.mubr.f32.mxu0 %v5532_v15  ;;  %v3175_v44 = vcombine.high %v3165_v2, %v3165_v2  ;;  %v8519_v53 = vld [vmem:[#allocation5_spill] sm:$0xff]  ;;  %vm3205_vm15 = vcmask 1041408   ;;  %v5533_v11 = vmov 1.0   ;;  %v8523_v47 = vld [vmem:[#allocation90_spill] sm:$0xff]  ;;  %v8528_v37 = vld [vmem:[#allocation84_spill] sm:$0xff] }
 0x8d7   : > { %3359 = vmatprep.mubr.f32.mxu1 %v5532_v15  ;;  %v4982_v56 = vld.sshfl [vmem:[%s7961_s2 + $0x8] sm:$0x33 pattern:$0x76325410]  ;;  %v5534_v0 = vmov 18   ;;  %vm3200_vm14 = vcmask 15360  }
 0x8d8   : > { %v3178_v39 = vunpack.c.0.s8 %v3177_v38  ;;  %v3199_v51 = vcombine.high %v4982_v56, %v4982_v56  ;;  %5414 = vset.pattern.permute.xlu1 %v5534_v0  ;;  %v8526_v14 = vld [vmem:[#allocation85_spill] sm:$0xff]  ;;  %v8530_v8 = vld [vmem:[#allocation79_spill] sm:$0xff]  ;;  %v8532_v32 = vld [vmem:[#allocation78_spill] sm:$0xff] }
 0x8d9   : > { %3685 = vperm.xlu1 %5414, %v3162_v28   ;;  %vm8531_vm13 = vnez %v8530_v8  ;;  %v8534_v36 = vld [vmem:[#allocation73_spill] sm:$0xff]  ;;  %v8536_v3 = vld [vmem:[#allocation72_spill] sm:$0xff]  ;;  %v8539_v26 = vld [vmem:[#allocation67_spill] sm:$0xff] }
 0x8da   : > { %3171 = vrot.lane.b32.xlu0 %v3162_v28, %s5530_s27  ;;  %v3181_v43 = vsub.s32 %v3178_v39, %v8519_v53  ;;  %vm8535_vm0 = vnez %v8534_v36  ;;  %vm8537_vm2 = vnez %v8536_v3  ;;  %vm8540_vm5 = vnez %v8539_v26  ;;  %v8541_v17 = vld [vmem:[#allocation93_spill] sm:$0xff]  ;;  %v8543_v27 = vld [vmem:[#allocation66_spill] sm:$0xff]  ;;  %v8545_v20 = vld [vmem:[#allocation92_spill] sm:$0xff] }
 0x8db   : > { %vm8542_vm3 = vnez %v8541_v17  ;;  %vm8544_vm6 = vnez %v8543_v27  ;;  %vm8546_vm11 = vnez %v8545_v20  ;;  %v8547_v58 = vld [vmem:[#allocation61_spill] sm:$0xff]  ;;  %v8549_v54 = vld [vmem:[#allocation87_spill] sm:$0xff]  ;;  %v8551_v35 = vld [vmem:[#allocation60_spill] sm:$0xff] }
 0x8dc   : > { %v3189_v29 = vrot.slane %v3175_v44, %v3181_v43  ;;  %v3182_v24 = vrot.slane %v3165_v2, %v3181_v43  ;;  %v8553_v13 = vld [vmem:[#allocation86_spill] sm:$0xff]  ;;  %v8555_v12 = vld [vmem:[#allocation55_spill] sm:$0xff]  ;;  %v8557_v45 = vld [vmem:[#allocation81_spill] sm:$0xff] }
 0x8dd   : > { %3681 = vperm.xlu1 %5414, %v3161_v48   ;;  %v8559_v4 = vld [vmem:[#allocation54_spill] sm:$0xff]  ;;  %v8561_v50 = vld [vmem:[#allocation80_spill] sm:$0xff]  ;;  %v8563_v62 = vld [vmem:[#allocation49_spill] sm:$0xff] }
 0x8de   : > { %v3191_v10 = vcombine.high %v3189_v29, %v3189_v29  ;;  %v3190_v41 = vcombine.high %v3182_v24, %v3182_v24  ;;  %v8565_v60 = vld [vmem:[#allocation75_spill] sm:$0xff]  ;;  %v8567_v25 = vld [vmem:[#allocation48_spill] sm:$0xff]  ;;  %v8569_v59 = vld [vmem:[#allocation74_spill] sm:$0xff] }
 0x8df   : > { %v8571_v21 = vld [vmem:[#allocation43_spill] sm:$0xff]  ;;  %v8573_v52 = vld [vmem:[#allocation69_spill] sm:$0xff]  ;;  %v8575_v57 = vld [vmem:[#allocation42_spill] sm:$0xff] }
 0x8e0   : > { %4987 = vmatprep.subr.msk.mxu1 %vm3205_vm15, %v3191_v10  ;;  %4983 = vmatprep.subr.msk.mxu0 %vm3205_vm15, %v3190_v41  ;;  %v8577_v63 = vld [vmem:[#allocation68_spill] sm:$0xff]  ;;  %v8579_v33 = vld [vmem:[#allocation37_spill] sm:$0xff]  ;;  %v8581_v61 = vld [vmem:[#allocation63_spill] sm:$0xff] }
 0x8e1   : > { %4988 = vmatpush1.msk.msra.mxu1 %vm3205_vm15, %v3189_v29  ;;  %4984 = vmatpush1.msk.msra.mxu0 %vm3205_vm15, %v3182_v24  ;;  %v8583_v16 = vld [vmem:[#allocation36_spill] sm:$0xff]  ;;  %v8585_v42 = vld [vmem:[#allocation62_spill] sm:$0xff]  ;;  %v8587_v23 = vld [vmem:[#allocation31_spill] sm:$0xff] }
 0x8e2   : > { %4995 = vmatprep.subr.msk.mxu1 %vm6264_vm4, %v5533_v11  ;;  %4991 = vmatprep.subr.msk.mxu0 %vm3205_vm15, %v3199_v51  ;;  %vm8524_vm4 = vnez %v8523_v47  ;;  %v8589_v5 = vld [vmem:[#allocation57_spill] sm:$0xff]  ;;  %v8591_v18 = vld [vmem:[#allocation30_spill] sm:$0xff]  ;;  %v8593_v31 = vld [vmem:[#allocation56_spill] sm:$0xff] }
 0x8e3   : > { %v8595_v9 = vld [vmem:[#allocation25_spill] sm:$0xff]  ;;  %v8597_v19 = vld [vmem:[#allocation51_spill] sm:$0xff]  ;;  %v8599_v6 = vld [vmem:[#allocation24_spill] sm:$0xff] }
 0x8e4   : > { %v8601_v7 = vld [vmem:[#allocation50_spill] sm:$0xff]  ;;  %v8603_v48 = vld [vmem:[#allocation19_spill] sm:$0xff]  ;;  %v8605_v2 = vld [vmem:[#allocation45_spill] sm:$0xff] }
 0x8e5   : > { %v8607_v49 = vld [vmem:[#allocation18_spill] sm:$0xff]  ;;  %v8609_v38 = vld [vmem:[#allocation44_spill] sm:$0xff]  ;;  %v8611_v28 = vld [vmem:[#allocation13_spill] sm:$0xff] }
 0x8e6   : > { %v8613_v44 = vld [vmem:[#allocation39_spill] sm:$0xff]  ;;  %v8615_v39 = vld [vmem:[#allocation12_spill] sm:$0xff]  ;;  %v8617_v43 = vld [vmem:[#allocation38_spill] sm:$0xff] }
 0x8e7   : > { %v3163_v29 = vld [vmem:[#allocation4] sm:$0xff]  ;;  %v8621_v24 = vld [vmem:[#allocation33_spill] sm:$0xff]  ;;  %v8623_v10 = vld [vmem:[#allocation6_spill] sm:$0xff] }
 0x8e8   : > { %v8625_v41 = vld [vmem:[#allocation32_spill] sm:$0xff]  ;;  %v8627_v51 = vld [vmem:[#allocation27_spill] sm:$0xff]  ;;  %v8630_v0 = vld [vmem:[#allocation26_spill] sm:$0xff] }
 0x8e9   : > { %v8633_v40 = vld [vmem:[#allocation21_spill] sm:$0xff]  ;;  %v3164_v46 = vld [vmem:[#allocation4 + $0x8] sm:$0xff]  ;;  %v8635_v47 = vld [vmem:[#allocation95_spill] sm:$0xff] }
 0x8ea   : > { %v8639_v22 = vld [vmem:[#allocation94_spill] sm:$0xff]  ;;  %v8649_v36 = vld [vmem:[#allocation9_spill] sm:$0xff]  ;;  %v8651_v3 = vld [vmem:[#allocation83_spill] sm:$0xff] }
 0x8eb   : > { %v8645_v8 = vld [vmem:[#allocation14_spill] sm:$0xff]  ;;  %v8653_v30 = vld [vmem:[#allocation8_spill] sm:$0xff]  ;;  %v8657_v17 = vld [vmem:[#allocation77_spill] sm:$0xff] }
 0x8ec   : > { %v8655_v26 = vld [vmem:[#allocation82_spill] sm:$0xff]  ;;  %v8659_v27 = vld [vmem:[#allocation76_spill] sm:$0xff]  ;;  %v8661_v20 = vld [vmem:[#allocation71_spill] sm:$0xff] }
 0x948   : > { %v3170_v1 = vpop.permute.xlu0 %3169 }
 0x949   : > { %4985 = vmatmul.mubr.msk.f32.vlgmr.msra.gmra.mxu0 %vm3200_vm14, %v3170_v1  ;;  %4989 = vmatmul.mubr.msk.f32.vlgmr.msra.gmra.mxu1 %vm3200_vm14, %v3170_v1 }
 0x94a   : > { %4996 = vmatpush1.msk.msra.mxu1 %vm6258_vm1, %v5533_v11  ;;  %3288 = vmatprep.mubr.f32.mxu0 %v5532_v15  ;;  %vm8527_vm1 = vnez %v8526_v14  ;;  %v8641_v14 = vld [vmem:[#allocation15_spill] sm:$0xff] }
 0x94b   : > { %4997 = vmatprep.subr.msk.mxu1 %vm6228_vm12, %v5533_v11  ;;  %4992 = vmatpush1.msk.msra.mxu0 %vm3205_vm15, %v4982_v56  ;;  %vm8529_vm12 = vnez %v8528_v37  ;;  %vm8548_vm15 = vnez %v8547_v58  ;;  %v8619_v56 = vld [vmem:[#allocation7_spill] sm:$0xff]  ;;  %v8643_v37 = vld [vmem:[#allocation89_spill] sm:$0xff]  ;;  %v8663_v58 = vld [vmem:[#allocation70_spill] sm:$0xff] }
 0x94c   : > { %4998 = vmatpush1.msk.msra.mxu1 %vm8524_vm4, %v5533_v11  ;;  %v3172_v34 = vpop.permute.xlu0 %3171  ;;  %5027 = vmatprep.subr.msk.mxu0 %vm6274_vm8, %v5533_v11  ;;  %vm8533_vm8 = vnez %v8532_v32  ;;  %vm8552_vm4 = vnez %v8551_v35  ;;  %v8647_v32 = vld [vmem:[#allocation88_spill] sm:$0xff] }
 0x94d   : > { %4999 = vmatprep.subr.msk.mxu1 %vm8527_vm1, %v5533_v11  ;;  %4986 = vmatmul.mubr.msk.f32.gmra.mxu0 %vm3200_vm14, %v3172_v34  ;;  %vm8554_vm1 = vnez %v8553_v13  ;;  %v8667_v35 = vld [vmem:[#allocation64_spill] sm:$0xff]  ;;  %v8669_v13 = vld [vmem:[#allocation59_spill] sm:$0xff] }
 0x94e   : > { %5000 = vmatpush1.msk.msra.mxu1 %vm8529_vm12, %v5533_v11  ;;  %3436 = vmatprep.mubr.f32.mxu0 %v5532_v15  ;;  %vm8556_vm12 = vnez %v8555_v12  ;;  %v8671_v12 = vld [vmem:[#allocation58_spill] sm:$0xff] }
 0x94f   : > { %5001 = vmatprep.subr.msk.mxu1 %vm8531_vm13, %v5533_v11  ;;  %3365 = vmatprep.mubr.f32.mxu1 %v5532_v15  ;;  %vm8558_vm13 = vnez %v8557_v45  ;;  %v8673_v45 = vld [vmem:[#allocation53_spill] sm:$0xff] }
 0x950   : > { %5002 = vmatpush1.msk.msra.mxu1 %vm8533_vm8, %v5533_v11  ;;  %vm8560_vm8 = vnez %v8559_v4  ;;  %v8675_v4 = vld [vmem:[#allocation52_spill] sm:$0xff] }
 0x951   : > { %5003 = vmatprep.subr.msk.mxu1 %vm8535_vm0, %v5533_v11  ;;  %4993 = vmatmul.mubr.msk.f32.vlgmr.msra.gmra.mxu0 %vm3200_vm14, %v3170_v1  ;;  %vm8562_vm0 = vnez %v8561_v50  ;;  %v8677_v50 = vld [vmem:[#allocation47_spill] sm:$0xff] }
 0x952   : > { %5004 = vmatpush1.msk.msra.mxu1 %vm8537_vm2, %v5533_v11  ;;  %5028 = vmatpush1.msk.msra.mxu0 %vm6270_vm7, %v5533_v11  ;;  %vm8550_vm7 = vnez %v8549_v54  ;;  %vm8564_vm2 = vnez %v8563_v62  ;;  %v8665_v54 = vld [vmem:[#allocation65_spill] sm:$0xff]  ;;  %v8679_v62 = vld [vmem:[#allocation46_spill] sm:$0xff] }
 0x953   : > { %5005 = vmatprep.subr.msk.mxu1 %vm8540_vm5, %v5533_v11  ;;  %5029 = vmatprep.subr.msk.mxu0 %vm8542_vm3, %v5533_v11  ;;  %vm8566_vm5 = vnez %v8565_v60  ;;  %vm8568_vm3 = vnez %v8567_v25  ;;  %v8681_v60 = vld [vmem:[#allocation41_spill] sm:$0xff]  ;;  %v8683_v25 = vld [vmem:[#allocation40_spill] sm:$0xff] }
 0x954   : > { %5006 = vmatpush1.msk.msra.mxu1 %vm8544_vm6, %v5533_v11  ;;  %5030 = vmatpush1.msk.msra.mxu0 %vm8546_vm11, %v5533_v11  ;;  %vm8570_vm6 = vnez %v8569_v59  ;;  %vm8572_vm11 = vnez %v8571_v21  ;;  %v8685_v59 = vld [vmem:[#allocation35_spill] sm:$0xff]  ;;  %v8687_v21 = vld [vmem:[#allocation34_spill] sm:$0xff] }
 0x955   : > { %5007 = vmatprep.subr.msk.mxu1 %vm8548_vm15, %v5533_v11  ;;  %5031 = vmatprep.subr.msk.mxu0 %vm8550_vm7, %v5533_v11  ;;  %vm8574_vm15 = vnez %v8573_v52  ;;  %vm8576_vm7 = vnez %v8575_v57  ;;  %v8689_v52 = vld [vmem:[#allocation29_spill] sm:$0xff]  ;;  %v8691_v57 = vld [vmem:[#allocation28_spill] sm:$0xff] }
 0x956   : > { %5008 = vmatpush1.msk.msra.mxu1 %vm8552_vm4, %v5533_v11  ;;  %5032 = vmatpush1.msk.msra.mxu0 %vm8554_vm1, %v5533_v11  ;;  %vm8578_vm4 = vnez %v8577_v63  ;;  %vm8580_vm1 = vnez %v8579_v33  ;;  %v8693_v63 = vld [vmem:[#allocation23_spill] sm:$0xff]  ;;  %v8695_v33 = vld [vmem:[#allocation22_spill] sm:$0xff] }
 0x957   : > { %5009 = vmatprep.subr.msk.mxu1 %vm8556_vm12, %v5533_v11  ;;  %5033 = vmatprep.subr.msk.mxu0 %vm8558_vm13, %v5533_v11  ;;  %vm8582_vm12 = vnez %v8581_v61  ;;  %vm8584_vm13 = vnez %v8583_v16  ;;  %v8697_v61 = vld [vmem:[#allocation17_spill] sm:$0xff]  ;;  %v8699_v16 = vld [vmem:[#allocation16_spill] sm:$0xff] }
 0x958   : > { %5010 = vmatpush1.msk.msra.mxu1 %vm8560_vm8, %v5533_v11  ;;  %5034 = vmatpush1.msk.msra.mxu0 %vm8562_vm0, %v5533_v11  ;;  %vm8588_vm8 = vnez %v8587_v23  ;;  %vm8590_vm0 = vnez %v8589_v5  ;;  %v8703_v23 = vld [vmem:[#allocation10_spill] sm:$0xff]  ;;  %v7748_v5 = vld [vmem:[%s7963_s4 + $0x58] sm:$0xff] }
 0x959   : > { %5011 = vmatprep.subr.msk.mxu1 %vm8564_vm2, %v5533_v11  ;;  %5035 = vmatprep.subr.msk.mxu0 %vm8566_vm5, %v5533_v11  ;;  %vm8592_vm2 = vnez %v8591_v18  ;;  %vm8594_vm5 = vnez %v8593_v31  ;;  %v7753_v18 = vld [vmem:[%s7963_s4 + $0x60] sm:$0xff]  ;;  %v5535_v31 = vmov 16  }
 0x95a   : > { %5012 = vmatpush1.msk.msra.mxu1 %vm8568_vm3, %v5533_v11  ;;  %5036 = vmatpush1.msk.msra.mxu0 %vm8570_vm6, %v5533_v11  ;;  %vm8596_vm3 = vnez %v8595_v9  ;;  %vm8598_vm6 = vnez %v8597_v19 }
 0x95b   : > { %3442 = vmatprep.mubr.f32.mxu0 %v5532_v15  ;;  %5013 = vmatprep.subr.msk.mxu1 %vm8572_vm11, %v5533_v11  ;;  %vm8600_vm11 = vnez %v8599_v6 }
 0x95c   : > { %5037 = vmatprep.subr.msk.mxu0 %vm8574_vm15, %v5533_v11  ;;  %4990 = vmatmul.mubr.msk.f32.gmra.mxu1 %vm3200_vm14, %v3172_v34  ;;  %vm8602_vm15 = vnez %v8601_v7 }
 0x95d   : > { %4994 = vmatmul.mubr.msk.f32.gmra.mxu0 %vm3200_vm14, %v3172_v34  ;;  %5014 = vmatpush1.msk.msra.mxu1 %vm8576_vm7, %v5533_v11  ;;  %vm8586_vm14 = vnez %v8585_v42  ;;  %vm8604_vm7 = vnez %v8603_v48  ;;  %v8637_v34 = vld [vmem:[#allocation20_spill] sm:$0xff]  ;;  %v8701_v42 = vld [vmem:[#allocation11_spill] sm:$0xff] }
 0x95e   : > { %5038 = vmatpush1.msk.msra.mxu0 %vm8578_vm4, %v5533_v11  ;;  %5015 = vmatprep.subr.msk.mxu1 %vm8580_vm1, %v5533_v11  ;;  %vm8606_vm4 = vnez %v8605_v2  ;;  %vm8608_vm1 = vnez %v8607_v49  ;;  %v7763_v2 = vpop.permute.xlu1 %3685 }
 0x95f   : > { %5039 = vmatprep.subr.msk.mxu0 %vm8582_vm12, %v5533_v11  ;;  %5016 = vmatpush1.msk.msra.mxu1 %vm8584_vm13, %v5533_v11  ;;  %vm8610_vm12 = vnez %v8609_v38  ;;  %vm8612_vm13 = vnez %v8611_v28 }
 0x960   : > { %5040 = vmatpush1.msk.msra.mxu0 %vm8586_vm14, %v5533_v11  ;;  %5017 = vmatprep.subr.msk.mxu1 %vm8588_vm8, %v5533_v11  ;;  %vm8614_vm14 = vnez %v8613_v44  ;;  %vm8616_vm8 = vnez %v8615_v39 }
 0x961   : > { %5041 = vmatprep.subr.msk.mxu0 %vm8590_vm0, %v5533_v11  ;;  %5018 = vmatpush1.msk.msra.mxu1 %vm8592_vm2, %v5533_v11  ;;  %vm8618_vm0 = vnez %v8617_v43  ;;  %vm8620_vm2 = vnez %v8619_v56 }
 0x962   : > { %5042 = vmatpush1.msk.msra.mxu0 %vm8594_vm5, %v5533_v11  ;;  %5019 = vmatprep.subr.msk.mxu1 %vm8596_vm3, %v5533_v11  ;;  %vm8622_vm5 = vnez %v8621_v24  ;;  %vm8624_vm3 = vnez %v8623_v10  ;;  %v7767_v43 = vpop.permute.xlu1 %3681 }
 0x963   : > { %5043 = vmatprep.subr.msk.mxu0 %vm8598_vm6, %v5533_v11  ;;  %5020 = vmatpush1.msk.msra.mxu1 %vm8600_vm11, %v5533_v11  ;;  %vm8626_vm6 = vnez %v8625_v41  ;;  %vm8628_vm11 = vnez %v8627_v51 }
 0x964   : > { %5044 = vmatpush1.msk.msra.mxu0 %vm8602_vm15, %v5533_v11  ;;  %5021 = vmatprep.subr.msk.mxu1 %vm8604_vm7, %v5533_v11  ;;  %vm8631_vm15 = vnez %v8630_v0  ;;  %vm8634_vm7 = vnez %v8633_v40 }
 0x965   : > { %5045 = vmatprep.subr.msk.mxu0 %vm8606_vm4, %v5533_v11  ;;  %5022 = vmatpush1.msk.msra.mxu1 %vm8608_vm1, %v5533_v11  ;;  %vm8636_vm4 = vnez %v8635_v47  ;;  %vm8640_vm1 = vnez %v8639_v22 }
 0x966   : > { %5046 = vmatpush1.msk.msra.mxu0 %vm8610_vm12, %v5533_v11  ;;  %5023 = vmatprep.subr.msk.mxu1 %vm8612_vm13, %v5533_v11  ;;  %vm8644_vm12 = vnez %v8643_v37  ;;  %vm8646_vm13 = vnez %v8645_v8 }
 0x967   : > { %5047 = vmatprep.subr.msk.mxu0 %vm8614_vm14, %v5533_v11  ;;  %5024 = vmatpush1.msk.msra.mxu1 %vm8616_vm8, %v5533_v11  ;;  %vm8648_vm14 = vnez %v8647_v32  ;;  %vm8650_vm8 = vnez %v8649_v36 }
 0x968   : > { %5048 = vmatpush1.msk.msra.mxu0 %vm8618_vm0, %v5533_v11  ;;  %5025 = vmatprep.subr.msk.mxu1 %vm8620_vm2, %v5533_v11  ;;  %vm8652_vm0 = vnez %v8651_v3  ;;  %vm8654_vm2 = vnez %v8653_v30 }
 0x969   : > { %5049 = vmatprep.subr.msk.mxu0 %vm8622_vm5, %v5533_v11  ;;  %5026 = vmatpush1.msk.msra.mxu1 %vm8624_vm3, %v5533_v11  ;;  %vm8656_vm5 = vnez %v8655_v26  ;;  %vm8658_vm3 = vnez %v8657_v17 }
 0x96a   : > { %3513 = vmatprep.mubr.f32.mxu1 %v5532_v15  ;;  %5050 = vmatpush1.msk.msra.mxu0 %vm8626_vm6, %v5533_v11  ;;  %vm8660_vm6 = vnez %v8659_v27 }
 0x96b   : > { %3514 = vmatmul.mubr.f32.vlgmr.msra.gmra.mxu1 %v3163_v29  ;;  %5051 = vmatprep.subr.msk.mxu0 %vm8628_vm11, %v5533_v11  ;;  %vm8662_vm11 = vnez %v8661_v20 }
 0x96c   : > { %5059 = vmatprep.subr.msk.mxu1 %vm6282_vm10, %v5533_v11  ;;  %5052 = vmatpush1.msk.msra.mxu0 %vm8631_vm15, %v5533_v11  ;;  %vm8638_vm10 = vnez %v8637_v34  ;;  %vm8664_vm15 = vnez %v8663_v58 }
 0x96d   : > { %5060 = vmatpush1.msk.msra.mxu1 %vm6278_vm9, %v5533_v11  ;;  %5053 = vmatprep.subr.msk.mxu0 %vm8634_vm7, %v5533_v11  ;;  %vm8642_vm9 = vnez %v8641_v14  ;;  %vm8666_vm7 = vnez %v8665_v54 }
 0x96e   : > { %5061 = vmatprep.subr.msk.mxu1 %vm8636_vm4, %v5533_v11  ;;  %3519 = vmatprep.mubr.f32.mxu1 %v5532_v15  ;;  %vm8668_vm4 = vnez %v8667_v35 }
 0x96f   : > { %5054 = vmatpush1.msk.msra.mxu0 %vm8638_vm10, %v5533_v11  ;;  %5062 = vmatpush1.msk.msra.mxu1 %vm8640_vm1, %v5533_v11  ;;  %vm8670_vm10 = vnez %v8669_v13  ;;  %vm8672_vm1 = vnez %v8671_v12 }
 0x970   : > { %3520 = vmatmul.mubr.f32.gmra.mxu1 %v3164_v46  ;;  %5055 = vmatprep.subr.msk.mxu0 %vm8642_vm9, %v5533_v11  ;;  %vm8674_vm9 = vnez %v8673_v45 }
 0x971   : > { %5063 = vmatprep.subr.msk.mxu1 %vm8644_vm12, %v5533_v11  ;;  %5056 = vmatpush1.msk.msra.mxu0 %vm8646_vm13, %v5533_v11  ;;  %vm8676_vm12 = vnez %v8675_v4  ;;  %vm8678_vm13 = vnez %v8677_v50 }
 0x972   : > { %5064 = vmatpush1.msk.msra.mxu1 %vm8648_vm14, %v5533_v11  ;;  %5057 = vmatprep.subr.msk.mxu0 %vm8650_vm8, %v5533_v11  ;;  %vm8680_vm14 = vnez %v8679_v62  ;;  %vm8682_vm8 = vnez %v8681_v60 }
 0x973   : > { %5065 = vmatprep.subr.msk.mxu1 %vm8652_vm0, %v5533_v11  ;;  %5058 = vmatpush1.msk.msra.mxu0 %vm8654_vm2, %v5533_v11  ;;  %vm8684_vm0 = vnez %v8683_v25  ;;  %vm8686_vm2 = vnez %v8685_v59 }
 0x974   : > { %3590 = vmatprep.mubr.f32.mxu0 %v5532_v15  ;;  %5066 = vmatpush1.msk.msra.mxu1 %vm8656_vm5, %v5533_v11  ;;  %vm8688_vm5 = vnez %v8687_v21 }
 0x975   : > { %3591 = vmatmul.mubr.f32.vlgmr.msra.gmra.mxu0 %v3163_v29  ;;  %5067 = vmatprep.subr.msk.mxu1 %vm8658_vm3, %v5533_v11  ;;  %vm8690_vm3 = vnez %v8689_v52 }
 0x976   : > { %5068 = vmatpush1.msk.msra.mxu1 %vm8660_vm6, %v5533_v11  ;;  %3596 = vmatprep.mubr.f32.mxu0 %v5532_v15  ;;  %vm8692_vm6 = vnez %v8691_v57 }
 0x977   : > { %5069 = vmatprep.subr.msk.mxu1 %vm8662_vm11, %v5533_v11  ;;  %3667 = vmatprep.mubr.f32.mxu1 %v5532_v15  ;;  %vm8694_vm11 = vnez %v8693_v63 }
 0x978   : > { %5070 = vmatpush1.msk.msra.mxu1 %vm8664_vm15, %v5533_v11  ;;  %vm8696_vm15 = vnez %v8695_v33  ;;  %5416 = vset.pattern.permute.xlu1 %v5535_v31 }
 0x979   : > { %3597 = vmatmul.mubr.f32.gmra.mxu0 %v3164_v46  ;;  %5071 = vmatprep.subr.msk.mxu1 %vm8666_vm7, %v5533_v11  ;;  %vm8698_vm7 = vnez %v8697_v61 }
 0x97a   : > { %5072 = vmatpush1.msk.msra.mxu1 %vm8668_vm4, %v5533_v11  ;;  %3853 = vmatprep.mubr.f32.mxu0 %v5532_v15  ;;  %vm8700_vm4 = vnez %v8699_v16 }
 0x97b   : > { %5073 = vmatprep.subr.msk.mxu1 %vm8670_vm10, %v5533_v11  ;;  %vm8702_vm10 = vnez %v8701_v42  ;;  %5415 = vset.pattern.permute.xlu0 %v5535_v31 }
 0x97c   : > { %5074 = vmatpush1.msk.msra.mxu1 %vm8672_vm1, %v5533_v11  ;;  %vm8704_vm1 = vnez %v8703_v23  ;;  %3776 = vperm.xlu1 %5416, %v7748_v5  }
 0x97d   : > { %5075 = vmatprep.subr.msk.mxu1 %vm8674_vm9, %v5533_v11  ;;  %3781 = vperm.xlu0 %5415, %v7753_v18  }
 0x97e   : > { %5076 = vmatpush1.msk.msra.mxu1 %vm8676_vm12, %v5533_v11 }
 0x97f   : > { %5077 = vmatprep.subr.msk.mxu1 %vm8678_vm13, %v5533_v11 }
 0x980   : > { %5078 = vmatpush1.msk.msra.mxu1 %vm8680_vm14, %v5533_v11 }
 0x981   : > { %5079 = vmatprep.subr.msk.mxu1 %vm8682_vm8, %v5533_v11  ;;  %vm3784_vm8 = vcmask 130048  }
 0x982   : > { %5080 = vmatpush1.msk.msra.mxu1 %vm8684_vm0, %v5533_v11 }
 0x983   : > { %5081 = vmatprep.subr.msk.mxu1 %vm8686_vm2, %v5533_v11 }
 0x984   : > { %5082 = vmatpush1.msk.msra.mxu1 %vm8688_vm5, %v5533_v11 }
 0x985   : > { %5083 = vmatprep.subr.msk.mxu1 %vm8690_vm3, %v5533_v11 }
 0x986   : > { %5084 = vmatpush1.msk.msra.mxu1 %vm8692_vm6, %v5533_v11 }
 0x987   : > { %5085 = vmatprep.subr.msk.mxu1 %vm8694_vm11, %v5533_v11 }
 0x988   : > { %5086 = vmatpush1.msk.msra.mxu1 %vm8696_vm15, %v5533_v11 }
 0x989   : > { %5087 = vmatprep.subr.msk.mxu1 %vm8698_vm7, %v5533_v11 }
 0x98a   : > { %5088 = vmatpush1.msk.msra.mxu1 %vm8700_vm4, %v5533_v11 }
 0x98b   : > { %5089 = vmatprep.subr.msk.mxu1 %vm8702_vm10, %v5533_v11 }
 0x98c   : > { %5090 = vmatpush1.msk.msra.mxu1 %vm8704_vm1, %v5533_v11  ;;  %v7760_v11 = vld [vmem:[%s7963_s4 + $0x68] sm:$0xff] }
 0x98d   : > { %3668 = vmatmul.mubr.f32.vlgmr.msra.gmra.mxu1 %v3163_v29  ;;  %4095 = vperm.xlu1 %5416, %v7760_v11  }
 0x98e   : > { %3673 = vmatprep.mubr.f32.mxu1 %v5532_v15 }
 0x991   : > { %3674 = vmatmul.mubr.f32.gmra.mxu1 %v3164_v46 }
 0x992   : > { %4235 = vmatprep.mubr.f32.mxu1 %v5532_v15 }
 0xa09   : > { %v3284_v9 = vpop.f32.mrf.mxu0  ;;  %v3361_v6 = vpop.f32.mrf.mxu1 }
 0xa0b   : > { %v3286_v19 = vpop.f32.mrf.mxu0  ;;  %v3363_v48 = vpop.f32.mrf.mxu1 }
 0xa0d   : > { %v3290_v7 = vpop.f32.mrf.mxu0 }
 0xa0f   : > { %v3292_v49 = vpop.f32.mrf.mxu0 }
 0xa11   : > { %v7765_v28 = vpop.f32.mrf.mxu0 }
 0xa13   : > { %v7769_v29 = vpop.f32.mrf.mxu0 }
 0xa1c   : > { %v3367_v38 = vpop.f32.mrf.mxu1 }
 0xa1d   : > { %v7774_v51 = vpop.f32.mrf.mxu0 }
 0xa1e   : > { %v3369_v44 = vpop.f32.mrf.mxu1 }
 0xa1f   : > { %v7778_v34 = vpop.f32.mrf.mxu0 }
 0xa2b   : > { %v3515_v39 = vpop.f32.mrf.mxu1 }
 0xa2c   : > { %v3516_v56 = vadd.f32 %v3515_v39, %v3284_v9 }
 0xa2d   : > { %v3517_v24 = vpop.f32.mrf.mxu1 }
 0xa2e   : > { %v3518_v10 = vadd.f32 %v3517_v24, %v3286_v19  ;;  %v7772_v41 = vadd.f32 %v7767_v43, %v3516_v56 }
 0xa30   : > { %v3689_v55 = vadd.f32 %v7767_v43, %v3518_v10  ;;  %v3521_v0 = vpop.f32.mrf.mxu1  ;;  %v3712_v47 = vmin.f32 %v7772_v41, 0.0  ;;  %vm3700_vm14 = vcmp.gt.f32.partialorder %v7772_v41, 0.0 }
 0xa31   : > { %v3522_v1 = vadd.f32 %v3521_v0, %v3290_v7 }
 0xa32   : > { %v3713_v40 = vmin.f32 %v3689_v55, 0.0  ;;  %v3523_v46 = vpop.f32.mrf.mxu1  ;;  %v3724_v30 = vmul.f32 1.442695, %v3712_v47  ;;  %vm3701_vm13 = vcmp.gt.f32.partialorder %v3689_v55, 0.0 }
 0xa33   : > { %v3694_v22 = vadd.f32 %v7763_v2, %v3522_v1  ;;  %v3524_v14 = vadd.f32 %v3523_v46, %v3292_v49 }
 0xa34   : > { %v3726_v37 = vmul.f32 1.442695, %v3713_v40 }
 0xa35   : > { %v3718_v8 = vmin.f32 %v3694_v22, 0.0  ;;  %v3695_v32 = vadd.f32 %v7763_v2, %v3524_v14  ;;  %v3592_v36 = vpop.f32.mrf.mxu0  ;;  %vm3706_vm12 = vcmp.gt.f32.partialorder %v3694_v22, 0.0 }
 0xa36   : > { %v3593_v3 = vadd.f32 %v3592_v36, %v3361_v6  ;;  %5418 = vpow2.f32 %v3726_v37 }
 0xa37   : > { %v3736_v26 = vmul.f32 1.442695, %v3718_v8  ;;  %v3719_v17 = vmin.f32 %v3695_v32, 0.0  ;;  %v3594_v27 = vpop.f32.mrf.mxu0  ;;  %vm3707_vm9 = vcmp.gt.f32.partialorder %v3695_v32, 0.0 }
 0xa38   : > { %v7783_v20 = vadd.f32 %v7767_v43, %v3593_v3  ;;  %v3595_v58 = vadd.f32 %v3594_v27, %v3363_v48 }
 0xa39   : > { %5420 = vpow2.f32 %v3736_v26  ;;  %v3738_v54 = vmul.f32 1.442695, %v3719_v17  ;;  %v3598_v35 = vpop.f32.mrf.mxu0 }
 0xa3a   : > { %v3714_v13 = vmin.f32 %v7783_v20, 0.0  ;;  %v7787_v12 = vadd.f32 %v7767_v43, %v3595_v58  ;;  %v3599_v45 = vadd.f32 %v3598_v35, %v3367_v38  ;;  %5422 = vpow2.f32 %v3724_v30 }
 0xa3b   : > { %5424 = vpow2.f32 %v3738_v54  ;;  %v3600_v4 = vpop.f32.mrf.mxu0  ;;  %vm3702_vm3 = vcmp.gt.f32.partialorder %v7783_v20, 0.0 }
 0xa3c   : > { %v3715_v50 = vmin.f32 %v7787_v12, 0.0  ;;  %v7791_v62 = vadd.f32 %v7763_v2, %v3599_v45  ;;  %v3601_v60 = vadd.f32 %v3600_v4, %v3369_v44  ;;  %v3728_v25 = vmul.f32 1.442695, %v3714_v13 }
 0xa3d   : > { %vm3703_vm5 = vcmp.gt.f32.partialorder %v7787_v12, 0.0 }
 0xa3e   : > { %v3720_v59 = vmin.f32 %v7791_v62, 0.0  ;;  %v3697_v21 = vadd.f32 %v7763_v2, %v3601_v60  ;;  %v3730_v52 = vmul.f32 1.442695, %v3715_v50  ;;  %5426 = vpow2.f32 %v3728_v25 }
 0xa3f   : > { %vm3708_vm2 = vcmp.gt.f32.partialorder %v7791_v62, 0.0 }
 0xa40   : > { %v3740_v57 = vmul.f32 1.442695, %v3720_v59  ;;  %v3721_v63 = vmin.f32 %v3697_v21, 0.0  ;;  %vm3709_vm0 = vcmp.gt.f32.partialorder %v3697_v21, 0.0 }
 0xa42   : > { %5428 = vpow2.f32 %v3740_v57  ;;  %v3742_v33 = vmul.f32 1.442695, %v3721_v63  ;;  %v7834_v57 = vpop.permute.xlu1 %3776 }
 0xa43   : > { %5430 = vpow2.f32 %v3730_v52  ;;  %v5419_v61 = vpop.eup %5418 }
 0xa44   : > { %5432 = vpow2.f32 %v3742_v33  ;;  %v5092_v19 = vadd.f32 -1.0, %v5419_v61 }
 0xa46   : > { %v5421_v16 = vpop.eup %5420  ;;  %v3761_v38 = vsel %vm3701_vm13, %v3689_v55, %v5092_v19 }
 0xa47   : > { %v5423_v42 = vpop.eup %5422  ;;  %v5097_v31 = vadd.f32 -1.0, %v5421_v16  ;;  %v7837_v16 = vpop.permute.xlu0 %3781 }
 0xa48   : > { %v5425_v23 = vpop.eup %5424  ;;  %v5091_v6 = vadd.f32 -1.0, %v5423_v42 }
 0xa49   : > { %v5098_v9 = vadd.f32 -1.0, %v5425_v23  ;;  %v3766_v48 = vsel %vm3706_vm12, %v3694_v22, %v5097_v31 }
 0xa4a   : > { %v3760_v56 = vsel %vm3700_vm14, %v7772_v41, %v5091_v6 }
 0xa4b   : > { %v3767_v7 = vsel %vm3707_vm9, %v3695_v32, %v5098_v9  ;;  %v5427_v44 = vpop.eup %5426 }
 0xa4c   : > { %3817 = vmatprep.subr.mxu0 %v3767_v7  ;;  %v5093_v3 = vadd.f32 -1.0, %v5427_v44 }
 0xa4d   : > { %v3669_v49 = vpop.f32.mrf.mxu1  ;;  %3818 = vmatpush1.msra.mxu0 %v3766_v48 }
 0xa4e   : > { %v3670_v39 = vadd.f32 %v3669_v49, %v7765_v28  ;;  %3819 = vmatprep.subr.mxu0 %v3761_v38  ;;  %v3762_v35 = vsel %vm3702_vm3, %v7783_v20, %v5093_v3 }
 0xa4f   : > { %v5429_v24 = vpop.eup %5428  ;;  %v3671_v10 = vpop.f32.mrf.mxu1  ;;  %3820 = vmatpush1.msra.mxu0 %v3760_v56 }
 0xa50   : > { %v5431_v0 = vpop.eup %5430  ;;  %v7799_v1 = vadd.f32 %v7767_v43, %v3670_v39  ;;  %v3672_v40 = vadd.f32 %v3671_v10, %v7769_v29  ;;  %5103 = vmatmul.mubr.msk.f32.vlgmr.msra.gmra.mxu0 %vm3784_vm8, %v7748_v5  ;;  %v5099_v22 = vadd.f32 -1.0, %v5429_v24 }
 0xa51   : > { %v5433_v55 = vpop.eup %5432  ;;  %v3675_v46 = vpop.f32.mrf.mxu1  ;;  %3859 = vmatprep.mubr.f32.mxu0 %v5532_v15  ;;  %v5094_v8 = vadd.f32 -1.0, %v5431_v0 }
 0xa52   : > { %v3693_v28 = vadd.f32 %v7767_v43, %v3672_v40  ;;  %v3676_v41 = vadd.f32 %v3675_v46, %v7774_v51  ;;  %v5100_v47 = vadd.f32 -1.0, %v5433_v55  ;;  %v3716_v14 = vmin.f32 %v7799_v1, 0.0 }
 0xa53   : > { %v3677_v37 = vpop.f32.mrf.mxu1  ;;  %v3768_v17 = vsel %vm3708_vm2, %v7791_v62, %v5099_v22  ;;  %vm3704_vm7 = vcmp.gt.f32.partialorder %v7799_v1, 0.0 }
 0xa54   : > { %v3717_v32 = vmin.f32 %v3693_v28, 0.0  ;;  %v3698_v29 = vadd.f32 %v7763_v2, %v3676_v41  ;;  %v3678_v36 = vadd.f32 %v3677_v37, %v7778_v34  ;;  %5104 = vmatmul.mubr.msk.f32.gmra.mxu0 %vm3784_vm8, %v7753_v18  ;;  %v3769_v30 = vsel %vm3709_vm0, %v3697_v21, %v5100_v47 }
 0xa55   : > { %3930 = vmatprep.mubr.f32.mxu0 %v5532_v15  ;;  %3894 = vmatprep.subr.mxu0 %v3769_v30  ;;  %v3732_v27 = vmul.f32 1.442695, %v3716_v14  ;;  %v3763_v34 = vsel %vm3703_vm5, %v7787_v12, %v5094_v8  ;;  %vm3705_vm15 = vcmp.gt.f32.partialorder %v3693_v28, 0.0 }
 0xa56   : > { %v3734_v43 = vmul.f32 1.442695, %v3717_v32  ;;  %v3722_v51 = vmin.f32 %v3698_v29, 0.0  ;;  %v3699_v26 = vadd.f32 %v7763_v2, %v3678_v36  ;;  %3895 = vmatpush1.msra.mxu0 %v3768_v17  ;;  %vm3710_vm11 = vcmp.gt.f32.partialorder %v3698_v29, 0.0 }
 0xa57   : > { %3896 = vmatprep.subr.mxu0 %v3763_v34 }
 0xa58   : > { %v3744_v58 = vmul.f32 1.442695, %v3722_v51  ;;  %v3723_v54 = vmin.f32 %v3699_v26, 0.0  ;;  %5434 = vpow2.f32 %v3734_v43  ;;  %3897 = vmatpush1.msra.mxu0 %v3762_v35  ;;  %vm3711_vm6 = vcmp.gt.f32.partialorder %v3699_v26, 0.0 }
 0xa59   : > { %5105 = vmatmul.mubr.msk.f32.vlgmr.msra.gmra.mxu0 %vm3784_vm8, %v7748_v5 }
 0xa5a   : > { %5436 = vpow2.f32 %v3744_v58  ;;  %v3746_v13 = vmul.f32 1.442695, %v3723_v54  ;;  %3936 = vmatprep.mubr.f32.mxu0 %v5532_v15 }
 0xa5b   : > { %5438 = vpow2.f32 %v3732_v27 }
 0xa5c   : > { %5440 = vpow2.f32 %v3746_v13 }
 0xa5d   : > { %5106 = vmatmul.mubr.msk.f32.gmra.mxu0 %vm3784_vm8, %v7753_v18 }
 0xa5e   : > { %4007 = vmatprep.mubr.f32.mxu0 %v5532_v15 }
 0xa65   : > { %v5435_v2 = vpop.eup %5434 }
 0xa66   : > { %v5096_v62 = vadd.f32 -1.0, %v5435_v2 }
 0xa67   : > { %v5437_v12 = vpop.eup %5436 }
 0xa68   : > { %v5439_v45 = vpop.eup %5438  ;;  %v5101_v4 = vadd.f32 -1.0, %v5437_v12  ;;  %v3765_v21 = vsel %vm3705_vm15, %v3693_v28, %v5096_v62 }
 0xa69   : > { %v5441_v20 = vpop.eup %5440  ;;  %v5095_v60 = vadd.f32 -1.0, %v5439_v45 }
 0xa6a   : > { %v5102_v50 = vadd.f32 -1.0, %v5441_v20  ;;  %v3770_v59 = vsel %vm3710_vm11, %v3698_v29, %v5101_v4  ;;  %vm4313_vm11 = vcmp.lt.s32.totalorder %v8519_v53, 4 }
 0xa6b   : > { %v3764_v52 = vsel %vm3704_vm7, %v7799_v1, %v5095_v60 }
 0xa6c   : > { %v3771_v25 = vsel %vm3711_vm6, %v3699_v26, %v5102_v50 }
 0xa6d   : > { %3971 = vmatprep.subr.mxu0 %v3771_v25 }
 0xa6e   : > { %3972 = vmatpush1.msra.mxu0 %v3770_v59 }
 0xa6f   : > { %3973 = vmatprep.subr.mxu0 %v3765_v21 }
 0xa70   : > { %3974 = vmatpush1.msra.mxu0 %v3764_v52 }
 0xa71   : > { %5107 = vmatmul.mubr.msk.f32.vlgmr.msra.gmra.mxu0 %vm3784_vm8, %v7748_v5 }
 0xa72   : > { %4013 = vmatprep.mubr.f32.mxu0 %v5532_v15 }
 0xa75   : > { %5108 = vmatmul.mubr.msk.f32.gmra.mxu0 %vm3784_vm8, %v7753_v18 }
 0xa76   : > { %4164 = vmatprep.mubr.f32.mxu0 %v5532_v15 }
 0xb10   : > { %v3855_v63 = vpop.f32.mrf.mxu0 }
 0xb11   : > { %v3856_v33 = vadd.f32 %v3855_v63, %v7834_v57 }
 0xb12   : > { %v3857_v61 = vpop.f32.mrf.mxu0 }
 0xb13   : > { %v4032_v42 = vmin.f32 %v3856_v33, 0.0  ;;  %v3858_v23 = vadd.f32 %v3857_v61, %v7834_v57  ;;  %vm4020_vm9 = vcmp.gt.f32.partialorder %v3856_v33, 0.0 }
 0xb14   : > { %v3861_v31 = vpop.f32.mrf.mxu0 }
 0xb15   : > { %v4033_v5 = vmin.f32 %v3858_v23, 0.0  ;;  %v3862_v9 = vadd.f32 %v3861_v31, %v7837_v16  ;;  %v4044_v19 = vmul.f32 1.442695, %v4032_v42  ;;  %vm4021_vm1 = vcmp.gt.f32.partialorder %v3858_v23, 0.0 }
 0xb16   : > { %v3863_v6 = vpop.f32.mrf.mxu0 }
 0xb17   : > { %v4046_v18 = vmul.f32 1.442695, %v4033_v5  ;;  %v3864_v7 = vadd.f32 %v3863_v6, %v7837_v16  ;;  %v4038_v48 = vmin.f32 %v3862_v9, 0.0  ;;  %5442 = vpow2.f32 %v4044_v19 }
 0xb18   : > { %vm4026_vm10 = vcmp.gt.f32.partialorder %v3862_v9, 0.0 }
 0xb19   : > { %v4039_v49 = vmin.f32 %v3864_v7, 0.0  ;;  %v3932_v38 = vpop.f32.mrf.mxu0  ;;  %v4056_v44 = vmul.f32 1.442695, %v4038_v48  ;;  %5444 = vpow2.f32 %v4046_v18  ;;  %vm4027_vm4 = vcmp.gt.f32.partialorder %v3864_v7, 0.0 }
 0xb1a   : > { %v7843_v56 = vadd.f32 %v3932_v38, %v7834_v57 }
 0xb1b   : > { %v4058_v39 = vmul.f32 1.442695, %v4039_v49  ;;  %v3934_v24 = vpop.f32.mrf.mxu0  ;;  %5446 = vpow2.f32 %v4056_v44 }
 0xb1c   : > { %v7846_v10 = vadd.f32 %v3934_v24, %v7834_v57  ;;  %v4034_v0 = vmin.f32 %v7843_v56, 0.0  ;;  %vm4022_vm0 = vcmp.gt.f32.partialorder %v7843_v56, 0.0 }
 0xb1d   : > { %5448 = vpow2.f32 %v4058_v39  ;;  %v3938_v1 = vpop.f32.mrf.mxu0 }
 0xb1e   : > { %v4035_v40 = vmin.f32 %v7846_v10, 0.0  ;;  %v3939_v55 = vadd.f32 %v3938_v1, %v7837_v16  ;;  %v4048_v41 = vmul.f32 1.442695, %v4034_v0  ;;  %vm4023_vm14 = vcmp.gt.f32.partialorder %v7846_v10, 0.0 }
 0xb1f   : > { %v3940_v46 = vpop.f32.mrf.mxu0 }
 0xb20   : > { %v4040_v28 = vmin.f32 %v3939_v55, 0.0  ;;  %v3941_v47 = vadd.f32 %v3940_v46, %v7837_v16  ;;  %v4050_v22 = vmul.f32 1.442695, %v4035_v40  ;;  %vm4028_vm13 = vcmp.gt.f32.partialorder %v3939_v55, 0.0  ;;  %v4096_v40 = vpop.permute.xlu1 %4095 }
 0xb22   : > { %v4060_v14 = vmul.f32 1.442695, %v4040_v28  ;;  %v4041_v37 = vmin.f32 %v3941_v47, 0.0  ;;  %vm4029_vm12 = vcmp.gt.f32.partialorder %v3941_v47, 0.0 }
 0xb24   : > { %5450 = vpow2.f32 %v4060_v14  ;;  %v4062_v8 = vmul.f32 1.442695, %v4041_v37  ;;  %v5443_v32 = vpop.eup %5442 }
 0xb25   : > { %5452 = vpow2.f32 %v4048_v41  ;;  %v5109_v26 = vadd.f32 -1.0, %v5443_v32 }
 0xb26   : > { %5454 = vpow2.f32 %v4050_v22  ;;  %v5445_v29 = vpop.eup %5444 }
 0xb27   : > { %5456 = vpow2.f32 %v4062_v8  ;;  %v5110_v51 = vadd.f32 -1.0, %v5445_v29  ;;  %v4080_v58 = vsel %vm4020_vm9, %v3856_v33, %v5109_v26 }
 0xb28   : > { %v5447_v36 = vpop.eup %5446 }
 0xb29   : > { %v5115_v30 = vadd.f32 -1.0, %v5447_v36  ;;  %v4081_v34 = vsel %vm4021_vm1, %v3858_v23, %v5110_v51 }
 0xb2a   : > { %v5449_v3 = vpop.eup %5448 }
 0xb2b   : > { %v5116_v43 = vadd.f32 -1.0, %v5449_v3  ;;  %v4086_v27 = vsel %vm4026_vm10, %v3862_v9, %v5115_v30 }
 0xb2d   : > { %v4087_v17 = vsel %vm4027_vm4, %v3864_v7, %v5116_v43 }
 0xb2e   : > { %4128 = vmatprep.subr.mxu0 %v4087_v17 }
 0xb2f   : > { %4129 = vmatpush1.msra.mxu0 %v4086_v27 }
 0xb30   : > { %4130 = vmatprep.subr.mxu0 %v4081_v34 }
 0xb31   : > { %v4009_v54 = vpop.f32.mrf.mxu0  ;;  %4131 = vmatpush1.msra.mxu0 %v4080_v58  ;;  %v5451_v35 = vpop.eup %5450 }
 0xb32   : > { %v4010_v13 = vadd.f32 %v4009_v54, %v7834_v57  ;;  %5121 = vmatmul.mubr.msk.f32.vlgmr.msra.gmra.mxu0 %vm3784_vm8, %v7760_v11  ;;  %v5453_v2 = vpop.eup %5452  ;;  %v5117_v62 = vadd.f32 -1.0, %v5451_v35 }
 0xb33   : > { %v4011_v12 = vpop.f32.mrf.mxu0  ;;  %4306 = vmatprep.mubr.f32.mxu0 %v5532_v15  ;;  %v5455_v45 = vpop.eup %5454  ;;  %v5111_v61 = vadd.f32 -1.0, %v5453_v2 }
 0xb34   : > { %v4012_v20 = vadd.f32 %v4011_v12, %v7834_v57  ;;  %v5457_v4 = vpop.eup %5456  ;;  %v4036_v60 = vmin.f32 %v4010_v13, 0.0  ;;  %v5112_v63 = vadd.f32 -1.0, %v5455_v45  ;;  %v4088_v5 = vsel %vm4028_vm13, %v3939_v55, %v5117_v62 }
 0xb35   : > { %v4015_v50 = vpop.f32.mrf.mxu0  ;;  %v5118_v21 = vadd.f32 -1.0, %v5457_v4  ;;  %v4082_v6 = vsel %vm4022_vm0, %v7843_v56, %v5111_v61  ;;  %vm4024_vm6 = vcmp.gt.f32.partialorder %v4010_v13, 0.0 }
 0xb36   : > { %v4037_v25 = vmin.f32 %v4012_v20, 0.0  ;;  %v4016_v59 = vadd.f32 %v4015_v50, %v7837_v16  ;;  %v4052_v31 = vmul.f32 1.442695, %v4036_v60  ;;  %v4083_v19 = vsel %vm4023_vm14, %v7846_v10, %v5112_v63 }
 0xb37   : > { %v4017_v52 = vpop.f32.mrf.mxu0  ;;  %v4089_v23 = vsel %vm4029_vm12, %v3941_v47, %v5118_v21  ;;  %vm4025_vm3 = vcmp.gt.f32.partialorder %v4012_v20, 0.0 }
 0xb38   : > { %v4042_v33 = vmin.f32 %v4016_v59, 0.0  ;;  %v4054_v42 = vmul.f32 1.442695, %v4037_v25  ;;  %v4018_v15 = vadd.f32 %v4017_v52, %v7837_v16  ;;  %4199 = vmatprep.subr.mxu1 %v4089_v23  ;;  %vm4030_vm5 = vcmp.gt.f32.partialorder %v4016_v59, 0.0 }
 0xb39   : > { %4200 = vmatpush1.msra.mxu1 %v4088_v5 }
 0xb3a   : > { %v4064_v57 = vmul.f32 1.442695, %v4042_v33  ;;  %v4043_v9 = vmin.f32 %v4018_v15, 0.0  ;;  %4201 = vmatprep.subr.mxu1 %v4083_v19  ;;  %vm4031_vm2 = vcmp.gt.f32.partialorder %v4018_v15, 0.0 }
 0xb3b   : > { %4202 = vmatpush1.msra.mxu1 %v4082_v6 }
 0xb3c   : > { %5458 = vpow2.f32 %v4064_v57  ;;  %v4066_v18 = vmul.f32 1.442695, %v4043_v9  ;;  %5122 = vmatmul.mubr.msk.f32.vlgmr.msra.gmra.mxu1 %vm3784_vm8, %v7760_v11 }
 0xb3d   : > { %5460 = vpow2.f32 %v4054_v42 }
 0xb3e   : > { %5462 = vpow2.f32 %v4052_v31 }
 0xb3f   : > { %5464 = vpow2.f32 %v4066_v18 }
 0xb49   : > { %v5459_v16 = vpop.eup %5458 }
 0xb4a   : > { %v5461_v7 = vpop.eup %5460  ;;  %v5119_v38 = vadd.f32 -1.0, %v5459_v16 }
 0xb4b   : > { %v5463_v48 = vpop.eup %5462  ;;  %v5114_v39 = vadd.f32 -1.0, %v5461_v7 }
 0xb4c   : > { %v5465_v49 = vpop.eup %5464  ;;  %v5113_v24 = vadd.f32 -1.0, %v5463_v48  ;;  %v4090_v56 = vsel %vm4030_vm5, %v4016_v59, %v5119_v38 }
 0xb4d   : > { %v5120_v44 = vadd.f32 -1.0, %v5465_v49  ;;  %v4085_v0 = vsel %vm4025_vm3, %v4012_v20, %v5114_v39 }
 0xb4e   : > { %v4084_v1 = vsel %vm4024_vm6, %v4010_v13, %v5113_v24 }
 0xb4f   : > { %v4091_v10 = vsel %vm4031_vm2, %v4018_v15, %v5120_v44 }
 0xb50   : > { %4270 = vmatprep.subr.mxu0 %v4091_v10 }
 0xb51   : > { %4271 = vmatpush1.msra.mxu0 %v4090_v56 }
 0xb52   : > { %4272 = vmatprep.subr.mxu0 %v4085_v0 }
 0xb53   : > { %4273 = vmatpush1.msra.mxu0 %v4084_v1 }
 0xb54   : > { %5123 = vmatmul.mubr.msk.f32.vlgmr.msra.gmra.mxu0 %vm3784_vm8, %v7760_v11 }
 0xbf2   : > { %v4166_v55 = vpop.f32.mrf.mxu0 }
 0xbf3   : > { %v4167_v46 = vadd.f32 %v4166_v55, %v4096_v40 }
 0xbf4   : > { %v4168_v28 = vpop.f32.mrf.mxu0 }
 0xbf5   : > { %v7870_v41 = vsel %vm4313_vm11, %v4167_v46, -1e+30  ;;  %v4169_v47 = vadd.f32 %v4168_v28, %v4096_v40 }
 0xbf6   : > { %v4320_v22 = vrot.slane %v7870_v41, 4 }
 0xbf7   : > { %v7875_v14 = vsel %vm4313_vm11, %v4169_v47, -1e+30 }
 0xbf8   : > { %v4321_v37 = vmax.f32 %v7870_v41, %v4320_v22  ;;  %v4326_v11 = vrot.slane %v7875_v14, 4 }
 0xbfa   : > { %v4322_v8 = vrot.slane %v4321_v37, 2  ;;  %v4327_v32 = vmax.f32 %v7875_v14, %v4326_v11 }
 0xbfc   : > { %v4323_v29 = vmax.f32 %v4321_v37, %v4322_v8  ;;  %v4328_v36 = vrot.slane %v4327_v32, 2  ;;  %v4237_v43 = vpop.f32.mrf.mxu1 }
 0xbfd   : > { %v4238_v51 = vadd.f32 %v4237_v43, %v4096_v40 }
 0xbfe   : > { %v4324_v3 = vrot.slane %v4323_v29, 1  ;;  %v4329_v30 = vmax.f32 %v4327_v32, %v4328_v36  ;;  %v4239_v27 = vpop.f32.mrf.mxu1 }
 0xbff   : > { %v7884_v34 = vsel %vm4313_vm11, %v4238_v51, -1e+30  ;;  %v4240_v58 = vadd.f32 %v4239_v27, %v4096_v40 }
 0xc00   : > { %v7880_v26 = vmax.f32 %v4323_v29, %v4324_v3  ;;  %v4330_v17 = vrot.slane %v4329_v30, 1  ;;  %v4332_v13 = vrot.slane %v7884_v34, 4 }
 0xc01   : > { %v7893_v2 = vsel %vm4313_vm11, %v4240_v58, -1e+30 }
 0xc02   : > { %v4356_v54 = vsub.f32 %v7870_v41, %v7880_v26  ;;  %v7888_v35 = vmax.f32 %v4329_v30, %v4330_v17  ;;  %v4333_v20 = vmax.f32 %v7884_v34, %v4332_v13  ;;  %v4338_v4 = vrot.slane %v7893_v2, 4 }
 0xc04   : > { %v4362_v12 = vmul.f32 1.442695, %v4356_v54  ;;  %v4357_v45 = vsub.f32 %v7875_v14, %v7888_v35  ;;  %v4334_v62 = vrot.slane %v4333_v20, 2  ;;  %v4339_v60 = vmax.f32 %v7893_v2, %v4338_v4 }
 0xc06   : > { %5466 = vpow2.f32 %v4362_v12  ;;  %v4364_v50 = vmul.f32 1.442695, %v4357_v45  ;;  %v4335_v25 = vmax.f32 %v4333_v20, %v4334_v62  ;;  %v4340_v59 = vrot.slane %v4339_v60, 2 }
 0xc08   : > { %5468 = vpow2.f32 %v4364_v50  ;;  %v4336_v21 = vrot.slane %v4335_v25, 1  ;;  %v4341_v52 = vmax.f32 %v4339_v60, %v4340_v59 }
 0xc0a   : > { %v7900_v63 = vmax.f32 %v4335_v25, %v4336_v21  ;;  %v4342_v33 = vrot.slane %v4341_v52, 1 }
 0xc0c   : > { %v4358_v61 = vsub.f32 %v7884_v34, %v7900_v63  ;;  %v7904_v42 = vmax.f32 %v4341_v52, %v4342_v33 }
 0xc0e   : > { %v4366_v15 = vmul.f32 1.442695, %v4358_v61  ;;  %v4359_v23 = vsub.f32 %v7893_v2, %v7904_v42 }
 0xc10   : > { %5470 = vpow2.f32 %v4366_v15  ;;  %v4368_v31 = vmul.f32 1.442695, %v4359_v23 }
 0xc12   : > { %5472 = vpow2.f32 %v4368_v31 }
 0xc13   : > { %v5467_v57 = vpop.eup %5466 }
 0xc14   : > { %v4374_v5 = vrot.slane %v5467_v57, 4  ;;  %v4308_v9 = vpop.f32.mrf.mxu0 }
 0xc15   : > { %v5469_v19 = vpop.eup %5468  ;;  %v4309_v6 = vadd.f32 %v4308_v9, %v4096_v40 }
 0xc16   : > { %v4375_v18 = vadd.f32 %v5467_v57, %v4374_v5  ;;  %v4380_v16 = vrot.slane %v5469_v19, 4  ;;  %v4310_v7 = vpop.f32.mrf.mxu0 }
 0xc17   : > { %v7910_v48 = vsel %vm4313_vm11, %v4309_v6, -1e+30  ;;  %v4311_v49 = vadd.f32 %v4310_v7, %v4096_v40 }
 0xc18   : > { %v4376_v38 = vrot.slane %v4375_v18, 2  ;;  %v4381_v44 = vadd.f32 %v5469_v19, %v4380_v16  ;;  %v4344_v39 = vrot.slane %v7910_v48, 4 }
 0xc19   : > { %v7915_v24 = vsel %vm4313_vm11, %v4311_v49, -1e+30 }
 0xc1a   : > { %v4377_v10 = vadd.f32 %v4376_v38, %v4375_v18  ;;  %v4382_v56 = vrot.slane %v4381_v44, 2  ;;  %v4345_v0 = vmax.f32 %v7910_v48, %v4344_v39  ;;  %v4350_v1 = vrot.slane %v7915_v24, 4 }
 0xc1c   : > { %v4378_v55 = vrot.slane %v4377_v10, 1  ;;  %v4383_v46 = vadd.f32 %v4382_v56, %v4381_v44  ;;  %v4346_v28 = vrot.slane %v4345_v0, 2  ;;  %v4351_v47 = vmax.f32 %v7915_v24, %v4350_v1 }
 0xc1d   : > { %v5471_v8 = vpop.eup %5470 }
 0xc1e   : > { %v4379_v40 = vadd.f32 %v4378_v55, %v4377_v10  ;;  %v4384_v22 = vrot.slane %v4383_v46, 1  ;;  %v4347_v37 = vmax.f32 %v4345_v0, %v4346_v28  ;;  %v4352_v11 = vrot.slane %v4351_v47, 2 }
 0xc1f   : > { %v4386_v32 = vrot.slane %v5471_v8, 4  ;;  %v5473_v36 = vpop.eup %5472 }
 0xc20   : > { %5474 = vlog2.f32 %v4379_v40  ;;  %v4385_v53 = vadd.f32 %v4384_v22, %v4383_v46  ;;  %v4348_v29 = vrot.slane %v4347_v37, 1  ;;  %v4353_v3 = vmax.f32 %v4351_v47, %v4352_v11 }
 0xc21   : > { %v4387_v30 = vadd.f32 %v5471_v8, %v4386_v32  ;;  %v4392_v43 = vrot.slane %v5473_v36, 4 }
 0xc22   : > { %5476 = vlog2.f32 %v4385_v53  ;;  %v4349_v51 = vmax.f32 %v4347_v37, %v4348_v29  ;;  %v4354_v17 = vrot.slane %v4353_v3, 1 }
 0xc23   : > { %v4388_v27 = vrot.slane %v4387_v30, 2  ;;  %v4393_v58 = vadd.f32 %v5473_v36, %v4392_v43 }
 0xc24   : > { %v4360_v54 = vsub.f32 %v7910_v48, %v4349_v51  ;;  %v4355_v13 = vmax.f32 %v4353_v3, %v4354_v17 }
 0xc25   : > { %v4389_v12 = vadd.f32 %v4388_v27, %v4387_v30  ;;  %v4394_v45 = vrot.slane %v4393_v58, 2 }
 0xc26   : > { %v4370_v20 = vmul.f32 1.442695, %v4360_v54  ;;  %v4361_v4 = vsub.f32 %v7915_v24, %v4355_v13 }
 0xc27   : > { %v4390_v50 = vrot.slane %v4389_v12, 1  ;;  %v4395_v62 = vadd.f32 %v4394_v45, %v4393_v58 }
 0xc28   : > { %5478 = vpow2.f32 %v4370_v20  ;;  %v4372_v60 = vmul.f32 1.442695, %v4361_v4 }
 0xc29   : > { %v4391_v25 = vadd.f32 %v4390_v50, %v4389_v12  ;;  %v4396_v59 = vrot.slane %v4395_v62, 1 }
 0xc2a   : > { %5480 = vpow2.f32 %v4372_v60 }
 0xc2b   : > { %5482 = vlog2.f32 %v4391_v25  ;;  %v4397_v21 = vadd.f32 %v4396_v59, %v4395_v62 }
 0xc2d   : > { %v5475_v52 = vpop.eup %5474  ;;  %5484 = vlog2.f32 %v4397_v21 }
 0xc2e   : > { %v4411_v33 = vmul.f32 0.6931472, %v5475_v52 }
 0xc2f   : > { %v5477_v61 = vpop.eup %5476 }
 0xc30   : > { %v4422_v15 = vadd.f32 %v4411_v33, %v7880_v26  ;;  %v4413_v23 = vmul.f32 0.6931472, %v5477_v61 }
 0xc32   : > { %v4428_v31 = vsub.f32 %v7870_v41, %v4422_v15  ;;  %v4423_v57 = vadd.f32 %v4413_v23, %v7888_v35 }
 0xc34   : > { %4434 = vst [vmem:[%s7964_s5] sm:$0xff] %v4428_v31  ;;  %v4429_v5 = vsub.f32 %v7875_v14, %v4423_v57 }
 0xc35   : > { %v5479_v9 = vpop.eup %5478 }
 0xc36   : > { %4435 = vst [vmem:[%s7964_s5 + $0x8] sm:$0xff] %v4429_v5  ;;  %v4398_v19 = vrot.slane %v5479_v9, 4 }
 0xc37   : > { %v5481_v6 = vpop.eup %5480 }
 0xc38   : > { %v4399_v18 = vadd.f32 %v5479_v9, %v4398_v19  ;;  %v5483_v26 = vpop.eup %5482  ;;  %v4404_v16 = vrot.slane %v5481_v6, 4 }
 0xc39   : > { %v4415_v7 = vmul.f32 0.6931472, %v5483_v26 }
 0xc3a   : > { %v4400_v41 = vrot.slane %v4399_v18, 2  ;;  %v5485_v49 = vpop.eup %5484  ;;  %v4405_v35 = vadd.f32 %v5481_v6, %v4404_v16 }
 0xc3b   : > { %v4424_v38 = vadd.f32 %v4415_v7, %v7900_v63  ;;  %v4417_v44 = vmul.f32 0.6931472, %v5485_v49 }
 0xc3c   : > { %v4401_v39 = vadd.f32 %v4400_v41, %v4399_v18  ;;  %v4406_v10 = vrot.slane %v4405_v35, 2 }
 0xc3d   : > { %v4430_v14 = vsub.f32 %v7884_v34, %v4424_v38  ;;  %v4425_v56 = vadd.f32 %v4417_v44, %v7904_v42 }
 0xc3e   : > { %v4402_v0 = vrot.slane %v4401_v39, 1  ;;  %v4407_v1 = vadd.f32 %v4406_v10, %v4405_v35 }
 0xc3f   : > { %4436 = vst [vmem:[%s7964_s5 + $0x10] sm:$0xff] %v4430_v14  ;;  %v4431_v55 = vsub.f32 %v7893_v2, %v4425_v56 }
 0xc40   : > { %v4403_v46 = vadd.f32 %v4402_v0, %v4401_v39  ;;  %v4408_v28 = vrot.slane %v4407_v1, 1 }
 0xc41   : > { %4437 = vst [vmem:[%s7964_s5 + $0x18] sm:$0xff] %v4431_v55 }
 0xc42   : > { %5486 = vlog2.f32 %v4403_v46  ;;  %v4409_v63 = vadd.f32 %v4408_v28, %v4407_v1 }
 0xc44   : > { %5488 = vlog2.f32 %v4409_v63 }
 0xc4f   : > { %v5487_v34 = vpop.eup %5486 }
 0xc50   : > { %v4419_v47 = vmul.f32 0.6931472, %v5487_v34 }
 0xc51   : > { %v5489_v42 = vpop.eup %5488 }
 0xc52   : > { %v4426_v40 = vadd.f32 %v4419_v47, %v4349_v51  ;;  %v4421_v22 = vmul.f32 0.6931472, %v5489_v42 }
 0xc54   : > { %v4432_v37 = vsub.f32 %v7910_v48, %v4426_v40  ;;  %v4427_v11 = vadd.f32 %v4421_v22, %v4355_v13 }
 0xc56   : > { %4438 = vst [vmem:[%s7964_s5 + $0x20] sm:$0xff] %v4432_v37  ;;  %v4433_v2 = vsub.f32 %v7915_v24, %v4427_v11 }
 0xc58   : > { %4439 = vst [vmem:[%s7964_s5 + $0x28] sm:$0xff] %v4433_v2 }
 0xc59 PF: > { %s15_s20 = sadd.s32 1, %s5512_s20   ;;  %s8705_s18 = smov %s5508_s19 }
 0xc5a   : > { %p12_p8 = scmp.ge.s32.totalorder %s15_s20, 4   ;;  %s8706_s19 = smov %s8708_s21 }
 0xc5c   :  { %14 = sbr.rel (!%p12_p8) target bundleno = 2 (0x2), region = 93 }

</bundles_post_ra>
